<compile_context>
chip_gen: v7x
topology: tpu7x:2x2x1
jax: 0.10.0
libtpu: 0.0.40
codegen_flags: <defaults>
</compile_context>

<pallas_src>
import functools

import jax
import jax.numpy as jnp
from jax.experimental import pallas as pl
from jax.experimental.pallas import tpu as pltpu

INPOS = 3            # positional input features
INVIEW = 3           # view-direction input features
DENSE = 256          # dense_features
DEPTH = 8            # dense_depth
SKIP = 4             # skips=[4] -> hidden-loop index 4 consumes the pos skip
HALF = DENSE // 2
MAX_TILE = 1024      # rows per grid step (upper bound, see _pick_tile)


def _nerf_kernel(x_ref, w_small_ref, b0_ref, wh_ref, bh_ref,
                 wf_ref, bf_ref, wr1x_ref, br1_ref,
                 wr2_ref, wd_ref, b_head_ref, out_ref,
                 *, n_hidden, skip_layer):
    f32, bf16 = jnp.float32, jnp.bfloat16
    xin = x_ref[...].astype(bf16)                                # (T, 6)

    # Fused skinny matmul: proj = [pos@W0 | pos@W_skip | view@W_rad1v]
    proj = jnp.dot(xin, w_small_ref[...], preferred_element_type=f32)  # (T,640)
    skip_add = proj[:, DENSE:2 * DENSE]                          # (T, 256) f32
    view_term = proj[:, 2 * DENSE:]                              # (T, 128) f32

    # density_dense[0]: Linear(3, 256) + ReLU (ReLU fused with the bf16 cast).
    h = jnp.maximum(proj[:, :DENSE] + b0_ref[...], 0.0).astype(bf16)

    # density_dense[1..7]: Linear(256, 256) + ReLU; pos skip folded into the
    # skip layer as pos @ W[:3]  (torch.cat((pos, x)) @ W == pos@W[:3]+x@W[3:])
    for j in range(n_hidden):
        z = jnp.dot(h, wh_ref[j], preferred_element_type=f32) + bh_ref[j]
        if j == skip_layer:
            z = z + skip_add
        h = jnp.maximum(z, 0.0).astype(bf16)

    # feature_output (no activation), then radiance hidden layer.
    feat = (jnp.dot(h, wf_ref[...], preferred_element_type=f32)
            + bf_ref[...]).astype(bf16)
    r1 = jnp.maximum(
        jnp.dot(feat, wr1x_ref[...], preferred_element_type=f32)
        + view_term + br1_ref[...], 0.0).astype(bf16)

    # Output head [radiance | density]: two zero-padded N=4 matmuls summed in
    # f32 (avoids a (T, 384) lane concatenate).
    out_ref[...] = (jnp.dot(r1, wr2_ref[...], preferred_element_type=f32)
                    + jnp.dot(h, wd_ref[...], preferred_element_type=f32)
                    + b_head_ref[...])


def init_params(key, inpos=INPOS, inview=INVIEW, dense=DENSE, depth=DEPTH):
    """Deterministic synthetic parameters (He-style init), all float32."""
    n_hidden = depth - 1
    half = dense // 2
    ks = jax.random.split(key, 16)

    def w(k, shape):
        fan_in = shape[-2]
        return (jax.random.normal(k, shape, jnp.float32)
                * jnp.sqrt(2.0 / fan_in)).astype(jnp.float32)

    def b(k, shape):
        return (jax.random.normal(k, shape, jnp.float32) * 0.01).astype(jnp.float32)

    w0 = w(ks[0], (inpos, dense));            b0 = b(ks[1], (1, dense))
    wh = w(ks[2], (n_hidden, dense, dense));  bh = b(ks[3], (n_hidden, 1, dense))
    wp_skip = w(ks[4], (inpos, dense))        # pos part of the skip layer weight
    wf = w(ks[5], (dense, dense));            bf_ = b(ks[6], (1, dense))
    wd = w(ks[7], (dense, 1));                bd = b(ks[8], (1, 1))
    wr1x = w(ks[9], (dense, half))
    wr1v = w(ks[10], (inview, half));         br1 = b(ks[11], (1, half))
    wr2 = w(ks[12], (half, 3));               br2 = b(ks[13], (1, 3))
    return (w0, b0, wh, bh, wp_skip, wf, bf_, wd, bd,
            wr1x, wr1v, br1, wr2, br2)


def pack_params(params):
    """Build the kernel operand list: fused block matrices + bf16 weights."""
    (w0, b0, wh, bh, wp_skip, wf, bf_, wd, bd,
     wr1x, wr1v, br1, wr2, br2) = params
    inpos, dense = w0.shape
    inview = wr1v.shape[0]
    half = wr1x.shape[1]
    bf16 = jnp.bfloat16

    # [pos rows -> (W0 | W_skip)] , [view rows -> W_rad1v]   (6, 640)
    w_small = jnp.zeros((inpos + inview, 2 * dense + half), jnp.float32)
    w_small = w_small.at[:inpos, :dense].set(w0)
    w_small = w_small.at[:inpos, dense:2 * dense].set(wp_skip)
    w_small = w_small.at[inpos:, 2 * dense:].set(wr1v)

    # Radiance layer-2 and density head, each zero-padded to 4 output lanes so
    # their (T, 4) results can simply be summed (no concatenate in the kernel).
    wr2_pad = jnp.zeros((half, 4), jnp.float32).at[:, :3].set(wr2)
    wd_pad = jnp.zeros((dense, 4), jnp.float32).at[:, 3:].set(wd)
    b_head = jnp.concatenate([br2, bd], axis=-1)                 # (1, 4)

    return (w_small.astype(bf16), b0, wh.astype(bf16), bh,
            wf.astype(bf16), bf_, wr1x.astype(bf16), br1,
            wr2_pad.astype(bf16), wd_pad.astype(bf16), b_head)


def _num_tensorcores():
    """Best-effort TensorCore count per JAX device (2 on v7x / megacore)."""
    try:
        d = jax.devices()[0]
        nc = getattr(d, "num_cores", None)
        if nc:
            return int(nc)
        kind = str(getattr(d, "device_kind", "")).lower()
        if "v7" in kind or "v4" in kind or "v5p" in kind:
            return 2
    except Exception:
        pass
    return 1


def _pick_tile(n, num_cores=1, max_tile=MAX_TILE):
    """Rows per grid step (multiple of 128).

    Single-TC chips (v5e/v6e): one tile as large as possible (<= max_tile);
    splitting small batches only doubles per-step overhead.
    Dual-TC chips (v7x / megacore): keep the grid-step count a multiple of
    num_cores so the 'parallel' axis load-balances across TensorCores.
    """
    max_chunks = max(1, max_tile // 128)
    chunks = max(1, pl.cdiv(n, 128))            # 128-row units of real work
    if num_cores <= 1 or chunks < 2:
        return 128 * min(chunks, max_chunks)
    steps = max(num_cores, pl.cdiv(chunks, max_chunks))
    steps = pl.cdiv(steps, num_cores) * num_cores
    return 128 * max(1, pl.cdiv(chunks, steps))


def nerf_forward(x, params, *, tile=None):
    """x: [..., inpos+inview] float32  ->  [..., 4] float32."""
    feat_in = x.shape[-1]
    lead = x.shape[:-1]
    xf = x.reshape(-1, feat_in)
    n = xf.shape[0]
    if tile is None:
        tile = _pick_tile(n, _num_tensorcores())
    n_pad = pl.cdiv(n, tile) * tile
    if n_pad != n:
        xf = jnp.pad(xf, ((0, n_pad - n), (0, 0)))

    kparams = pack_params(params)
    n_hidden = params[2].shape[0]
    weight_bytes = sum(int(p.size) * p.dtype.itemsize for p in kparams)

    def full_spec(a):
        nd = a.ndim
        return pl.BlockSpec(a.shape, lambda i, _nd=nd: (0,) * _nd)

    in_specs = ([pl.BlockSpec((tile, feat_in), lambda i: (i, 0))]
                + [full_spec(p) for p in kparams])

    # ~1.12 MFLOP per row vs ~40 B/row of HBM traffic: firmly MXU-bound.
    macs_per_row = (2 * INPOS * DENSE + INVIEW * HALF
                    + n_hidden * DENSE * DENSE + DENSE * DENSE
                    + DENSE * HALF + DENSE * 1 + HALF * 3)
    cost = pl.CostEstimate(
        flops=2 * macs_per_row * n_pad,
        transcendentals=0,
        bytes_accessed=n_pad * (feat_in + 4) * 4 + weight_bytes)

    # Scoped-VMEM budget: double-buffered resident weights + per-row live
    # f32/bf16 intermediates, clamped below v7x's 64 MiB physical VMEM.
    vmem_limit = int(min(56 * 1024 * 1024,
                         max(40 * 1024 * 1024,
                             2 * weight_bytes + tile * 16 * 1024
                             + 8 * 1024 * 1024)))

    out = pl.pallas_call(
        functools.partial(_nerf_kernel, n_hidden=n_hidden, skip_layer=SKIP),
        out_shape=jax.ShapeDtypeStruct((n_pad, 4), jnp.float32),
        grid=(n_pad // tile,),
        in_specs=in_specs,
        # 4-wide output tile -> masked stores; negligible vs 11 MXU matmuls
        # per tile (kept narrow to avoid 32x HBM write traffic).
        out_specs=pl.BlockSpec((tile, 4), lambda i: (i, 0)),
        compiler_params=pltpu.CompilerParams(
            dimension_semantics=("parallel",),
            vmem_limit_bytes=vmem_limit),
        cost_estimate=cost,
    )(xf, *kparams)

    return out[:n].reshape(*lead, 4)


def nerf_ref(x, params):
    """Pure-JAX f32 reference identical to the PyTorch forward."""
    (w0, b0, wh, bh, wp_skip, wf, bf_, wd, bd,
     wr1x, wr1v, br1, wr2, br2) = params
    pos, view = x[..., :INPOS], x[..., INPOS:]
    h = jax.nn.relu(pos @ w0 + b0[0])
    for j in range(wh.shape[0]):
        z = h @ wh[j] + bh[j, 0]
        if j == SKIP:
            z = z + pos @ wp_skip
        h = jax.nn.relu(z)
    feat = h @ wf + bf_[0]
    dens = h @ wd + bd[0]
    r1 = jax.nn.relu(feat @ wr1x + view @ wr1v + br1[0])
    rad = r1 @ wr2 + br2[0]
    return jnp.concatenate([rad, dens], axis=-1)


def nerf_ref_bf16(x, params):
    """Pure-JAX reference with the kernel's exact numerics: bf16 matmul
    operands (weights AND activations), f32 accumulation, f32 bias/skip/ReLU."""
    (w0, b0, wh, bh, wp_skip, wf, bf_, wd, bd,
     wr1x, wr1v, br1, wr2, br2) = params
    bf16, f32 = jnp.bfloat16, jnp.float32

    def mm(a, w):
        return jnp.dot(a.astype(bf16), w.astype(bf16),
                       preferred_element_type=f32)

    pos, view = x[..., :INPOS], x[..., INPOS:]
    skip_add = mm(pos, wp_skip)
    view_term = mm(view, wr1v)
    h = jax.nn.relu(mm(pos, w0) + b0[0])
    for j in range(wh.shape[0]):
        z = mm(h, wh[j]) + bh[j, 0]
        if j == SKIP:
            z = z + skip_add
        h = jax.nn.relu(z)
    feat = mm(h, wf) + bf_[0]
    r1 = jax.nn.relu(mm(feat, wr1x) + view_term + br1[0])
    rad = mm(r1, wr2) + br2[0]
    dens = mm(h, wd) + bd[0]
    return jnp.concatenate([rad, dens], axis=-1)


if __name__ == "__main__":
    key = jax.random.PRNGKey(0)
    kx, kp = jax.random.split(key)

    params = init_params(kp)
    # batch of rays x samples, each point has 3 pos + 3 view features
    x = jax.random.uniform(kx, (2, 128, INPOS + INVIEW), jnp.float32, -1.0, 1.0)

    out = jax.block_until_ready(nerf_forward(x, params))
    assert out.shape == (2, 128, 4), out.shape
    assert bool(jnp.all(jnp.isfinite(out)))

    # Matched-numerics check: pure-JAX forward applying the same bf16 rounding
    # to weights and activations that the kernel performs -> tight agreement.
    ref_bf16 = nerf_ref_bf16(x, params)
    err_m = float(jnp.max(jnp.abs(out - ref_bf16)))
    assert jnp.allclose(out, ref_bf16, atol=5e-3, rtol=5e-3), err_m

    # Semantics check against the full-f32 module reference.  bf16 matmul
    # operands through ~10 stacked 256-wide layers accumulate a few percent of
    # drift, so this tolerance is intentionally loose (documents the bf16
    # design choice; acceptable for NeRF).
    ref_f32 = nerf_ref(x, params)
    err_f = float(jnp.max(jnp.abs(out - ref_f32)))
    assert jnp.allclose(out, ref_f32, atol=2.5e-1, rtol=1e-1), err_f

    print("KERNEL_OK")
</pallas_src>

<mosaic_0001>
module attributes {stable_mosaic.version = 11 : i64} {
  func.func @_nerf_kernel(%arg0: i32, %arg1: memref<256x6xf32, #tpu.memory_space<vmem>>, %arg2: memref<6x640xbf16, #tpu.memory_space<vmem>>, %arg3: memref<1x256xf32, #tpu.memory_space<vmem>>, %arg4: memref<7x256x256xbf16, #tpu.memory_space<vmem>>, %arg5: memref<7x1x256xf32, #tpu.memory_space<vmem>>, %arg6: memref<256x256xbf16, #tpu.memory_space<vmem>>, %arg7: memref<1x256xf32, #tpu.memory_space<vmem>>, %arg8: memref<256x128xbf16, #tpu.memory_space<vmem>>, %arg9: memref<1x128xf32, #tpu.memory_space<vmem>>, %arg10: memref<128x4xbf16, #tpu.memory_space<vmem>>, %arg11: memref<256x4xbf16, #tpu.memory_space<vmem>>, %arg12: memref<1x4xf32, #tpu.memory_space<vmem>>, %arg13: memref<256x4xf32, #tpu.memory_space<vmem>>) attributes {dimension_semantics = [#tpu.dimension_semantics<parallel>], iteration_bounds = array<i64: 1>, scalar_prefetch = 0 : i64, scratch_operands = 0 : i64, tpu.core_type = #tpu.core_type<tc>, window_params = [{transform_indices = @transform_0, window_bounds = array<i64: 256, 6>}, {pipeline_mode = #tpu.pipeline_mode<synchronous>, transform_indices = @transform_1, window_bounds = array<i64: 6, 640>}, {pipeline_mode = #tpu.pipeline_mode<synchronous>, transform_indices = @transform_2, window_bounds = array<i64: 1, 256>}, {pipeline_mode = #tpu.pipeline_mode<synchronous>, transform_indices = @transform_3, window_bounds = array<i64: 7, 256, 256>}, {pipeline_mode = #tpu.pipeline_mode<synchronous>, transform_indices = @transform_4, window_bounds = array<i64: 7, 1, 256>}, {pipeline_mode = #tpu.pipeline_mode<synchronous>, transform_indices = @transform_5, window_bounds = array<i64: 256, 256>}, {pipeline_mode = #tpu.pipeline_mode<synchronous>, transform_indices = @transform_6, window_bounds = array<i64: 1, 256>}, {pipeline_mode = #tpu.pipeline_mode<synchronous>, transform_indices = @transform_7, window_bounds = array<i64: 256, 128>}, {pipeline_mode = #tpu.pipeline_mode<synchronous>, transform_indices = @transform_8, window_bounds = array<i64: 1, 128>}, {pipeline_mode = #tpu.pipeline_mode<synchronous>, transform_indices = @transform_9, window_bounds = array<i64: 128, 4>}, {pipeline_mode = #tpu.pipeline_mode<synchronous>, transform_indices = @transform_10, window_bounds = array<i64: 256, 4>}, {pipeline_mode = #tpu.pipeline_mode<synchronous>, transform_indices = @transform_11, window_bounds = array<i64: 1, 4>}, {transform_indices = @transform_12, window_bounds = array<i64: 256, 4>}]} {
    %c0 = arith.constant 0 : index
    %c0_0 = arith.constant 0 : index
    %0 = vector.load %arg1[%c0, %c0_0] : memref<256x6xf32, #tpu.memory_space<vmem>>, vector<256x6xf32>
    %1 = arith.truncf %0 : vector<256x6xf32> to vector<256x6xbf16>
    %c0_1 = arith.constant 0 : index
    %c0_2 = arith.constant 0 : index
    %2 = vector.load %arg2[%c0_1, %c0_2] : memref<6x640xbf16, #tpu.memory_space<vmem>>, vector<6x640xbf16>
    %cst = arith.constant dense<0.000000e+00> : vector<256x640xf32>
    %3 = tpu.matmul %1, %2, %cst {dimension_numbers = #tpu.dot_dimension_numbers<[1], [0], [0], [1], [0, 0, 1, 1], [], []>} : vector<256x6xbf16>, vector<6x640xbf16>, vector<256x640xf32> -> vector<256x640xf32>
    %4 = vector.extract_strided_slice %3 {offsets = [0, 256], sizes = [256, 256], strides = [1, 1]} : vector<256x640xf32> to vector<256x256xf32>
    %5 = vector.extract_strided_slice %3 {offsets = [0, 512], sizes = [256, 128], strides = [1, 1]} : vector<256x640xf32> to vector<256x128xf32>
    %6 = vector.extract_strided_slice %3 {offsets = [0, 0], sizes = [256, 256], strides = [1, 1]} : vector<256x640xf32> to vector<256x256xf32>
    %c0_3 = arith.constant 0 : index
    %c0_4 = arith.constant 0 : index
    %7 = vector.load %arg3[%c0_3, %c0_4] : memref<1x256xf32, #tpu.memory_space<vmem>>, vector<1x256xf32>
    %8 = vector.broadcast %7 : vector<1x256xf32> to vector<256x256xf32>
    %9 = arith.addf %6, %8 : vector<256x256xf32>
    %cst_5 = arith.constant 0.000000e+00 : f32
    %10 = vector.broadcast %cst_5 : f32 to vector<256x256xf32>
    %11 = arith.maximumf %9, %10 : vector<256x256xf32>
    %12 = arith.truncf %11 : vector<256x256xf32> to vector<256x256xbf16>
    %c0_6 = arith.constant 0 : index
    %c0_7 = arith.constant 0 : index
    %c0_8 = arith.constant 0 : index
    %13 = vector.load %arg4[%c0_6, %c0_7, %c0_8] : memref<7x256x256xbf16, #tpu.memory_space<vmem>>, vector<1x256x256xbf16>
    %14 = vector.shape_cast %13 : vector<1x256x256xbf16> to vector<256x256xbf16>
    %cst_9 = arith.constant dense<0.000000e+00> : vector<256x256xf32>
    %15 = tpu.matmul %12, %14, %cst_9 {dimension_numbers = #tpu.dot_dimension_numbers<[1], [0], [0], [1], [0, 0, 1, 1], [], []>} : vector<256x256xbf16>, vector<256x256xbf16>, vector<256x256xf32> -> vector<256x256xf32>
    %c0_10 = arith.constant 0 : index
    %c0_11 = arith.constant 0 : index
    %c0_12 = arith.constant 0 : index
    %16 = vector.load %arg5[%c0_10, %c0_11, %c0_12] : memref<7x1x256xf32, #tpu.memory_space<vmem>>, vector<1x1x256xf32>
    %17 = vector.shape_cast %16 : vector<1x1x256xf32> to vector<1x256xf32>
    %18 = vector.broadcast %17 : vector<1x256xf32> to vector<256x256xf32>
    %19 = arith.addf %15, %18 : vector<256x256xf32>
    %cst_13 = arith.constant 0.000000e+00 : f32
    %20 = vector.broadcast %cst_13 : f32 to vector<256x256xf32>
    %21 = arith.maximumf %19, %20 : vector<256x256xf32>
    %22 = arith.truncf %21 : vector<256x256xf32> to vector<256x256xbf16>
    %c1 = arith.constant 1 : index
    %c0_14 = arith.constant 0 : index
    %c0_15 = arith.constant 0 : index
    %23 = vector.load %arg4[%c1, %c0_14, %c0_15] : memref<7x256x256xbf16, #tpu.memory_space<vmem>>, vector<1x256x256xbf16>
    %24 = vector.shape_cast %23 : vector<1x256x256xbf16> to vector<256x256xbf16>
    %cst_16 = arith.constant dense<0.000000e+00> : vector<256x256xf32>
    %25 = tpu.matmul %22, %24, %cst_16 {dimension_numbers = #tpu.dot_dimension_numbers<[1], [0], [0], [1], [0, 0, 1, 1], [], []>} : vector<256x256xbf16>, vector<256x256xbf16>, vector<256x256xf32> -> vector<256x256xf32>
    %c1_17 = arith.constant 1 : index
    %c0_18 = arith.constant 0 : index
    %c0_19 = arith.constant 0 : index
    %26 = vector.load %arg5[%c1_17, %c0_18, %c0_19] : memref<7x1x256xf32, #tpu.memory_space<vmem>>, vector<1x1x256xf32>
    %27 = vector.shape_cast %26 : vector<1x1x256xf32> to vector<1x256xf32>
    %28 = vector.broadcast %27 : vector<1x256xf32> to vector<256x256xf32>
    %29 = arith.addf %25, %28 : vector<256x256xf32>
    %cst_20 = arith.constant 0.000000e+00 : f32
    %30 = vector.broadcast %cst_20 : f32 to vector<256x256xf32>
    %31 = arith.maximumf %29, %30 : vector<256x256xf32>
    %32 = arith.truncf %31 : vector<256x256xf32> to vector<256x256xbf16>
    %c2 = arith.constant 2 : index
    %c0_21 = arith.constant 0 : index
    %c0_22 = arith.constant 0 : index
    %33 = vector.load %arg4[%c2, %c0_21, %c0_22] : memref<7x256x256xbf16, #tpu.memory_space<vmem>>, vector<1x256x256xbf16>
    %34 = vector.shape_cast %33 : vector<1x256x256xbf16> to vector<256x256xbf16>
    %cst_23 = arith.constant dense<0.000000e+00> : vector<256x256xf32>
    %35 = tpu.matmul %32, %34, %cst_23 {dimension_numbers = #tpu.dot_dimension_numbers<[1], [0], [0], [1], [0, 0, 1, 1], [], []>} : vector<256x256xbf16>, vector<256x256xbf16>, vector<256x256xf32> -> vector<256x256xf32>
    %c2_24 = arith.constant 2 : index
    %c0_25 = arith.constant 0 : index
    %c0_26 = arith.constant 0 : index
    %36 = vector.load %arg5[%c2_24, %c0_25, %c0_26] : memref<7x1x256xf32, #tpu.memory_space<vmem>>, vector<1x1x256xf32>
    %37 = vector.shape_cast %36 : vector<1x1x256xf32> to vector<1x256xf32>
    %38 = vector.broadcast %37 : vector<1x256xf32> to vector<256x256xf32>
    %39 = arith.addf %35, %38 : vector<256x256xf32>
    %cst_27 = arith.constant 0.000000e+00 : f32
    %40 = vector.broadcast %cst_27 : f32 to vector<256x256xf32>
    %41 = arith.maximumf %39, %40 : vector<256x256xf32>
    %42 = arith.truncf %41 : vector<256x256xf32> to vector<256x256xbf16>
    %c3 = arith.constant 3 : index
    %c0_28 = arith.constant 0 : index
    %c0_29 = arith.constant 0 : index
    %43 = vector.load %arg4[%c3, %c0_28, %c0_29] : memref<7x256x256xbf16, #tpu.memory_space<vmem>>, vector<1x256x256xbf16>
    %44 = vector.shape_cast %43 : vector<1x256x256xbf16> to vector<256x256xbf16>
    %cst_30 = arith.constant dense<0.000000e+00> : vector<256x256xf32>
    %45 = tpu.matmul %42, %44, %cst_30 {dimension_numbers = #tpu.dot_dimension_numbers<[1], [0], [0], [1], [0, 0, 1, 1], [], []>} : vector<256x256xbf16>, vector<256x256xbf16>, vector<256x256xf32> -> vector<256x256xf32>
    %c3_31 = arith.constant 3 : index
    %c0_32 = arith.constant 0 : index
    %c0_33 = arith.constant 0 : index
    %46 = vector.load %arg5[%c3_31, %c0_32, %c0_33] : memref<7x1x256xf32, #tpu.memory_space<vmem>>, vector<1x1x256xf32>
    %47 = vector.shape_cast %46 : vector<1x1x256xf32> to vector<1x256xf32>
    %48 = vector.broadcast %47 : vector<1x256xf32> to vector<256x256xf32>
    %49 = arith.addf %45, %48 : vector<256x256xf32>
    %cst_34 = arith.constant 0.000000e+00 : f32
    %50 = vector.broadcast %cst_34 : f32 to vector<256x256xf32>
    %51 = arith.maximumf %49, %50 : vector<256x256xf32>
    %52 = arith.truncf %51 : vector<256x256xf32> to vector<256x256xbf16>
    %c4 = arith.constant 4 : index
    %c0_35 = arith.constant 0 : index
    %c0_36 = arith.constant 0 : index
    %53 = vector.load %arg4[%c4, %c0_35, %c0_36] : memref<7x256x256xbf16, #tpu.memory_space<vmem>>, vector<1x256x256xbf16>
    %54 = vector.shape_cast %53 : vector<1x256x256xbf16> to vector<256x256xbf16>
    %cst_37 = arith.constant dense<0.000000e+00> : vector<256x256xf32>
    %55 = tpu.matmul %52, %54, %cst_37 {dimension_numbers = #tpu.dot_dimension_numbers<[1], [0], [0], [1], [0, 0, 1, 1], [], []>} : vector<256x256xbf16>, vector<256x256xbf16>, vector<256x256xf32> -> vector<256x256xf32>
    %c4_38 = arith.constant 4 : index
    %c0_39 = arith.constant 0 : index
    %c0_40 = arith.constant 0 : index
    %56 = vector.load %arg5[%c4_38, %c0_39, %c0_40] : memref<7x1x256xf32, #tpu.memory_space<vmem>>, vector<1x1x256xf32>
    %57 = vector.shape_cast %56 : vector<1x1x256xf32> to vector<1x256xf32>
    %58 = vector.broadcast %57 : vector<1x256xf32> to vector<256x256xf32>
    %59 = arith.addf %55, %58 : vector<256x256xf32>
    %60 = arith.addf %59, %4 : vector<256x256xf32>
    %cst_41 = arith.constant 0.000000e+00 : f32
    %61 = vector.broadcast %cst_41 : f32 to vector<256x256xf32>
    %62 = arith.maximumf %60, %61 : vector<256x256xf32>
    %63 = arith.truncf %62 : vector<256x256xf32> to vector<256x256xbf16>
    %c5 = arith.constant 5 : index
    %c0_42 = arith.constant 0 : index
    %c0_43 = arith.constant 0 : index
    %64 = vector.load %arg4[%c5, %c0_42, %c0_43] : memref<7x256x256xbf16, #tpu.memory_space<vmem>>, vector<1x256x256xbf16>
    %65 = vector.shape_cast %64 : vector<1x256x256xbf16> to vector<256x256xbf16>
    %cst_44 = arith.constant dense<0.000000e+00> : vector<256x256xf32>
    %66 = tpu.matmul %63, %65, %cst_44 {dimension_numbers = #tpu.dot_dimension_numbers<[1], [0], [0], [1], [0, 0, 1, 1], [], []>} : vector<256x256xbf16>, vector<256x256xbf16>, vector<256x256xf32> -> vector<256x256xf32>
    %c5_45 = arith.constant 5 : index
    %c0_46 = arith.constant 0 : index
    %c0_47 = arith.constant 0 : index
    %67 = vector.load %arg5[%c5_45, %c0_46, %c0_47] : memref<7x1x256xf32, #tpu.memory_space<vmem>>, vector<1x1x256xf32>
    %68 = vector.shape_cast %67 : vector<1x1x256xf32> to vector<1x256xf32>
    %69 = vector.broadcast %68 : vector<1x256xf32> to vector<256x256xf32>
    %70 = arith.addf %66, %69 : vector<256x256xf32>
    %cst_48 = arith.constant 0.000000e+00 : f32
    %71 = vector.broadcast %cst_48 : f32 to vector<256x256xf32>
    %72 = arith.maximumf %70, %71 : vector<256x256xf32>
    %73 = arith.truncf %72 : vector<256x256xf32> to vector<256x256xbf16>
    %c6 = arith.constant 6 : index
    %c0_49 = arith.constant 0 : index
    %c0_50 = arith.constant 0 : index
    %74 = vector.load %arg4[%c6, %c0_49, %c0_50] : memref<7x256x256xbf16, #tpu.memory_space<vmem>>, vector<1x256x256xbf16>
    %75 = vector.shape_cast %74 : vector<1x256x256xbf16> to vector<256x256xbf16>
    %cst_51 = arith.constant dense<0.000000e+00> : vector<256x256xf32>
    %76 = tpu.matmul %73, %75, %cst_51 {dimension_numbers = #tpu.dot_dimension_numbers<[1], [0], [0], [1], [0, 0, 1, 1], [], []>} : vector<256x256xbf16>, vector<256x256xbf16>, vector<256x256xf32> -> vector<256x256xf32>
    %c6_52 = arith.constant 6 : index
    %c0_53 = arith.constant 0 : index
    %c0_54 = arith.constant 0 : index
    %77 = vector.load %arg5[%c6_52, %c0_53, %c0_54] : memref<7x1x256xf32, #tpu.memory_space<vmem>>, vector<1x1x256xf32>
    %78 = vector.shape_cast %77 : vector<1x1x256xf32> to vector<1x256xf32>
    %79 = vector.broadcast %78 : vector<1x256xf32> to vector<256x256xf32>
    %80 = arith.addf %76, %79 : vector<256x256xf32>
    %cst_55 = arith.constant 0.000000e+00 : f32
    %81 = vector.broadcast %cst_55 : f32 to vector<256x256xf32>
    %82 = arith.maximumf %80, %81 : vector<256x256xf32>
    %83 = arith.truncf %82 : vector<256x256xf32> to vector<256x256xbf16>
    %c0_56 = arith.constant 0 : index
    %c0_57 = arith.constant 0 : index
    %84 = vector.load %arg6[%c0_56, %c0_57] : memref<256x256xbf16, #tpu.memory_space<vmem>>, vector<256x256xbf16>
    %cst_58 = arith.constant dense<0.000000e+00> : vector<256x256xf32>
    %85 = tpu.matmul %83, %84, %cst_58 {dimension_numbers = #tpu.dot_dimension_numbers<[1], [0], [0], [1], [0, 0, 1, 1], [], []>} : vector<256x256xbf16>, vector<256x256xbf16>, vector<256x256xf32> -> vector<256x256xf32>
    %c0_59 = arith.constant 0 : index
    %c0_60 = arith.constant 0 : index
    %86 = vector.load %arg7[%c0_59, %c0_60] : memref<1x256xf32, #tpu.memory_space<vmem>>, vector<1x256xf32>
    %87 = vector.broadcast %86 : vector<1x256xf32> to vector<256x256xf32>
    %88 = arith.addf %85, %87 : vector<256x256xf32>
    %89 = arith.truncf %88 : vector<256x256xf32> to vector<256x256xbf16>
    %c0_61 = arith.constant 0 : index
    %c0_62 = arith.constant 0 : index
    %90 = vector.load %arg8[%c0_61, %c0_62] : memref<256x128xbf16, #tpu.memory_space<vmem>>, vector<256x128xbf16>
    %cst_63 = arith.constant dense<0.000000e+00> : vector<256x128xf32>
    %91 = tpu.matmul %89, %90, %cst_63 {dimension_numbers = #tpu.dot_dimension_numbers<[1], [0], [0], [1], [0, 0, 1, 1], [], []>} : vector<256x256xbf16>, vector<256x128xbf16>, vector<256x128xf32> -> vector<256x128xf32>
    %92 = arith.addf %91, %5 : vector<256x128xf32>
    %c0_64 = arith.constant 0 : index
    %c0_65 = arith.constant 0 : index
    %93 = vector.load %arg9[%c0_64, %c0_65] : memref<1x128xf32, #tpu.memory_space<vmem>>, vector<1x128xf32>
    %94 = vector.broadcast %93 : vector<1x128xf32> to vector<256x128xf32>
    %95 = arith.addf %92, %94 : vector<256x128xf32>
    %cst_66 = arith.constant 0.000000e+00 : f32
    %96 = vector.broadcast %cst_66 : f32 to vector<256x128xf32>
    %97 = arith.maximumf %95, %96 : vector<256x128xf32>
    %98 = arith.truncf %97 : vector<256x128xf32> to vector<256x128xbf16>
    %c0_67 = arith.constant 0 : index
    %c0_68 = arith.constant 0 : index
    %99 = vector.load %arg10[%c0_67, %c0_68] : memref<128x4xbf16, #tpu.memory_space<vmem>>, vector<128x4xbf16>
    %cst_69 = arith.constant dense<0.000000e+00> : vector<256x4xf32>
    %100 = tpu.matmul %98, %99, %cst_69 {dimension_numbers = #tpu.dot_dimension_numbers<[1], [0], [0], [1], [0, 0, 1, 1], [], []>} : vector<256x128xbf16>, vector<128x4xbf16>, vector<256x4xf32> -> vector<256x4xf32>
    %c0_70 = arith.constant 0 : index
    %c0_71 = arith.constant 0 : index
    %101 = vector.load %arg11[%c0_70, %c0_71] : memref<256x4xbf16, #tpu.memory_space<vmem>>, vector<256x4xbf16>
    %cst_72 = arith.constant dense<0.000000e+00> : vector<256x4xf32>
    %102 = tpu.matmul %83, %101, %cst_72 {dimension_numbers = #tpu.dot_dimension_numbers<[1], [0], [0], [1], [0, 0, 1, 1], [], []>} : vector<256x256xbf16>, vector<256x4xbf16>, vector<256x4xf32> -> vector<256x4xf32>
    %103 = arith.addf %100, %102 : vector<256x4xf32>
    %c0_73 = arith.constant 0 : index
    %c0_74 = arith.constant 0 : index
    %104 = vector.load %arg12[%c0_73, %c0_74] : memref<1x4xf32, #tpu.memory_space<vmem>>, vector<1x4xf32>
    %105 = vector.broadcast %104 : vector<1x4xf32> to vector<256x4xf32>
    %106 = arith.addf %103, %105 : vector<256x4xf32>
    %c0_75 = arith.constant 0 : index
    %c0_76 = arith.constant 0 : index
    %107 = vector.load %arg13[%c0_75, %c0_76] : memref<256x4xf32, #tpu.memory_space<vmem>>, vector<256x4xf32>
    tpu.vector_store %arg13[%c0_75, %c0_76], %106 {strides = array<i32>} : memref<256x4xf32, #tpu.memory_space<vmem>>, vector<256x4xf32>,
    return
  }
  func.func @transform_0(%arg0: i32) -> (i32, i32) {
    %c0_i32 = arith.constant 0 : i32
    %c0_i32_0 = arith.constant 0 : i32
    return %arg0, %c0_i32 : i32, i32
  }
  func.func @transform_1(%arg0: i32) -> (i32, i32) {
    %c0_i32 = arith.constant 0 : i32
    %c0_i32_0 = arith.constant 0 : i32
    %c0_i32_1 = arith.constant 0 : i32
    return %c0_i32, %c0_i32_0 : i32, i32
  }
  func.func @transform_2(%arg0: i32) -> (i32, i32) {
    %c0_i32 = arith.constant 0 : i32
    %c0_i32_0 = arith.constant 0 : i32
    %c0_i32_1 = arith.constant 0 : i32
    return %c0_i32, %c0_i32_0 : i32, i32
  }
  func.func @transform_3(%arg0: i32) -> (i32, i32, i32) {
    %c0_i32 = arith.constant 0 : i32
    %c0_i32_0 = arith.constant 0 : i32
    %c0_i32_1 = arith.constant 0 : i32
    %c0_i32_2 = arith.constant 0 : i32
    return %c0_i32, %c0_i32_0, %c0_i32_1 : i32, i32, i32
  }
  func.func @transform_4(%arg0: i32) -> (i32, i32, i32) {
    %c0_i32 = arith.constant 0 : i32
    %c0_i32_0 = arith.constant 0 : i32
    %c0_i32_1 = arith.constant 0 : i32
    %c0_i32_2 = arith.constant 0 : i32
    return %c0_i32, %c0_i32_0, %c0_i32_1 : i32, i32, i32
  }
  func.func @transform_5(%arg0: i32) -> (i32, i32) {
    %c0_i32 = arith.constant 0 : i32
    %c0_i32_0 = arith.constant 0 : i32
    %c0_i32_1 = arith.constant 0 : i32
    return %c0_i32, %c0_i32_0 : i32, i32
  }
  func.func @transform_6(%arg0: i32) -> (i32, i32) {
    %c0_i32 = arith.constant 0 : i32
    %c0_i32_0 = arith.constant 0 : i32
    %c0_i32_1 = arith.constant 0 : i32
    return %c0_i32, %c0_i32_0 : i32, i32
  }
  func.func @transform_7(%arg0: i32) -> (i32, i32) {
    %c0_i32 = arith.constant 0 : i32
    %c0_i32_0 = arith.constant 0 : i32
    %c0_i32_1 = arith.constant 0 : i32
    return %c0_i32, %c0_i32_0 : i32, i32
  }
  func.func @transform_8(%arg0: i32) -> (i32, i32) {
    %c0_i32 = arith.constant 0 : i32
    %c0_i32_0 = arith.constant 0 : i32
    %c0_i32_1 = arith.constant 0 : i32
    return %c0_i32, %c0_i32_0 : i32, i32
  }
  func.func @transform_9(%arg0: i32) -> (i32, i32) {
    %c0_i32 = arith.constant 0 : i32
    %c0_i32_0 = arith.constant 0 : i32
    %c0_i32_1 = arith.constant 0 : i32
    return %c0_i32, %c0_i32_0 : i32, i32
  }
  func.func @transform_10(%arg0: i32) -> (i32, i32) {
    %c0_i32 = arith.constant 0 : i32
    %c0_i32_0 = arith.constant 0 : i32
    %c0_i32_1 = arith.constant 0 : i32
    return %c0_i32, %c0_i32_0 : i32, i32
  }
  func.func @transform_11(%arg0: i32) -> (i32, i32) {
    %c0_i32 = arith.constant 0 : i32
    %c0_i32_0 = arith.constant 0 : i32
    %c0_i32_1 = arith.constant 0 : i32
    return %c0_i32, %c0_i32_0 : i32, i32
  }
  func.func @transform_12(%arg0: i32) -> (i32, i32) {
    %c0_i32 = arith.constant 0 : i32
    %c0_i32_0 = arith.constant 0 : i32
    return %arg0, %c0_i32 : i32, i32
  }
}

</mosaic_0001>

<bundles_post_ra>
// kernel: tpu_custom_call.1
= control target key start
LH: loop header
LB: loop body
LE: loop exit
PB: predicated region body
PF: predicated region fallthrough
CT: control target
= control target key end

     0   :  { %17 = vsyncpa [#allocation3], 0  ;;  %s7119_s21 = smov [#allocation2]   ;;  %s8840_s0 = inlined_call_operand.vmem [shape: f32[256,6], index: 0, kind: input, shape index: {}]   ;;  %s8841_s1 = inlined_call_operand.vmem [shape: bf16[6,640], index: 1, kind: input, shape index: {}]   ;;  %s8842_s2 = inlined_call_operand.vmem [shape: f32[1,256], index: 2, kind: input, shape index: {}]   ;;  %s8843_s3 = inlined_call_operand.hbm [shape: bf16[7,256,256], index: 3, kind: input, shape index: {}]   ;;  %s8844_s4 = inlined_call_operand.vmem [shape: f32[7,1,256], index: 4, kind: input, shape index: {}]   ;;  %s8845_s5 = inlined_call_operand.vmem [shape: bf16[256,256], index: 5, kind: input, shape index: {}]   ;;  %s8846_s6 = inlined_call_operand.vmem [shape: f32[1,256], index: 6, kind: input, shape index: {}]   ;;  %s8847_s7 = inlined_call_operand.vmem [shape: bf16[256,128], index: 7, kind: input, shape index: {}]   ;;  %s8848_s8 = inlined_call_operand.vmem [shape: f32[1,128], index: 8, kind: input, shape index: {}]   ;;  %s8849_s9 = inlined_call_operand.vmem [shape: bf16[128,4], index: 9, kind: input, shape index: {}]   ;;  %s8850_s10 = inlined_call_operand.vmem [shape: bf16[256,4], index: 10, kind: input, shape index: {}]   ;;  %s8851_s11 = inlined_call_operand.vmem [shape: f32[1,4], index: 11, kind: input, shape index: {}]   ;;  %s8852_s12 = inlined_call_operand.vmem [shape: f32[256,4], index: 12, kind: output, shape index: {}]  }
   0x1   :  { %s29_s22 = sshll.u32 %s7119_s21, 4  ;;  %s7095_s25 = scalar_lea.hbm %s8843_s3, 28672  ;;  %s30_s22 = int_to_ptr.vmem [resolvable:$true] %s29_s22 }
   0x2   :  { %p7096_p0 = scmp.ne.s32.totalorder %s8843_s3, %s7095_s25  ;;  %p7099_p1 = scmp.lt.u32.totalorder %s7095_s25, %s8843_s3 }
   0x4   :  { %p7101_p2 = pnand %p7099_p1, %p7096_p0 }
   0x6   :  { %7104 = shalt.err (!%p7101_p2)
}
   0x7   :  { %s7105_s30 = scalar_lea.vmem %s30_s22, 28672  ;;  %p7110_p4 = scmp.lt.s32.totalorder %s30_s22, %s30_s22 }
   0x8   :  { %p7106_p3 = scmp.ne.s32.totalorder %s30_s22, %s7105_s30  ;;  %p7111_p5 = scmp.lt.s32.totalorder %s7105_s30, %s7105_s30 }
   0xa   :  { %p7112_p6 = por %p7111_p5, %p7110_p4 }
   0xc   :  { %p7113_p7 = pnand %p7112_p6, %p7106_p3 }
   0xe   :  { %7116 = shalt.err (!%p7113_p7)
}
   0xf   :  { %s7120_s13 = smov 128   ;;  %s7121_s14 = smov 8  }
  0x10   :  { %35 = dma.hbm_to_vmem [thread:$0]  %s8843_s3, 28672, %s30_s22, [#allocation3], %s7120_s13, %s7120_s13, %s7121_s14  }
  0x11   :  { %7117 = dma.done.wait [#allocation3], 28672  }
  0x12   :  { %7118 = vsyncadd [#allocation3], 4294938624  ;;  %v7122_v0 = vmov 0   ;;  %v104_v1 = vld [vmem:[%s8841_s1] sm:$0x77]  ;;  %vm169_vm0 = vcmask 1042432  }
  0x13   :  { %217 = vmatprep.mubr.bf16.mxu0 %v7122_v0  ;;  %410 = vmatprep.mubr.bf16.mxu1 %v7122_v0  ;;  %v56_v2 = vld [vmem:[%s8840_s0] sm:$0xff]  ;;  %v57_v3 = vld [vmem:[%s8840_s0 + $0x8] sm:$0xff]  ;;  %v5828_v4 = vcombine.high %v104_v1, %v104_v1  ;;  %v5827_v5 = vcombine.low %v104_v1, %v104_v1  ;;  %vm120_vm1 = vcmask 48128   ;;  %v58_v8 = vld [vmem:[%s8840_s0 + $0x10] sm:$0xff]  ;;  %vm5789_vm2 = vcmask 31744  }
  0x14   :  { %v7213_v7 = vpack.c.bf16 %v57_v3, %v56_v2  ;;  %v59_v9 = vld [vmem:[%s8840_s0 + $0x18] sm:$0xff]  ;;  %v105_v10 = vld [vmem:[%s8841_s1 + $0x8] sm:$0x77]  ;;  %v60_v18 = vld [vmem:[%s8840_s0 + $0x20] sm:$0xff] }
  0x15   :  { %5832 = vmatprep.subr.msk.bf16.mxu0 %vm169_vm0, %v5828_v4  ;;  %v171_v6 = vsel %vm169_vm0, %v5827_v5, 0  ;;  %v5830_v11 = vcombine.high %v105_v10, %v105_v10  ;;  %v5829_v12 = vcombine.low %v105_v10, %v105_v10  ;;  %v6672_v13 = vld [vmem:[#allocation2 + $0x4] ss:$8 sps:$4 sm:$0xff]   ;;  %v7227_v14 = vpack.c.bf16 %v59_v9, %v58_v8  ;;  %v6670_v16 = vld [vmem:[#allocation2] ss:$8 sps:$4 sm:$0xff]   ;;  %v62_v25 = vld [vmem:[%s8840_s0 + $0x30] sm:$0xff] }
  0x16   :  { %186 = vmatpush1.bf16.msra.mxu0 %v171_v6  ;;  %v6675_v17 = vld [vmem:[#allocation2 + $0x14] ss:$8 sps:$4 sm:$0xff]   ;;  %v61_v19 = vld [vmem:[%s8840_s0 + $0x28] sm:$0xff]  ;;  %v6673_v20 = vld [vmem:[#allocation2 + $0x10] ss:$8 sps:$4 sm:$0xff]  }
  0x17   :  { %5849 = vmatprep.subr.msk.bf16.mxu1 %vm169_vm0, %v5830_v11  ;;  %v177_v15 = vsel %vm169_vm0, %v5829_v12, 0  ;;  %v6678_v21 = vld [vmem:[#allocation2 + $0x24] ss:$8 sps:$4 sm:$0xff]   ;;  %v7243_v22 = vpack.c.bf16 %v61_v19, %v60_v18  ;;  %v6676_v23 = vld [vmem:[#allocation2 + $0x20] ss:$8 sps:$4 sm:$0xff]   ;;  %v63_v26 = vld [vmem:[%s8840_s0 + $0x38] sm:$0xff] }
  0x18   :  { %379 = vmatpush1.bf16.msra.mxu1 %v177_v15  ;;  %v6681_v24 = vld [vmem:[#allocation2 + $0x34] ss:$8 sps:$4 sm:$0xff]   ;;  %v6679_v27 = vld [vmem:[#allocation2 + $0x30] ss:$8 sps:$4 sm:$0xff]   ;;  %v6684_v28 = vld [vmem:[#allocation2 + $0x44] ss:$8 sps:$4 sm:$0xff]   ;;  %v7257_v29 = vpack.c.bf16 %v63_v26, %v62_v25 }
  0x19   :  { %5833 = vmatmul.mubr.msk.bf16.vlgmr.msra.gmra.mrb[0].mxu0 %vm120_vm1, %v7213_v7  ;;  %1108 = vmatprep.subr.bf16.mxu1 %v6672_v13  ;;  %v6682_v30 = vld [vmem:[#allocation2 + $0x40] ss:$8 sps:$4 sm:$0xff]   ;;  %v6687_v33 = vld [vmem:[#allocation2 + $0x54] ss:$8 sps:$4 sm:$0xff]   ;;  %v6685_v34 = vld [vmem:[#allocation2 + $0x50] ss:$8 sps:$4 sm:$0xff]  }
  0x1a   :  { %227 = vmatprep.mubr.bf16.mxu0 %v7122_v0  ;;  %v64_v31 = vld [vmem:[%s8840_s0 + $0x40] sm:$0xff]  ;;  %v65_v32 = vld [vmem:[%s8840_s0 + $0x48] sm:$0xff]  ;;  %v6693_v38 = vld [vmem:[#allocation2 + $0x74] ss:$8 sps:$4 sm:$0xff]  }
  0x1b   :  { %5850 = vmatmul.mubr.msk.bf16.vlgmr.msra.gmra.mrb[0].mxu1 %vm120_vm1, %v7213_v7  ;;  %v6690_v35 = vld [vmem:[#allocation2 + $0x64] ss:$8 sps:$4 sm:$0xff]   ;;  %v7271_v36 = vpack.c.bf16 %v65_v32, %v64_v31  ;;  %v6688_v37 = vld [vmem:[#allocation2 + $0x60] ss:$8 sps:$4 sm:$0xff]   ;;  %v66_v39 = vld [vmem:[%s8840_s0 + $0x50] sm:$0xff] }
  0x1c   :  { %1109 = vmatpush1.bf16.msra.mxu1 %v6670_v16  ;;  %420 = vmatprep.mubr.bf16.mxu1 %v7122_v0  ;;  %v67_v40 = vld [vmem:[%s8840_s0 + $0x58] sm:$0xff]  ;;  %v6696_v42 = vld [vmem:[#allocation2 + $0x84] ss:$8 sps:$4 sm:$0xff]   ;;  %v6694_v44 = vld [vmem:[#allocation2 + $0x80] ss:$8 sps:$4 sm:$0xff]  }
  0x1d   :  { %1110 = vmatprep.subr.bf16.mxu1 %v6675_v17  ;;  %v6691_v41 = vld [vmem:[#allocation2 + $0x70] ss:$8 sps:$4 sm:$0xff]   ;;  %v7285_v43 = vpack.c.bf16 %v67_v40, %v66_v39  ;;  %v6699_v45 = vld [vmem:[#allocation2 + $0x94] ss:$8 sps:$4 sm:$0xff]   ;;  %v68_v46 = vld [vmem:[%s8840_s0 + $0x60] sm:$0xff] }
  0x1e   :  { %v69_v47 = vld [vmem:[%s8840_s0 + $0x68] sm:$0xff]  ;;  %v6697_v48 = vld [vmem:[#allocation2 + $0x90] ss:$8 sps:$4 sm:$0xff]   ;;  %v6705_v52 = vld [vmem:[#allocation2 + $0xb4] ss:$8 sps:$4 sm:$0xff]  }
  0x1f   :  { %v6702_v49 = vld [vmem:[#allocation2 + $0xa4] ss:$8 sps:$4 sm:$0xff]   ;;  %v7299_v50 = vpack.c.bf16 %v69_v47, %v68_v46  ;;  %v6700_v51 = vld [vmem:[#allocation2 + $0xa0] ss:$8 sps:$4 sm:$0xff]   ;;  %v70_v53 = vld [vmem:[%s8840_s0 + $0x70] sm:$0xff] }
  0x20   :  { %1111 = vmatpush1.bf16.msra.mxu1 %v6673_v20  ;;  %v71_v54 = vld [vmem:[%s8840_s0 + $0x78] sm:$0xff]  ;;  %v6708_v56 = vld [vmem:[#allocation2 + $0xc4] ss:$8 sps:$4 sm:$0xff]   ;;  %v6706_v58 = vld [vmem:[#allocation2 + $0xc0] ss:$8 sps:$4 sm:$0xff]  }
  0x21   :  { %5834 = vmatmul.mubr.msk.bf16.gmra.mrb[4].mxu0 %vm120_vm1, %v7227_v14  ;;  %1112 = vmatprep.subr.bf16.mxu1 %v6678_v21  ;;  %v6703_v55 = vld [vmem:[#allocation2 + $0xb0] ss:$8 sps:$4 sm:$0xff]   ;;  %v7313_v57 = vpack.c.bf16 %v71_v54, %v70_v53  ;;  %v6711_v59 = vld [vmem:[#allocation2 + $0xd4] ss:$8 sps:$4 sm:$0xff]   ;;  %v72_v60 = vld [vmem:[%s8840_s0 + $0x80] sm:$0xff] }
  0x22   :  { %237 = vmatprep.mubr.bf16.mxu0 %v7122_v0  ;;  %v73_v61 = vld [vmem:[%s8840_s0 + $0x88] sm:$0xff]  ;;  %v6709_v62 = vld [vmem:[#allocation2 + $0xd0] ss:$8 sps:$4 sm:$0xff]   ;;  %v76_v6 = vld [vmem:[%s8840_s0 + $0xa0] sm:$0xff] }
  0x23   :  { %5851 = vmatmul.mubr.msk.bf16.gmra.mrb[4].mxu1 %vm120_vm1, %v7227_v14  ;;  %v6714_v63 = vld [vmem:[#allocation2 + $0xe4] ss:$8 sps:$4 sm:$0xff]   ;;  %v7327_v1 = vpack.c.bf16 %v73_v61, %v72_v60  ;;  %v6712_v2 = vld [vmem:[#allocation2 + $0xe0] ss:$8 sps:$4 sm:$0xff]   ;;  %v74_v3 = vld [vmem:[%s8840_s0 + $0x90] sm:$0xff] }
  0x24   :  { %430 = vmatprep.mubr.bf16.mxu1 %v7122_v0  ;;  %1113 = vmatpush1.bf16.msra.mxu1 %v6676_v23  ;;  %v75_v4 = vld [vmem:[%s8840_s0 + $0x98] sm:$0xff]  ;;  %v77_v8 = vld [vmem:[%s8840_s0 + $0xa8] sm:$0xff]  ;;  %v78_v10 = vld [vmem:[%s8840_s0 + $0xb0] sm:$0xff] }
  0x25   :  { %1114 = vmatprep.subr.bf16.mxu1 %v6681_v24  ;;  %v7341_v5 = vpack.c.bf16 %v75_v4, %v74_v3  ;;  %v98_v9 = vpack.c.bf16 %v77_v8, %v76_v6  ;;  %v79_v11 = vld [vmem:[%s8840_s0 + $0xb8] sm:$0xff]  ;;  %v80_v13 = vld [vmem:[%s8840_s0 + $0xc0] sm:$0xff]  ;;  %v81_v15 = vld [vmem:[%s8840_s0 + $0xc8] sm:$0xff] }
  0x26   :  { %v99_v12 = vpack.c.bf16 %v79_v11, %v78_v10  ;;  %v6717_v16 = vld [vmem:[#allocation2 + $0xf4] ss:$8 sps:$4 sm:$0xff]   ;;  %v6715_v17 = vld [vmem:[#allocation2 + $0xf0] ss:$8 sps:$4 sm:$0xff]   ;;  %v100_v18 = vpack.c.bf16 %v81_v15, %v80_v13  ;;  %v84_v23 = vld [vmem:[%s8840_s0 + $0xe0] sm:$0xff] }
  0x27   :  { %v82_v19 = vld [vmem:[%s8840_s0 + $0xd0] sm:$0xff]  ;;  %v83_v20 = vld [vmem:[%s8840_s0 + $0xd8] sm:$0xff]  ;;  %v85_v24 = vld [vmem:[%s8840_s0 + $0xe8] sm:$0xff] }
  0x28   :  { %1115 = vmatpush1.bf16.msra.mxu1 %v6679_v27  ;;  %v101_v21 = vpack.c.bf16 %v83_v20, %v82_v19  ;;  %v102_v25 = vpack.c.bf16 %v85_v24, %v84_v23  ;;  %v86_v26 = vld [vmem:[%s8840_s0 + $0xf0] sm:$0xff]  ;;  %v87_v27 = vld [vmem:[%s8840_s0 + $0xf8] sm:$0xff]  ;;  %v6733_v6 = vld [vmem:[#allocation2 + $0x144] ss:$8 sps:$4 sm:$0xff]  }
  0x29   :  { %5835 = vmatmul.mubr.msk.bf16.gmra.mrb[8].mxu0 %vm120_vm1, %v7243_v22  ;;  %1116 = vmatprep.subr.bf16.mxu1 %v6684_v28  ;;  %v103_v28 = vpack.c.bf16 %v87_v27, %v86_v26  ;;  %v6730_v61 = vld [vmem:[#allocation2 + $0x134] ss:$8 sps:$4 sm:$0xff]   ;;  %v6728_v4 = vld [vmem:[#allocation2 + $0x130] ss:$8 sps:$4 sm:$0xff]   ;;  %v6731_v15 = vld [vmem:[#allocation2 + $0x140] ss:$8 sps:$4 sm:$0xff]  }
  0x2a   :  { %247 = vmatprep.mubr.bf16.mxu0 %v7122_v0  ;;  %v6739_v27 = vld [vmem:[#allocation2 + $0x164] ss:$8 sps:$4 sm:$0xff]  }
  0x2b   :  { %5852 = vmatmul.mubr.msk.bf16.gmra.mrb[8].mxu1 %vm120_vm1, %v7243_v22 }
  0x2c   :  { %440 = vmatprep.mubr.bf16.mxu1 %v7122_v0  ;;  %1117 = vmatpush1.bf16.msra.mxu1 %v6682_v30  ;;  %v6718_v30 = vld [vmem:[%s8841_s1 + $0x10] ss:$0 sps:$4 sm:$0x77]  }
  0x2d   :  { %1118 = vmatprep.subr.bf16.mxu1 %v6687_v33  ;;  %6661 = vmatprep.subr.msk.bf16.mxu0 %vm169_vm0, %v6718_v30  ;;  %v183_v31 = vsel %vm169_vm0, %v6718_v30, 0 }
  0x2e   :  { %6452 = vmatpush3.bf16.msra.mxu0 %v183_v31 }
  0x30   :  { %1119 = vmatpush1.bf16.msra.mxu1 %v6685_v34 }
  0x31   :  { %5836 = vmatmul.mubr.msk.bf16.gmra.mrb[12].mxu0 %vm120_vm1, %v7257_v29  ;;  %1120 = vmatprep.subr.bf16.mxu1 %v6690_v35 }
  0x32   :  { %257 = vmatprep.mubr.bf16.mxu0 %v7122_v0 }
  0x33   :  { %5853 = vmatmul.mubr.msk.bf16.gmra.mrb[12].mxu1 %vm120_vm1, %v7257_v29 }
  0x34   :  { %450 = vmatprep.mubr.bf16.mxu1 %v7122_v0  ;;  %1121 = vmatpush1.bf16.msra.mxu1 %v6688_v37 }
  0x35   :  { %1122 = vmatprep.subr.bf16.mxu1 %v6693_v38 }
  0x38   :  { %1123 = vmatpush1.bf16.msra.mxu1 %v6691_v41  ;;  %v6719_v41 = vld [vmem:[#allocation2 + $0x100] ss:$8 sps:$4 sm:$0xff]  }
  0x39   :  { %5837 = vmatmul.mubr.msk.bf16.gmra.mrb[16].mxu0 %vm120_vm1, %v7271_v36  ;;  %1124 = vmatprep.subr.bf16.mxu1 %v6696_v42  ;;  %v6721_v42 = vld [vmem:[#allocation2 + $0x104] ss:$8 sps:$4 sm:$0xff]  }
  0x3a   :  { %267 = vmatprep.mubr.bf16.mxu0 %v7122_v0  ;;  %1603 = vmatprep.subr.bf16.mxu0 %v6721_v42 }
  0x3b   :  { %5854 = vmatmul.mubr.msk.bf16.gmra.mrb[16].mxu1 %vm120_vm1, %v7271_v36 }
  0x3c   :  { %460 = vmatprep.mubr.bf16.mxu1 %v7122_v0  ;;  %1125 = vmatpush1.bf16.msra.mxu1 %v6694_v44  ;;  %v6724_v44 = vld [vmem:[#allocation2 + $0x114] ss:$8 sps:$4 sm:$0xff]  }
  0x3d   :  { %1126 = vmatprep.subr.bf16.mxu1 %v6699_v45 }
  0x40   :  { %1127 = vmatpush1.bf16.msra.mxu1 %v6697_v48 }
  0x41   :  { %5838 = vmatmul.mubr.msk.bf16.gmra.mrb[20].mxu0 %vm120_vm1, %v7285_v43  ;;  %1128 = vmatprep.subr.bf16.mxu1 %v6702_v49  ;;  %v6722_v49 = vld [vmem:[#allocation2 + $0x110] ss:$8 sps:$4 sm:$0xff]  }
  0x42   :  { %277 = vmatprep.mubr.bf16.mxu0 %v7122_v0 }
  0x43   :  { %5855 = vmatmul.mubr.msk.bf16.gmra.mrb[20].mxu1 %vm120_vm1, %v7285_v43 }
  0x44   :  { %470 = vmatprep.mubr.bf16.mxu1 %v7122_v0  ;;  %1129 = vmatpush1.bf16.msra.mxu1 %v6700_v51  ;;  %v6727_v51 = vld [vmem:[#allocation2 + $0x124] ss:$8 sps:$4 sm:$0xff]  }
  0x45   :  { %1130 = vmatprep.subr.bf16.mxu1 %v6705_v52 }
  0x48   :  { %1131 = vmatpush1.bf16.msra.mxu1 %v6703_v55 }
  0x49   :  { %5839 = vmatmul.mubr.msk.bf16.gmra.mrb[24].mxu0 %vm120_vm1, %v7299_v50  ;;  %1132 = vmatprep.subr.bf16.mxu1 %v6708_v56 }
  0x4a   :  { %287 = vmatprep.mubr.bf16.mxu0 %v7122_v0 }
  0x4b   :  { %5856 = vmatmul.mubr.msk.bf16.gmra.mrb[24].mxu1 %vm120_vm1, %v7299_v50 }
  0x4c   :  { %480 = vmatprep.mubr.bf16.mxu1 %v7122_v0  ;;  %1133 = vmatpush1.bf16.msra.mxu1 %v6706_v58  ;;  %v6725_v58 = vld [vmem:[#allocation2 + $0x120] ss:$8 sps:$4 sm:$0xff]  }
  0x4d   :  { %1134 = vmatprep.subr.bf16.mxu1 %v6711_v59 }
  0x50   :  { %1135 = vmatpush1.bf16.msra.mxu1 %v6709_v62 }
  0x51   :  { %5840 = vmatmul.mubr.msk.bf16.gmra.mrb[28].mxu0 %vm120_vm1, %v7313_v57  ;;  %1136 = vmatprep.subr.bf16.mxu1 %v6714_v63 }
  0x52   :  { %297 = vmatprep.mubr.bf16.mxu0 %v7122_v0 }
  0x53   :  { %5857 = vmatmul.mubr.msk.bf16.gmra.mrb[28].mxu1 %vm120_vm1, %v7313_v57 }
  0x54   :  { %490 = vmatprep.mubr.bf16.mxu1 %v7122_v0  ;;  %1137 = vmatpush1.bf16.msra.mxu1 %v6712_v2 }
  0x55   :  { %1138 = vmatprep.subr.bf16.mxu1 %v6717_v16 }
  0x58   :  { %1139 = vmatpush1.bf16.msra.mxu1 %v6715_v17 }
  0x59   :  { %5841 = vmatmul.mubr.msk.bf16.gmra.mrb[32].mxu0 %vm120_vm1, %v7327_v1 }
  0x5a   :  { %307 = vmatprep.mubr.bf16.mxu0 %v7122_v0 }
  0x5b   :  { %5858 = vmatmul.mubr.msk.bf16.gmra.mrb[32].mxu1 %vm120_vm1, %v7327_v1 }
  0x5c   :  { %500 = vmatprep.mubr.bf16.mxu1 %v7122_v0 }
  0x61   :  { %5842 = vmatmul.mubr.msk.bf16.gmra.mrb[36].mxu0 %vm120_vm1, %v7341_v5 }
  0x62   :  { %317 = vmatprep.mubr.bf16.mxu0 %v7122_v0 }
  0x63   :  { %5859 = vmatmul.mubr.msk.bf16.gmra.mrb[36].mxu1 %vm120_vm1, %v7341_v5 }
  0x64   :  { %510 = vmatprep.mubr.bf16.mxu1 %v7122_v0 }
  0x69   :  { %5843 = vmatmul.mubr.msk.bf16.gmra.mrb[40].mxu0 %vm120_vm1, %v98_v9 }
  0x6a   :  { %327 = vmatprep.mubr.bf16.mxu0 %v7122_v0 }
  0x6b   :  { %5860 = vmatmul.mubr.msk.bf16.gmra.mrb[40].mxu1 %vm120_vm1, %v98_v9 }
  0x6c   :  { %520 = vmatprep.mubr.bf16.mxu1 %v7122_v0 }
  0x71   :  { %5844 = vmatmul.mubr.msk.bf16.gmra.mrb[44].mxu0 %vm120_vm1, %v99_v12 }
  0x72   :  { %337 = vmatprep.mubr.bf16.mxu0 %v7122_v0 }
  0x73   :  { %5861 = vmatmul.mubr.msk.bf16.gmra.mrb[44].mxu1 %vm120_vm1, %v99_v12 }
  0x74   :  { %530 = vmatprep.mubr.bf16.mxu1 %v7122_v0 }
  0x79   :  { %5845 = vmatmul.mubr.msk.bf16.gmra.mrb[48].mxu0 %vm120_vm1, %v100_v18 }
  0x7a   :  { %347 = vmatprep.mubr.bf16.mxu0 %v7122_v0 }
  0x7b   :  { %5862 = vmatmul.mubr.msk.bf16.gmra.mrb[48].mxu1 %vm120_vm1, %v100_v18 }
  0x7c   :  { %540 = vmatprep.mubr.bf16.mxu1 %v7122_v0 }
  0x81   :  { %5846 = vmatmul.mubr.msk.bf16.gmra.mrb[52].mxu0 %vm120_vm1, %v101_v21 }
  0x82   :  { %357 = vmatprep.mubr.bf16.mxu0 %v7122_v0 }
  0x83   :  { %5863 = vmatmul.mubr.msk.bf16.gmra.mrb[52].mxu1 %vm120_vm1, %v101_v21 }
  0x84   :  { %550 = vmatprep.mubr.bf16.mxu1 %v7122_v0 }
  0x89   :  { %5847 = vmatmul.mubr.msk.bf16.gmra.mrb[56].mxu0 %vm120_vm1, %v102_v25 }
  0x8a   :  { %367 = vmatprep.mubr.bf16.mxu0 %v7122_v0 }
  0x8b   :  { %5864 = vmatmul.mubr.msk.bf16.gmra.mrb[56].mxu1 %vm120_vm1, %v102_v25 }
  0x8c   :  { %560 = vmatprep.mubr.bf16.mxu1 %v7122_v0  ;;  %v734_v0 = vlaneseq }
  0x91   :  { %5848 = vmatmul.mubr.msk.bf16.gmra.mrb[60].mxu0 %vm120_vm1, %v103_v28 }
  0x92   :  { %6453 = vmatprep.mubr.msk.bf16.mxu0 %vm120_vm1, %v7213_v7  ;;  %v735_v7 = vshrl.u32 %v734_v0, 7 }
  0x93   :  { %5865 = vmatmul.mubr.msk.bf16.gmra.mrb[60].mxu1 %vm120_vm1, %v103_v28 }
  0x99   :  { %6454 = vmatmul.mubr.msk.bf16.vlgmr.msra.gmra.mrb[64].mxu0 %vm120_vm1, %v7227_v14  ;;  %v7441_v14 = vsub.s32 0, %v735_v7 }
  0x9a   :  { %6457 = vmatprep.mubr.msk.bf16.mxu0 %vm120_vm1, %v7243_v22  ;;  %v732_v22 = vld [vmem:[%s8842_s2] sm:$0x3]  ;;  %1604 = vmatpush1.bf16.msra.mxu0 %v6719_v41 }
  0x9b   :  { %v7449_v32 = vrot.slane %v732_v22, %v7441_v14  ;;  %1605 = vmatprep.subr.bf16.mxu0 %v6724_v44 }
  0x9e   :  { %1606 = vmatpush1.bf16.msra.mxu0 %v6722_v49 }
  0x9f   :  { %1607 = vmatprep.subr.bf16.mxu0 %v6727_v51 }
  0xa1   :  { %6458 = vmatmul.mubr.msk.bf16.gmra.mrb[68].mxu0 %vm120_vm1, %v7257_v29  ;;  %v7446_v29 = vsub.s32 1, %v735_v7 }
  0xa2   :  { %6461 = vmatprep.mubr.msk.bf16.mxu0 %vm120_vm1, %v7271_v36  ;;  %1608 = vmatpush1.bf16.msra.mxu0 %v6725_v58 }
  0xa3   :  { %v7452_v33 = vrot.slane %v732_v22, %v7446_v29  ;;  %1609 = vmatprep.subr.bf16.mxu0 %v6730_v61  ;;  %v6746_v61 = vld [vmem:[#allocation2 + $0x190] ss:$8 sps:$4 sm:$0xff]  }
  0xa6   :  { %1610 = vmatpush1.bf16.msra.mxu0 %v6728_v4 }
  0xa7   :  { %1611 = vmatprep.subr.bf16.mxu0 %v6733_v6 }
  0xa9   :  { %6462 = vmatmul.mubr.msk.bf16.gmra.mrb[72].mxu0 %vm120_vm1, %v7285_v43 }
  0xaa   :  { %6465 = vmatprep.mubr.msk.bf16.mxu0 %vm120_vm1, %v7299_v50  ;;  %1612 = vmatpush1.bf16.msra.mxu0 %v6731_v15 }
  0xb1   :  { %6466 = vmatmul.mubr.msk.bf16.gmra.mrb[76].mxu0 %vm120_vm1, %v7313_v57 }
  0xb2   :  { %6469 = vmatprep.mubr.msk.bf16.mxu0 %vm120_vm1, %v7327_v1 }
  0xb9   :  { %6470 = vmatmul.mubr.msk.bf16.gmra.mrb[80].mxu0 %vm120_vm1, %v7341_v5 }
  0xba   :  { %6473 = vmatprep.mubr.msk.bf16.mxu0 %vm120_vm1, %v98_v9 }
  0xc1   :  { %6474 = vmatmul.mubr.msk.bf16.gmra.mrb[84].mxu0 %vm120_vm1, %v99_v12 }
  0xc2   :  { %6477 = vmatprep.mubr.msk.bf16.mxu0 %vm120_vm1, %v100_v18  ;;  %v6736_v18 = vld [vmem:[#allocation2 + $0x154] ss:$8 sps:$4 sm:$0xff]  }
  0xc3   :  { %1613 = vmatprep.subr.bf16.mxu0 %v6736_v18  ;;  %v6752_v18 = vld [vmem:[#allocation2 + $0x1b0] ss:$8 sps:$4 sm:$0xff]  }
  0xc9   :  { %6478 = vmatmul.mubr.msk.bf16.gmra.mrb[88].mxu0 %vm120_vm1, %v101_v21 }
  0xca   :  { %6481 = vmatprep.mubr.msk.bf16.mxu0 %vm120_vm1, %v102_v25  ;;  %v6734_v25 = vld [vmem:[#allocation2 + $0x150] ss:$8 sps:$4 sm:$0xff]  }
  0xcb   :  { %1614 = vmatpush1.bf16.msra.mxu0 %v6734_v25 }
  0xcc   :  { %1615 = vmatprep.subr.bf16.mxu0 %v6739_v27 }
  0xd1   :  { %6482 = vmatmul.mubr.msk.bf16.gmra.mrb[92].mxu0 %vm120_vm1, %v103_v28 }
  0xec   :  { %v219_v34 = vpop.f32.mrb[0].mxu0 }
  0xed   :  { %v744_v35 = vadd.f32 %v7449_v32, %v219_v34  ;;  %v221_v36 = vpop.f32.mrb[1].mxu0  ;;  %v6737_v34 = vld [vmem:[#allocation2 + $0x160] ss:$8 sps:$4 sm:$0xff]  }
  0xee   :  { %v745_v37 = vadd.f32 %v7452_v33, %v221_v36  ;;  %v223_v38 = vpop.f32.mrb[2].mxu0  ;;  %1616 = vmatpush1.bf16.msra.mxu0 %v6737_v34 }
  0xef   :  { %v746_v39 = vadd.f32 %v7449_v32, %v223_v38  ;;  %v225_v40 = vpop.f32.mrb[3].mxu0  ;;  %v808_v45 = vmax.f32 %v744_v35, 0.0 }
  0xf0   :  { %v747_v43 = vadd.f32 %v7452_v33, %v225_v40  ;;  %v809_v47 = vmax.f32 %v745_v37, 0.0  ;;  %v6742_v37 = vld [vmem:[#allocation2 + $0x174] ss:$8 sps:$4 sm:$0xff]  }
  0xf1   :  { %v810_v46 = vmax.f32 %v746_v39, 0.0  ;;  %1617 = vmatprep.subr.bf16.mxu0 %v6742_v37  ;;  %v6758_v37 = vld [vmem:[#allocation2 + $0x1d0] ss:$8 sps:$4 sm:$0xff]  }
  0xf2   :  { %v811_v48 = vmax.f32 %v747_v43, 0.0  ;;  %v6740_v43 = vld [vmem:[#allocation2 + $0x170] ss:$8 sps:$4 sm:$0xff]  }
  0xf3   :  { %v872_v50 = vpack.c.bf16 %v810_v46, %v808_v45  ;;  %v6745_v45 = vld [vmem:[#allocation2 + $0x184] ss:$8 sps:$4 sm:$0xff]   ;;  %1618 = vmatpush1.bf16.msra.mxu0 %v6740_v43 }
  0xf4   :  { %v229_v52 = vpop.f32.mrb[4].mxu0  ;;  %v873_v53 = vpack.c.bf16 %v811_v48, %v809_v47  ;;  %1619 = vmatprep.subr.bf16.mxu0 %v6745_v45 }
  0xf5   :  { %v748_v54 = vadd.f32 %v7449_v32, %v229_v52  ;;  %v231_v55 = vpop.f32.mrb[5].mxu0  ;;  %v6743_v52 = vld [vmem:[#allocation2 + $0x180] ss:$8 sps:$4 sm:$0xff]  }
  0xf6   :  { %v749_v56 = vadd.f32 %v7452_v33, %v231_v55  ;;  %v233_v57 = vpop.f32.mrb[6].mxu0  ;;  %1140 = vmatprep.mubr.bf16.mxu1 %v873_v53  ;;  %v6748_v55 = vld [vmem:[#allocation2 + $0x194] ss:$8 sps:$4 sm:$0xff]  }
  0xf7   :  { %v750_v59 = vadd.f32 %v7449_v32, %v233_v57  ;;  %v235_v60 = vpop.f32.mrb[7].mxu0  ;;  %1141 = vmatmul.mubr.bf16.vlgmr.msra.gmra.mrb[64].mxu1 %v872_v50  ;;  %v812_v63 = vmax.f32 %v748_v54, 0.0  ;;  %1620 = vmatpush1.bf16.msra.mxu0 %v6743_v52 }
  0xf8   :  { %v751_v62 = vadd.f32 %v7452_v33, %v235_v60  ;;  %v813_v2 = vmax.f32 %v749_v56, 0.0  ;;  %1621 = vmatprep.subr.bf16.mxu0 %v6748_v55 }
  0xf9   :  { %v814_v1 = vmax.f32 %v750_v59, 0.0 }
  0xfa   :  { %v815_v3 = vmax.f32 %v751_v62, 0.0 }
  0xfb   :  { %v874_v5 = vpack.c.bf16 %v814_v1, %v812_v63  ;;  %v6751_v63 = vld [vmem:[#allocation2 + $0x1a4] ss:$8 sps:$4 sm:$0xff]   ;;  %1622 = vmatpush1.bf16.msra.mxu0 %v6746_v61 }
  0xfc   :  { %v239_v8 = vpop.f32.mrb[8].mxu0  ;;  %v875_v9 = vpack.c.bf16 %v815_v3, %v813_v2  ;;  %1623 = vmatprep.subr.bf16.mxu0 %v6751_v63 }
  0xfd   :  { %v752_v10 = vadd.f32 %v7449_v32, %v239_v8  ;;  %v241_v11 = vpop.f32.mrb[9].mxu0  ;;  %v6749_v8 = vld [vmem:[#allocation2 + $0x1a0] ss:$8 sps:$4 sm:$0xff]  }
  0xfe   :  { %v753_v12 = vadd.f32 %v7452_v33, %v241_v11  ;;  %v243_v13 = vpop.f32.mrb[10].mxu0  ;;  %1150 = vmatprep.mubr.bf16.mxu1 %v875_v9  ;;  %v6754_v11 = vld [vmem:[#allocation2 + $0x1b4] ss:$8 sps:$4 sm:$0xff]  }
  0xff   :  { %v754_v16 = vadd.f32 %v7449_v32, %v243_v13  ;;  %v245_v17 = vpop.f32.mrb[11].mxu0  ;;  %1151 = vmatmul.mubr.bf16.gmra.mrb[68].mxu1 %v874_v5  ;;  %v816_v20 = vmax.f32 %v752_v10, 0.0  ;;  %1624 = vmatpush1.bf16.msra.mxu0 %v6749_v8 }
 0x100   :  { %v755_v19 = vadd.f32 %v7452_v33, %v245_v17  ;;  %v817_v23 = vmax.f32 %v753_v12, 0.0  ;;  %1625 = vmatprep.subr.bf16.mxu0 %v6754_v11 }
 0x101   :  { %v818_v21 = vmax.f32 %v754_v16, 0.0 }
 0x102   :  { %v819_v24 = vmax.f32 %v755_v19, 0.0 }
 0x103   :  { %v876_v26 = vpack.c.bf16 %v818_v21, %v816_v20  ;;  %v6757_v20 = vld [vmem:[#allocation2 + $0x1c4] ss:$8 sps:$4 sm:$0xff]   ;;  %1626 = vmatpush1.bf16.msra.mxu0 %v6752_v18 }
 0x104   :  { %v249_v28 = vpop.f32.mrb[12].mxu0  ;;  %v877_v30 = vpack.c.bf16 %v819_v24, %v817_v23  ;;  %1627 = vmatprep.subr.bf16.mxu0 %v6757_v20 }
 0x105   :  { %v756_v31 = vadd.f32 %v7449_v32, %v249_v28  ;;  %v251_v0 = vpop.f32.mrb[13].mxu0  ;;  %v6755_v28 = vld [vmem:[#allocation2 + $0x1c0] ss:$8 sps:$4 sm:$0xff]  }
 0x106   :  { %v757_v7 = vadd.f32 %v7452_v33, %v251_v0  ;;  %v253_v22 = vpop.f32.mrb[14].mxu0  ;;  %1160 = vmatprep.mubr.bf16.mxu1 %v877_v30  ;;  %v6760_v0 = vld [vmem:[#allocation2 + $0x1d4] ss:$8 sps:$4 sm:$0xff]  }
 0x107   :  { %v758_v35 = vadd.f32 %v7449_v32, %v253_v22  ;;  %v255_v36 = vpop.f32.mrb[15].mxu0  ;;  %1161 = vmatmul.mubr.bf16.gmra.mrb[72].mxu1 %v876_v26  ;;  %v820_v39 = vmax.f32 %v756_v31, 0.0  ;;  %1628 = vmatpush1.bf16.msra.mxu0 %v6755_v28 }
 0x108   :  { %v759_v38 = vadd.f32 %v7452_v33, %v255_v36  ;;  %v821_v41 = vmax.f32 %v757_v7, 0.0  ;;  %1629 = vmatprep.subr.bf16.mxu0 %v6760_v0 }
 0x109   :  { %v822_v40 = vmax.f32 %v758_v35, 0.0 }
 0x10a   :  { %v823_v42 = vmax.f32 %v759_v38, 0.0 }
 0x10b   :  { %v878_v44 = vpack.c.bf16 %v822_v40, %v820_v39  ;;  %1630 = vmatpush1.bf16.msra.mxu0 %v6758_v37 }
 0x10c   :  { %v259_v46 = vpop.f32.mrb[16].mxu0  ;;  %v879_v47 = vpack.c.bf16 %v823_v42, %v821_v41 }
 0x10d   :  { %v760_v48 = vadd.f32 %v7449_v32, %v259_v46  ;;  %v261_v49 = vpop.f32.mrb[17].mxu0 }
 0x10e   :  { %v761_v50 = vadd.f32 %v7452_v33, %v261_v49  ;;  %v263_v51 = vpop.f32.mrb[18].mxu0  ;;  %1170 = vmatprep.mubr.bf16.mxu1 %v879_v47 }
 0x10f   :  { %v762_v53 = vadd.f32 %v7449_v32, %v263_v51  ;;  %v265_v54 = vpop.f32.mrb[19].mxu0  ;;  %1171 = vmatmul.mubr.bf16.gmra.mrb[76].mxu1 %v878_v44  ;;  %v824_v57 = vmax.f32 %v760_v48, 0.0 }
 0x110   :  { %v763_v56 = vadd.f32 %v7452_v33, %v265_v54  ;;  %v825_v59 = vmax.f32 %v761_v50, 0.0 }
 0x111   :  { %v826_v58 = vmax.f32 %v762_v53, 0.0 }
 0x112   :  { %v827_v60 = vmax.f32 %v763_v56, 0.0 }
 0x113   :  { %v880_v62 = vpack.c.bf16 %v826_v58, %v824_v57 }
 0x114   :  { %v269_v1 = vpop.f32.mrb[20].mxu0  ;;  %v881_v2 = vpack.c.bf16 %v827_v60, %v825_v59 }
 0x115   :  { %v764_v3 = vadd.f32 %v7449_v32, %v269_v1  ;;  %v271_v4 = vpop.f32.mrb[21].mxu0 }
 0x116   :  { %v765_v5 = vadd.f32 %v7452_v33, %v271_v4  ;;  %v273_v6 = vpop.f32.mrb[22].mxu0  ;;  %1180 = vmatprep.mubr.bf16.mxu1 %v881_v2 }
 0x117   :  { %v766_v9 = vadd.f32 %v7449_v32, %v273_v6  ;;  %v275_v10 = vpop.f32.mrb[23].mxu0  ;;  %1181 = vmatmul.mubr.bf16.gmra.mrb[80].mxu1 %v880_v62  ;;  %v828_v13 = vmax.f32 %v764_v3, 0.0 }
 0x118   :  { %v767_v12 = vadd.f32 %v7452_v33, %v275_v10  ;;  %v829_v16 = vmax.f32 %v765_v5, 0.0 }
 0x119   :  { %v830_v15 = vmax.f32 %v766_v9, 0.0 }
 0x11a   :  { %v831_v17 = vmax.f32 %v767_v12, 0.0 }
 0x11b   :  { %v882_v19 = vpack.c.bf16 %v830_v15, %v828_v13 }
 0x11c   :  { %v279_v21 = vpop.f32.mrb[24].mxu0  ;;  %v883_v23 = vpack.c.bf16 %v831_v17, %v829_v16 }
 0x11d   :  { %v768_v24 = vadd.f32 %v7449_v32, %v279_v21  ;;  %v281_v25 = vpop.f32.mrb[25].mxu0 }
 0x11e   :  { %v769_v26 = vadd.f32 %v7452_v33, %v281_v25  ;;  %v283_v27 = vpop.f32.mrb[26].mxu0  ;;  %1190 = vmatprep.mubr.bf16.mxu1 %v883_v23 }
 0x11f   :  { %v770_v30 = vadd.f32 %v7449_v32, %v283_v27  ;;  %v285_v31 = vpop.f32.mrb[27].mxu0  ;;  %1191 = vmatmul.mubr.bf16.gmra.mrb[84].mxu1 %v882_v19  ;;  %v832_v22 = vmax.f32 %v768_v24, 0.0 }
 0x120   :  { %v771_v7 = vadd.f32 %v7452_v33, %v285_v31  ;;  %v833_v35 = vmax.f32 %v769_v26, 0.0 }
 0x121   :  { %v834_v34 = vmax.f32 %v770_v30, 0.0 }
 0x122   :  { %v835_v36 = vmax.f32 %v771_v7, 0.0 }
 0x123   :  { %v884_v38 = vpack.c.bf16 %v834_v34, %v832_v22 }
 0x124   :  { %v289_v39 = vpop.f32.mrb[28].mxu0  ;;  %v885_v40 = vpack.c.bf16 %v835_v36, %v833_v35 }
 0x125   :  { %v772_v41 = vadd.f32 %v7449_v32, %v289_v39  ;;  %v291_v42 = vpop.f32.mrb[29].mxu0 }
 0x126   :  { %v773_v43 = vadd.f32 %v7452_v33, %v291_v42  ;;  %v293_v44 = vpop.f32.mrb[30].mxu0  ;;  %1200 = vmatprep.mubr.bf16.mxu1 %v885_v40 }
 0x127   :  { %v774_v45 = vadd.f32 %v7449_v32, %v293_v44  ;;  %v295_v46 = vpop.f32.mrb[31].mxu0  ;;  %1201 = vmatmul.mubr.bf16.gmra.mrb[88].mxu1 %v884_v38  ;;  %v836_v48 = vmax.f32 %v772_v41, 0.0 }
 0x128   :  { %v775_v47 = vadd.f32 %v7452_v33, %v295_v46  ;;  %v837_v50 = vmax.f32 %v773_v43, 0.0 }
 0x129   :  { %v838_v49 = vmax.f32 %v774_v45, 0.0 }
 0x12a   :  { %v839_v51 = vmax.f32 %v775_v47, 0.0 }
 0x12b   :  { %v886_v52 = vpack.c.bf16 %v838_v49, %v836_v48  ;;  %v6763_v49 = vld [vmem:[#allocation2 + $0x1e4] ss:$8 sps:$4 sm:$0xff]  }
 0x12c   :  { %v299_v53 = vpop.f32.mrb[32].mxu0  ;;  %v887_v54 = vpack.c.bf16 %v839_v51, %v837_v50  ;;  %1631 = vmatprep.subr.bf16.mxu0 %v6763_v49 }
 0x12d   :  { %v776_v55 = vadd.f32 %v7449_v32, %v299_v53  ;;  %v301_v56 = vpop.f32.mrb[33].mxu0 }
 0x12e   :  { %v777_v57 = vadd.f32 %v7452_v33, %v301_v56  ;;  %v303_v58 = vpop.f32.mrb[34].mxu0  ;;  %1210 = vmatprep.mubr.bf16.mxu1 %v887_v54 }
 0x12f   :  { %v778_v59 = vadd.f32 %v7449_v32, %v303_v58  ;;  %v305_v60 = vpop.f32.mrb[35].mxu0  ;;  %1211 = vmatmul.mubr.bf16.gmra.mrb[92].mxu1 %v886_v52  ;;  %v840_v62 = vmax.f32 %v776_v55, 0.0  ;;  %v6761_v52 = vld [vmem:[#allocation2 + $0x1e0] ss:$8 sps:$4 sm:$0xff]  }
 0x130   :  { %v779_v61 = vadd.f32 %v7452_v33, %v305_v60  ;;  %v841_v1 = vmax.f32 %v777_v57, 0.0  ;;  %1632 = vmatpush1.bf16.msra.mxu0 %v6761_v52  ;;  %v6770_v52 = vld [vmem:[#allocation2 + $0x210] ss:$8 sps:$4 sm:$0xff]  }
 0x131   :  { %v842_v63 = vmax.f32 %v778_v59, 0.0  ;;  %v6766_v59 = vld [vmem:[#allocation2 + $0x1f4] ss:$8 sps:$4 sm:$0xff]  }
 0x132   :  { %v843_v2 = vmax.f32 %v779_v61, 0.0  ;;  %v6764_v61 = vld [vmem:[#allocation2 + $0x1f0] ss:$8 sps:$4 sm:$0xff]   ;;  %1633 = vmatprep.subr.bf16.mxu0 %v6766_v59 }
 0x133   :  { %v888_v3 = vpack.c.bf16 %v842_v63, %v840_v62 }
 0x134   :  { %v309_v4 = vpop.f32.mrb[36].mxu0  ;;  %v889_v5 = vpack.c.bf16 %v843_v2, %v841_v1  ;;  %1634 = vmatpush1.bf16.msra.mxu0 %v6764_v61 }
 0x135   :  { %v780_v6 = vadd.f32 %v7449_v32, %v309_v4  ;;  %v311_v8 = vpop.f32.mrb[37].mxu0 }
 0x136   :  { %v781_v9 = vadd.f32 %v7452_v33, %v311_v8  ;;  %v313_v10 = vpop.f32.mrb[38].mxu0  ;;  %1220 = vmatprep.mubr.bf16.mxu1 %v889_v5 }
 0x137   :  { %v782_v11 = vadd.f32 %v7449_v32, %v313_v10  ;;  %v315_v12 = vpop.f32.mrb[39].mxu0  ;;  %1221 = vmatmul.mubr.bf16.gmra.mrb[96].mxu1 %v888_v3  ;;  %v844_v15 = vmax.f32 %v780_v6, 0.0 }
 0x138   :  { %v783_v13 = vadd.f32 %v7452_v33, %v315_v12  ;;  %v845_v17 = vmax.f32 %v781_v9, 0.0 }
 0x139   :  { %v846_v16 = vmax.f32 %v782_v11, 0.0 }
 0x13a   :  { %v847_v18 = vmax.f32 %v783_v13, 0.0 }
 0x13b   :  { %v890_v19 = vpack.c.bf16 %v846_v16, %v844_v15 }
 0x13c   :  { %v319_v20 = vpop.f32.mrb[40].mxu0  ;;  %v891_v21 = vpack.c.bf16 %v847_v18, %v845_v17 }
 0x13d   :  { %v784_v23 = vadd.f32 %v7449_v32, %v319_v20  ;;  %v321_v24 = vpop.f32.mrb[41].mxu0 }
 0x13e   :  { %v785_v25 = vadd.f32 %v7452_v33, %v321_v24  ;;  %v323_v26 = vpop.f32.mrb[42].mxu0  ;;  %1230 = vmatprep.mubr.bf16.mxu1 %v891_v21 }
 0x13f   :  { %v786_v27 = vadd.f32 %v7449_v32, %v323_v26  ;;  %v325_v28 = vpop.f32.mrb[43].mxu0  ;;  %1231 = vmatmul.mubr.bf16.gmra.mrb[100].mxu1 %v890_v19  ;;  %v848_v31 = vmax.f32 %v784_v23, 0.0 }
 0x140   :  { %v787_v30 = vadd.f32 %v7452_v33, %v325_v28  ;;  %v849_v7 = vmax.f32 %v785_v25, 0.0 }
 0x141   :  { %v850_v0 = vmax.f32 %v786_v27, 0.0 }
 0x142   :  { %v851_v22 = vmax.f32 %v787_v30, 0.0 }
 0x143   :  { %v892_v34 = vpack.c.bf16 %v850_v0, %v848_v31 }
 0x144   :  { %v329_v35 = vpop.f32.mrb[44].mxu0  ;;  %v893_v36 = vpack.c.bf16 %v851_v22, %v849_v7 }
 0x145   :  { %v788_v37 = vadd.f32 %v7449_v32, %v329_v35  ;;  %v331_v38 = vpop.f32.mrb[45].mxu0 }
 0x146   :  { %v789_v39 = vadd.f32 %v7452_v33, %v331_v38  ;;  %v333_v40 = vpop.f32.mrb[46].mxu0  ;;  %1240 = vmatprep.mubr.bf16.mxu1 %v893_v36 }
 0x147   :  { %v790_v41 = vadd.f32 %v7449_v32, %v333_v40  ;;  %v335_v42 = vpop.f32.mrb[47].mxu0  ;;  %1241 = vmatmul.mubr.bf16.gmra.mrb[104].mxu1 %v892_v34  ;;  %v852_v44 = vmax.f32 %v788_v37, 0.0 }
 0x148   :  { %v791_v43 = vadd.f32 %v7452_v33, %v335_v42  ;;  %v853_v46 = vmax.f32 %v789_v39, 0.0 }
 0x149   :  { %v854_v45 = vmax.f32 %v790_v41, 0.0 }
 0x14a   :  { %v855_v47 = vmax.f32 %v791_v43, 0.0 }
 0x14b   :  { %v894_v48 = vpack.c.bf16 %v854_v45, %v852_v44 }
 0x14c   :  { %v339_v50 = vpop.f32.mrb[48].mxu0  ;;  %v895_v51 = vpack.c.bf16 %v855_v47, %v853_v46 }
 0x14d   :  { %v792_v53 = vadd.f32 %v7449_v32, %v339_v50  ;;  %v341_v54 = vpop.f32.mrb[49].mxu0  ;;  %v6767_v50 = vld [vmem:[#allocation2 + $0x200] ss:$8 sps:$4 sm:$0xff]  }
 0x14e   :  { %v793_v55 = vadd.f32 %v7452_v33, %v341_v54  ;;  %v343_v56 = vpop.f32.mrb[50].mxu0  ;;  %1250 = vmatprep.mubr.bf16.mxu1 %v895_v51  ;;  %v6769_v51 = vld [vmem:[#allocation2 + $0x204] ss:$8 sps:$4 sm:$0xff]  }
 0x14f   :  { %v794_v57 = vadd.f32 %v7449_v32, %v343_v56  ;;  %v345_v58 = vpop.f32.mrb[51].mxu0  ;;  %1251 = vmatmul.mubr.bf16.gmra.mrb[108].mxu1 %v894_v48  ;;  %v856_v62 = vmax.f32 %v792_v53, 0.0  ;;  %2098 = vmatprep.subr.bf16.mxu1 %v6769_v51  ;;  %v6772_v53 = vld [vmem:[#allocation2 + $0x214] ss:$8 sps:$4 sm:$0xff]   ;;  %v6775_v54 = vld [vmem:[#allocation2 + $0x224] ss:$8 sps:$4 sm:$0xff]  }
 0x150   :  { %v795_v60 = vadd.f32 %v7452_v33, %v345_v58  ;;  %v857_v1 = vmax.f32 %v793_v55, 0.0  ;;  %2099 = vmatpush1.bf16.msra.mxu1 %v6767_v50  ;;  %v6778_v58 = vld [vmem:[#allocation2 + $0x234] ss:$8 sps:$4 sm:$0xff]  }
 0x151   :  { %v858_v63 = vmax.f32 %v794_v57, 0.0  ;;  %2100 = vmatprep.subr.bf16.mxu1 %v6772_v53  ;;  %v6776_v57 = vld [vmem:[#allocation2 + $0x230] ss:$8 sps:$4 sm:$0xff]  }
 0x152   :  { %v859_v2 = vmax.f32 %v795_v60, 0.0 }
 0x153   :  { %v896_v3 = vpack.c.bf16 %v858_v63, %v856_v62 }
 0x154   :  { %v349_v4 = vpop.f32.mrb[52].mxu0  ;;  %v897_v5 = vpack.c.bf16 %v859_v2, %v857_v1  ;;  %2101 = vmatpush1.bf16.msra.mxu1 %v6770_v52 }
 0x155   :  { %v796_v6 = vadd.f32 %v7449_v32, %v349_v4  ;;  %v351_v8 = vpop.f32.mrb[53].mxu0  ;;  %2102 = vmatprep.subr.bf16.mxu1 %v6775_v54  ;;  %v6781_v4 = vld [vmem:[#allocation2 + $0x244] ss:$8 sps:$4 sm:$0xff]  }
 0x156   :  { %v797_v9 = vadd.f32 %v7452_v33, %v351_v8  ;;  %v353_v10 = vpop.f32.mrb[54].mxu0  ;;  %1260 = vmatprep.mubr.bf16.mxu1 %v897_v5 }
 0x157   :  { %v798_v11 = vadd.f32 %v7449_v32, %v353_v10  ;;  %v355_v12 = vpop.f32.mrb[55].mxu0  ;;  %1261 = vmatmul.mubr.bf16.gmra.mrb[112].mxu1 %v896_v3  ;;  %v860_v15 = vmax.f32 %v796_v6, 0.0  ;;  %v6779_v3 = vld [vmem:[#allocation2 + $0x240] ss:$8 sps:$4 sm:$0xff]   ;;  %v6784_v6 = vld [vmem:[#allocation2 + $0x254] ss:$8 sps:$4 sm:$0xff]  }
 0x158   :  { %v799_v13 = vadd.f32 %v7452_v33, %v355_v12  ;;  %v861_v17 = vmax.f32 %v797_v9, 0.0 }
 0x159   :  { %v862_v16 = vmax.f32 %v798_v11, 0.0 }
 0x15a   :  { %v863_v18 = vmax.f32 %v799_v13, 0.0 }
 0x15b   :  { %v898_v19 = vpack.c.bf16 %v862_v16, %v860_v15  ;;  %v6782_v15 = vld [vmem:[#allocation2 + $0x250] ss:$8 sps:$4 sm:$0xff]  }
 0x15c   :  { %v359_v20 = vpop.f32.mrb[56].mxu0  ;;  %v899_v21 = vpack.c.bf16 %v863_v18, %v861_v17  ;;  %v6787_v18 = vld [vmem:[#allocation2 + $0x264] ss:$8 sps:$4 sm:$0xff]  }
 0x15d   :  { %v800_v23 = vadd.f32 %v7449_v32, %v359_v20  ;;  %v361_v24 = vpop.f32.mrb[57].mxu0 }
 0x15e   :  { %v801_v25 = vadd.f32 %v7452_v33, %v361_v24  ;;  %v363_v26 = vpop.f32.mrb[58].mxu0  ;;  %1270 = vmatprep.mubr.bf16.mxu1 %v899_v21 }
 0x15f   :  { %v802_v27 = vadd.f32 %v7449_v32, %v363_v26  ;;  %v365_v28 = vpop.f32.mrb[59].mxu0  ;;  %1271 = vmatmul.mubr.bf16.gmra.mrb[116].mxu1 %v898_v19  ;;  %v864_v31 = vmax.f32 %v800_v23, 0.0 }
 0x160   :  { %v803_v30 = vadd.f32 %v7452_v33, %v365_v28  ;;  %v865_v7 = vmax.f32 %v801_v25, 0.0 }
 0x161   :  { %v866_v0 = vmax.f32 %v802_v27, 0.0 }
 0x162   :  { %v867_v22 = vmax.f32 %v803_v30, 0.0  ;;  %v6785_v30 = vld [vmem:[#allocation2 + $0x260] ss:$8 sps:$4 sm:$0xff]  }
 0x163   :  { %v900_v34 = vpack.c.bf16 %v866_v0, %v864_v31 }
 0x164   :  { %v369_v35 = vpop.f32.mrb[60].mxu0  ;;  %v901_v36 = vpack.c.bf16 %v867_v22, %v865_v7  ;;  %v6790_v22 = vld [vmem:[#allocation2 + $0x274] ss:$8 sps:$4 sm:$0xff]  }
 0x165   :  { %v804_v37 = vadd.f32 %v7449_v32, %v369_v35  ;;  %v371_v38 = vpop.f32.mrb[61].mxu0 }
 0x166   :  { %v805_v39 = vadd.f32 %v7452_v33, %v371_v38  ;;  %v373_v40 = vpop.f32.mrb[62].mxu0  ;;  %1280 = vmatprep.mubr.bf16.mxu1 %v901_v36 }
 0x167   :  { %v806_v41 = vadd.f32 %v7449_v32, %v373_v40  ;;  %v375_v42 = vpop.f32.mrb[63].mxu0  ;;  %1281 = vmatmul.mubr.bf16.gmra.mrb[120].mxu1 %v900_v34  ;;  %v868_v44 = vmax.f32 %v804_v37, 0.0  ;;  %v936_v32 = vld [vmem:[%s8844_s4] sm:$0x3] }
 0x168   :  { %v807_v43 = vadd.f32 %v7452_v33, %v375_v42  ;;  %v869_v46 = vmax.f32 %v805_v39, 0.0  ;;  %v6773_v33 = vld [vmem:[#allocation2 + $0x220] ss:$8 sps:$4 sm:$0xff]   ;;  %v7522_v55 = vrot.slane %v936_v32, %v7441_v14  ;;  %v7525_v56 = vrot.slane %v936_v32, %v7446_v29  ;;  %v6788_v42 = vld [vmem:[#allocation2 + $0x270] ss:$8 sps:$4 sm:$0xff]  }
 0x169   :  { %v870_v45 = vmax.f32 %v806_v41, 0.0  ;;  %2103 = vmatpush1.bf16.msra.mxu1 %v6773_v33  ;;  %v6791_v33 = vld [vmem:[#allocation2 + $0x280] ss:$8 sps:$4 sm:$0xff]  }
 0x16a   :  { %v871_v47 = vmax.f32 %v807_v43, 0.0  ;;  %2104 = vmatprep.subr.bf16.mxu1 %v6778_v58 }
 0x16b   :  { %v902_v48 = vpack.c.bf16 %v870_v45, %v868_v44  ;;  %v6793_v45 = vld [vmem:[#allocation2 + $0x284] ss:$8 sps:$4 sm:$0xff]  }
 0x16c   :  { %v903_v49 = vpack.c.bf16 %v871_v47, %v869_v46  ;;  %v7531_v8 = vpop.f32.mrb[64].mxu0 }
 0x16d   :  { %2105 = vmatpush1.bf16.msra.mxu1 %v6776_v57  ;;  %v7533_v11 = vpop.f32.mrb[65].mxu0 }
 0x16e   :  { %1290 = vmatprep.mubr.bf16.mxu1 %v903_v49  ;;  %2106 = vmatprep.subr.bf16.mxu1 %v6781_v4  ;;  %v7535_v16 = vpop.f32.mrb[66].mxu0 }
 0x16f   :  { %1291 = vmatmul.mubr.bf16.gmra.mrb[124].mxu1 %v902_v48  ;;  %v7537_v19 = vpop.f32.mrb[67].mxu0 }
 0x171   :  { %2107 = vmatpush1.bf16.msra.mxu1 %v6779_v3 }
 0x172   :  { %2108 = vmatprep.subr.bf16.mxu1 %v6784_v6 }
 0x174   :  { %v7539_v23 = vpop.f32.mrb[68].mxu0 }
 0x175   :  { %v7542_v26 = vpop.f32.mrb[69].mxu0  ;;  %2109 = vmatpush1.bf16.msra.mxu1 %v6782_v15 }
 0x176   :  { %v7545_v31 = vpop.f32.mrb[70].mxu0  ;;  %2110 = vmatprep.subr.bf16.mxu1 %v6787_v18 }
 0x177   :  { %v7548_v34 = vpop.f32.mrb[71].mxu0 }
 0x179   :  { %2111 = vmatpush1.bf16.msra.mxu1 %v6785_v30 }
 0x17a   :  { %2112 = vmatprep.subr.bf16.mxu1 %v6790_v22 }
 0x17c   :  { %v7551_v36 = vpop.f32.mrb[72].mxu0 }
 0x17d   :  { %v7553_v39 = vpop.f32.mrb[73].mxu0  ;;  %2113 = vmatpush1.bf16.msra.mxu1 %v6788_v42 }
 0x17e   :  { %v7555_v43 = vpop.f32.mrb[74].mxu0  ;;  %2114 = vmatprep.subr.bf16.mxu1 %v6793_v45  ;;  %v6800_v45 = vld [vmem:[#allocation2 + $0x2b0] ss:$8 sps:$4 sm:$0xff]  }
 0x17f   :  { %v7557_v46 = vpop.f32.mrb[75].mxu0 }
 0x181   :  { %2115 = vmatpush1.bf16.msra.mxu1 %v6791_v33 }
 0x184   :  { %v7559_v49 = vpop.f32.mrb[76].mxu0 }
 0x185   :  { %v7562_v52 = vpop.f32.mrb[77].mxu0 }
 0x186   :  { %v7565_v54 = vpop.f32.mrb[78].mxu0 }
 0x187   :  { %8853 = vst [vmem:[#allocation5_spill] sm:$0xff] %v7565_v54 }
 0x1ca   :  { %v1142_v59 = vpop.f32.mrb[64].mxu1 }
 0x1cb   :  { %v1143_v60 = vadd.f32 %v1142_v59, %v7522_v55  ;;  %v1144_v61 = vpop.f32.mrb[65].mxu1  ;;  %v6796_v59 = vld [vmem:[#allocation2 + $0x294] ss:$8 sps:$4 sm:$0xff]  }
 0x1cc   :  { %v1145_v62 = vadd.f32 %v1144_v61, %v7525_v56  ;;  %v1146_v63 = vpop.f32.mrb[66].mxu1  ;;  %2116 = vmatprep.subr.bf16.mxu1 %v6796_v59 }
 0x1cd   :  { %v1147_v1 = vadd.f32 %v1146_v63, %v7522_v55  ;;  %v1148_v2 = vpop.f32.mrb[67].mxu1  ;;  %v1301_v9 = vmax.f32 %v1143_v60, 0.0  ;;  %v7568_v60 = vpop.f32.mrb[79].mxu0 }
 0x1ce   :  { %v1149_v5 = vadd.f32 %v1148_v2, %v7525_v56  ;;  %v1302_v12 = vmax.f32 %v1145_v62, 0.0  ;;  %v7571_v62 = vpop.f32.mrb[80].mxu0 }
 0x1cf   :  { %v1303_v10 = vmax.f32 %v1147_v1, 0.0  ;;  %8854 = vst [vmem:[#allocation6_spill] sm:$0xff] %v7571_v62  ;;  %v7573_v2 = vpop.f32.mrb[81].mxu0 }
 0x1d0   :  { %v1304_v13 = vmax.f32 %v1149_v5, 0.0  ;;  %8855 = vst [vmem:[#allocation7_spill] sm:$0xff] %v7573_v2  ;;  %v6794_v5 = vld [vmem:[#allocation2 + $0x290] ss:$8 sps:$4 sm:$0xff]   ;;  %v7575_v6 = vpop.f32.mrb[82].mxu0 }
 0x1d1   :  { %v1365_v17 = vpack.c.bf16 %v1303_v10, %v1301_v9  ;;  %8856 = vst [vmem:[#allocation8_spill] sm:$0xff] %v7575_v6  ;;  %v6799_v10 = vld [vmem:[#allocation2 + $0x2a4] ss:$8 sps:$4 sm:$0xff]   ;;  %2117 = vmatpush1.bf16.msra.mxu1 %v6794_v5 }
 0x1d2   :  { %v1152_v20 = vpop.f32.mrb[68].mxu1  ;;  %v1366_v21 = vpack.c.bf16 %v1304_v13, %v1302_v12  ;;  %v7577_v12 = vpop.f32.mrb[83].mxu0  ;;  %2118 = vmatprep.subr.bf16.mxu1 %v6799_v10 }
 0x1d3   :  { %v1153_v24 = vadd.f32 %v1152_v20, %v7522_v55  ;;  %v1154_v25 = vpop.f32.mrb[69].mxu1  ;;  %8857 = vst [vmem:[#allocation9_spill] sm:$0xff] %v7577_v12 }
 0x1d4   :  { %v1155_v27 = vadd.f32 %v1154_v25, %v7525_v56  ;;  %v1156_v28 = vpop.f32.mrb[70].mxu1  ;;  %1635 = vmatprep.mubr.bf16.mxu0 %v1366_v21 }
 0x1d5   :  { %v1157_v0 = vadd.f32 %v1156_v28, %v7522_v55  ;;  %v1158_v7 = vpop.f32.mrb[71].mxu1  ;;  %1636 = vmatmul.mubr.bf16.vlgmr.msra.gmra.mrb[96].mxu0 %v1365_v17  ;;  %v1305_v37 = vmax.f32 %v1153_v24, 0.0  ;;  %v7579_v17 = vpop.f32.mrb[84].mxu0 }
 0x1d6   :  { %v1159_v35 = vadd.f32 %v1158_v7, %v7525_v56  ;;  %v1306_v40 = vmax.f32 %v1155_v27, 0.0  ;;  %8858 = vst [vmem:[#allocation10_spill] sm:$0xff] %v7579_v17  ;;  %v7582_v21 = vpop.f32.mrb[85].mxu0  ;;  %v6797_v27 = vld [vmem:[#allocation2 + $0x2a0] ss:$8 sps:$4 sm:$0xff]  }
 0x1d7   :  { %v1307_v38 = vmax.f32 %v1157_v0, 0.0  ;;  %8859 = vst [vmem:[#allocation11_spill] sm:$0xff] %v7582_v21  ;;  %v7585_v28 = vpop.f32.mrb[86].mxu0  ;;  %v6802_v7 = vld [vmem:[#allocation2 + $0x2b4] ss:$8 sps:$4 sm:$0xff]   ;;  %2119 = vmatpush1.bf16.msra.mxu1 %v6797_v27 }
 0x1d8   :  { %v1308_v41 = vmax.f32 %v1159_v35, 0.0  ;;  %8860 = vst [vmem:[#allocation12_spill] sm:$0xff] %v7585_v28  ;;  %v7588_v22 = vpop.f32.mrb[87].mxu0  ;;  %2120 = vmatprep.subr.bf16.mxu1 %v6802_v7 }
 0x1d9   :  { %v1367_v44 = vpack.c.bf16 %v1307_v38, %v1305_v37  ;;  %8861 = vst [vmem:[#allocation13_spill] sm:$0xff] %v7588_v22  ;;  %v7591_v37 = vpop.f32.mrb[88].mxu0 }
 0x1da   :  { %v1162_v47 = vpop.f32.mrb[72].mxu1  ;;  %v1368_v48 = vpack.c.bf16 %v1308_v41, %v1306_v40  ;;  %8862 = vst [vmem:[#allocation14_spill] sm:$0xff] %v7591_v37  ;;  %v7593_v41 = vpop.f32.mrb[89].mxu0 }
 0x1db   :  { %v1163_v50 = vadd.f32 %v1162_v47, %v7522_v55  ;;  %v1164_v51 = vpop.f32.mrb[73].mxu1  ;;  %8863 = vst [vmem:[#allocation15_spill] sm:$0xff] %v7593_v41  ;;  %v7595_v47 = vpop.f32.mrb[90].mxu0  ;;  %2121 = vmatpush1.bf16.msra.mxu1 %v6800_v45 }
 0x1dc   :  { %v1165_v53 = vadd.f32 %v1164_v51, %v7525_v56  ;;  %v1166_v32 = vpop.f32.mrb[74].mxu1  ;;  %1645 = vmatprep.mubr.bf16.mxu0 %v1368_v48  ;;  %8864 = vst [vmem:[#allocation16_spill] sm:$0xff] %v7595_v47  ;;  %v7597_v51 = vpop.f32.mrb[91].mxu0 }
 0x1dd   :  { %v1167_v57 = vadd.f32 %v1166_v32, %v7522_v55  ;;  %v1168_v58 = vpop.f32.mrb[75].mxu1  ;;  %1646 = vmatmul.mubr.bf16.gmra.mrb[100].mxu0 %v1367_v44  ;;  %v1309_v63 = vmax.f32 %v1163_v50, 0.0  ;;  %v6805_v50 = vld [vmem:[#allocation2 + $0x2c4] ss:$8 sps:$4 sm:$0xff]   ;;  %8865 = vst [vmem:[#allocation17_spill] sm:$0xff] %v7597_v51  ;;  %v7599_v33 = vpop.f32.mrb[92].mxu0 }
 0x1de   :  { %v1169_v61 = vadd.f32 %v1168_v58, %v7525_v56  ;;  %v1310_v3 = vmax.f32 %v1165_v53, 0.0  ;;  %8866 = vst [vmem:[#allocation18_spill] sm:$0xff] %v7599_v33  ;;  %v7602_v59 = vpop.f32.mrb[93].mxu0  ;;  %2122 = vmatprep.subr.bf16.mxu1 %v6805_v50 }
 0x1df   :  { %v1311_v1 = vmax.f32 %v1167_v57, 0.0  ;;  %8867 = vst [vmem:[#allocation19_spill] sm:$0xff] %v7602_v59 }
 0x1e0   :  { %v1312_v4 = vmax.f32 %v1169_v61, 0.0 }
 0x1e1   :  { %v1369_v9 = vpack.c.bf16 %v1311_v1, %v1309_v63  ;;  %v6803_v1 = vld [vmem:[#allocation2 + $0x2c0] ss:$8 sps:$4 sm:$0xff]  }
 0x1e2   :  { %v1172_v13 = vpop.f32.mrb[76].mxu1  ;;  %v1370_v15 = vpack.c.bf16 %v1312_v4, %v1310_v3  ;;  %v7605_v3 = vpop.f32.mrb[94].mxu0  ;;  %2123 = vmatpush1.bf16.msra.mxu1 %v6803_v1 }
 0x1e3   :  { %v1173_v18 = vadd.f32 %v1172_v13, %v7522_v55  ;;  %v1174_v20 = vpop.f32.mrb[77].mxu1  ;;  %8868 = vst [vmem:[#allocation20_spill] sm:$0xff] %v7605_v3  ;;  %v7608_v10 = vpop.f32.mrb[95].mxu0 }
 0x1e4   :  { %v1175_v24 = vadd.f32 %v1174_v20, %v7525_v56  ;;  %v1176_v25 = vpop.f32.mrb[78].mxu1  ;;  %1655 = vmatprep.mubr.bf16.mxu0 %v1370_v15  ;;  %8869 = vst [vmem:[#allocation21_spill] sm:$0xff] %v7608_v10 }
 0x1e5   :  { %v1177_v30 = vadd.f32 %v1176_v25, %v7522_v55  ;;  %v1178_v0 = vpop.f32.mrb[79].mxu1  ;;  %1656 = vmatmul.mubr.bf16.gmra.mrb[104].mxu0 %v1369_v9  ;;  %v1313_v38 = vmax.f32 %v1173_v18, 0.0  ;;  %v6808_v9 = vld [vmem:[#allocation2 + $0x2d4] ss:$8 sps:$4 sm:$0xff]   ;;  %v6806_v25 = vld [vmem:[#allocation2 + $0x2d0] ss:$8 sps:$4 sm:$0xff]  }
 0x1e6   :  { %v1179_v35 = vadd.f32 %v1178_v0, %v7525_v56  ;;  %v1314_v42 = vmax.f32 %v1175_v24, 0.0  ;;  %2124 = vmatprep.subr.bf16.mxu1 %v6808_v9 }
 0x1e7   :  { %v1315_v40 = vmax.f32 %v1177_v30, 0.0  ;;  %v6811_v30 = vld [vmem:[#allocation2 + $0x2e4] ss:$8 sps:$4 sm:$0xff]   ;;  %2125 = vmatpush1.bf16.msra.mxu1 %v6806_v25 }
 0x1e8   :  { %v1316_v44 = vmax.f32 %v1179_v35, 0.0  ;;  %2126 = vmatprep.subr.bf16.mxu1 %v6811_v30 }
 0x1e9   :  { %v1371_v48 = vpack.c.bf16 %v1315_v40, %v1313_v38 }
 0x1ea   :  { %v1182_v53 = vpop.f32.mrb[80].mxu1  ;;  %v1372_v32 = vpack.c.bf16 %v1316_v44, %v1314_v42  ;;  %v6809_v44 = vld [vmem:[#allocation2 + $0x2e0] ss:$8 sps:$4 sm:$0xff]  }
 0x1eb   :  { %v1183_v57 = vadd.f32 %v1182_v53, %v7522_v55  ;;  %v1184_v58 = vpop.f32.mrb[81].mxu1  ;;  %2127 = vmatpush1.bf16.msra.mxu1 %v6809_v44 }
 0x1ec   :  { %v1185_v61 = vadd.f32 %v1184_v58, %v7525_v56  ;;  %v1186_v63 = vpop.f32.mrb[82].mxu1  ;;  %1665 = vmatprep.mubr.bf16.mxu0 %v1372_v32 }
 0x1ed   :  { %v1187_v4 = vadd.f32 %v1186_v63, %v7522_v55  ;;  %v1188_v5 = vpop.f32.mrb[83].mxu1  ;;  %1666 = vmatmul.mubr.bf16.gmra.mrb[108].mxu0 %v1371_v48  ;;  %v1317_v15 = vmax.f32 %v1183_v57, 0.0 }
 0x1ee   :  { %v1189_v13 = vadd.f32 %v1188_v5, %v7525_v56  ;;  %v1318_v20 = vmax.f32 %v1185_v61, 0.0 }
 0x1ef   :  { %v1319_v18 = vmax.f32 %v1187_v4, 0.0 }
 0x1f0   :  { %v1320_v24 = vmax.f32 %v1189_v13, 0.0 }
 0x1f1   :  { %v1373_v27 = vpack.c.bf16 %v1319_v18, %v1317_v15 }
 0x1f2   :  { %v1192_v0 = vpop.f32.mrb[84].mxu1  ;;  %v1374_v7 = vpack.c.bf16 %v1320_v24, %v1318_v20 }
 0x1f3   :  { %v1193_v35 = vadd.f32 %v1192_v0, %v7522_v55  ;;  %v1194_v38 = vpop.f32.mrb[85].mxu1 }
 0x1f4   :  { %v1195_v40 = vadd.f32 %v1194_v38, %v7525_v56  ;;  %v1196_v42 = vpop.f32.mrb[86].mxu1  ;;  %1675 = vmatprep.mubr.bf16.mxu0 %v1374_v7 }
 0x1f5   :  { %v1197_v45 = vadd.f32 %v1196_v42, %v7522_v55  ;;  %v1198_v48 = vpop.f32.mrb[87].mxu1  ;;  %1676 = vmatmul.mubr.bf16.gmra.mrb[112].mxu0 %v1373_v27  ;;  %v1321_v53 = vmax.f32 %v1193_v35, 0.0 }
 0x1f6   :  { %v1199_v50 = vadd.f32 %v1198_v48, %v7525_v56  ;;  %v1322_v57 = vmax.f32 %v1195_v40, 0.0 }
 0x1f7   :  { %v1323_v32 = vmax.f32 %v1197_v45, 0.0 }
 0x1f8   :  { %v1324_v58 = vmax.f32 %v1199_v50, 0.0 }
 0x1f9   :  { %v1375_v61 = vpack.c.bf16 %v1323_v32, %v1321_v53 }
 0x1fa   :  { %v1202_v63 = vpop.f32.mrb[88].mxu1  ;;  %v1376_v1 = vpack.c.bf16 %v1324_v58, %v1322_v57 }
 0x1fb   :  { %v1203_v4 = vadd.f32 %v1202_v63, %v7522_v55  ;;  %v1204_v5 = vpop.f32.mrb[89].mxu1 }
 0x1fc   :  { %v1205_v9 = vadd.f32 %v1204_v5, %v7525_v56  ;;  %v1206_v13 = vpop.f32.mrb[90].mxu1  ;;  %1685 = vmatprep.mubr.bf16.mxu0 %v1376_v1 }
 0x1fd   :  { %v1207_v15 = vadd.f32 %v1206_v13, %v7522_v55  ;;  %v1208_v18 = vpop.f32.mrb[91].mxu1  ;;  %1686 = vmatmul.mubr.bf16.gmra.mrb[116].mxu0 %v1375_v61  ;;  %v1325_v24 = vmax.f32 %v1203_v4, 0.0 }
 0x1fe   :  { %v1209_v20 = vadd.f32 %v1208_v18, %v7525_v56  ;;  %v1326_v27 = vmax.f32 %v1205_v9, 0.0 }
 0x1ff   :  { %v1327_v25 = vmax.f32 %v1207_v15, 0.0 }
 0x200   :  { %v1328_v30 = vmax.f32 %v1209_v20, 0.0 }
 0x201   :  { %v1377_v0 = vpack.c.bf16 %v1327_v25, %v1325_v24 }
 0x202   :  { %v1212_v7 = vpop.f32.mrb[92].mxu1  ;;  %v1378_v35 = vpack.c.bf16 %v1328_v30, %v1326_v27 }
 0x203   :  { %v1213_v38 = vadd.f32 %v1212_v7, %v7522_v55  ;;  %v1214_v40 = vpop.f32.mrb[93].mxu1 }
 0x204   :  { %v1215_v42 = vadd.f32 %v1214_v40, %v7525_v56  ;;  %v1216_v44 = vpop.f32.mrb[94].mxu1  ;;  %1695 = vmatprep.mubr.bf16.mxu0 %v1378_v35 }
 0x205   :  { %v1217_v45 = vadd.f32 %v1216_v44, %v7522_v55  ;;  %v1218_v48 = vpop.f32.mrb[95].mxu1  ;;  %1696 = vmatmul.mubr.bf16.gmra.mrb[120].mxu0 %v1377_v0  ;;  %v1329_v53 = vmax.f32 %v1213_v38, 0.0 }
 0x206   :  { %v1219_v50 = vadd.f32 %v1218_v48, %v7525_v56  ;;  %v1330_v57 = vmax.f32 %v1215_v42, 0.0 }
 0x207   :  { %v1331_v32 = vmax.f32 %v1217_v45, 0.0 }
 0x208   :  { %v1332_v58 = vmax.f32 %v1219_v50, 0.0 }
 0x209   :  { %v1379_v61 = vpack.c.bf16 %v1331_v32, %v1329_v53 }
 0x20a   :  { %v1222_v63 = vpop.f32.mrb[96].mxu1  ;;  %v1380_v1 = vpack.c.bf16 %v1332_v58, %v1330_v57 }
 0x20b   :  { %v1223_v4 = vadd.f32 %v1222_v63, %v7522_v55  ;;  %v1224_v5 = vpop.f32.mrb[97].mxu1 }
 0x20c   :  { %v1225_v9 = vadd.f32 %v1224_v5, %v7525_v56  ;;  %v1226_v13 = vpop.f32.mrb[98].mxu1  ;;  %1705 = vmatprep.mubr.bf16.mxu0 %v1380_v1 }
 0x20d   :  { %v1227_v15 = vadd.f32 %v1226_v13, %v7522_v55  ;;  %v1228_v18 = vpop.f32.mrb[99].mxu1  ;;  %1706 = vmatmul.mubr.bf16.gmra.mrb[124].mxu0 %v1379_v61  ;;  %v1333_v24 = vmax.f32 %v1223_v4, 0.0 }
 0x20e   :  { %v1229_v20 = vadd.f32 %v1228_v18, %v7525_v56  ;;  %v1334_v27 = vmax.f32 %v1225_v9, 0.0 }
 0x20f   :  { %v1335_v25 = vmax.f32 %v1227_v15, 0.0 }
 0x210   :  { %v1336_v30 = vmax.f32 %v1229_v20, 0.0 }
 0x211   :  { %v1381_v0 = vpack.c.bf16 %v1335_v25, %v1333_v24 }
 0x212   :  { %v1232_v7 = vpop.f32.mrb[100].mxu1  ;;  %v1382_v35 = vpack.c.bf16 %v1336_v30, %v1334_v27 }
 0x213   :  { %v1233_v38 = vadd.f32 %v1232_v7, %v7522_v55  ;;  %v1234_v40 = vpop.f32.mrb[101].mxu1 }
 0x214   :  { %v1235_v42 = vadd.f32 %v1234_v40, %v7525_v56  ;;  %v1236_v44 = vpop.f32.mrb[102].mxu1  ;;  %1715 = vmatprep.mubr.bf16.mxu0 %v1382_v35 }
 0x215   :  { %v1237_v45 = vadd.f32 %v1236_v44, %v7522_v55  ;;  %v1238_v48 = vpop.f32.mrb[103].mxu1  ;;  %1716 = vmatmul.mubr.bf16.gmra.mrb[128].mxu0 %v1381_v0  ;;  %v1337_v53 = vmax.f32 %v1233_v38, 0.0 }
 0x216   :  { %v1239_v50 = vadd.f32 %v1238_v48, %v7525_v56  ;;  %v1338_v57 = vmax.f32 %v1235_v42, 0.0 }
 0x217   :  { %v1339_v32 = vmax.f32 %v1237_v45, 0.0 }
 0x218   :  { %v1340_v58 = vmax.f32 %v1239_v50, 0.0 }
 0x219   :  { %v1383_v61 = vpack.c.bf16 %v1339_v32, %v1337_v53 }
 0x21a   :  { %v1242_v63 = vpop.f32.mrb[104].mxu1  ;;  %v1384_v1 = vpack.c.bf16 %v1340_v58, %v1338_v57 }
 0x21b   :  { %v1243_v4 = vadd.f32 %v1242_v63, %v7522_v55  ;;  %v1244_v5 = vpop.f32.mrb[105].mxu1 }
 0x21c   :  { %v1245_v9 = vadd.f32 %v1244_v5, %v7525_v56  ;;  %v1246_v13 = vpop.f32.mrb[106].mxu1  ;;  %1725 = vmatprep.mubr.bf16.mxu0 %v1384_v1 }
 0x21d   :  { %v1247_v15 = vadd.f32 %v1246_v13, %v7522_v55  ;;  %v1248_v18 = vpop.f32.mrb[107].mxu1  ;;  %1726 = vmatmul.mubr.bf16.gmra.mrb[132].mxu0 %v1383_v61  ;;  %v1341_v24 = vmax.f32 %v1243_v4, 0.0 }
 0x21e   :  { %v1249_v20 = vadd.f32 %v1248_v18, %v7525_v56  ;;  %v1342_v27 = vmax.f32 %v1245_v9, 0.0 }
 0x21f   :  { %v1343_v25 = vmax.f32 %v1247_v15, 0.0 }
 0x220   :  { %v1344_v30 = vmax.f32 %v1249_v20, 0.0  ;;  %v6814_v20 = vld [vmem:[#allocation2 + $0x2f4] ss:$8 sps:$4 sm:$0xff]  }
 0x221   :  { %v1385_v0 = vpack.c.bf16 %v1343_v25, %v1341_v24  ;;  %v6812_v25 = vld [vmem:[#allocation2 + $0x2f0] ss:$8 sps:$4 sm:$0xff]   ;;  %2128 = vmatprep.subr.bf16.mxu1 %v6814_v20 }
 0x222   :  { %v1252_v7 = vpop.f32.mrb[108].mxu1  ;;  %v1386_v35 = vpack.c.bf16 %v1344_v30, %v1342_v27  ;;  %2129 = vmatpush1.bf16.msra.mxu1 %v6812_v25 }
 0x223   :  { %v1253_v38 = vadd.f32 %v1252_v7, %v7522_v55  ;;  %v1254_v40 = vpop.f32.mrb[109].mxu1 }
 0x224   :  { %v1255_v42 = vadd.f32 %v1254_v40, %v7525_v56  ;;  %v1256_v44 = vpop.f32.mrb[110].mxu1  ;;  %1735 = vmatprep.mubr.bf16.mxu0 %v1386_v35 }
 0x225   :  { %v1257_v45 = vadd.f32 %v1256_v44, %v7522_v55  ;;  %v1258_v48 = vpop.f32.mrb[111].mxu1  ;;  %1736 = vmatmul.mubr.bf16.gmra.mrb[136].mxu0 %v1385_v0  ;;  %v1345_v53 = vmax.f32 %v1253_v38, 0.0 }
 0x226   :  { %v1259_v50 = vadd.f32 %v1258_v48, %v7525_v56  ;;  %v1346_v57 = vmax.f32 %v1255_v42, 0.0 }
 0x227   :  { %v1347_v32 = vmax.f32 %v1257_v45, 0.0 }
 0x228   :  { %v1348_v58 = vmax.f32 %v1259_v50, 0.0 }
 0x229   :  { %v1387_v61 = vpack.c.bf16 %v1347_v32, %v1345_v53 }
 0x22a   :  { %v1262_v63 = vpop.f32.mrb[112].mxu1  ;;  %v1388_v1 = vpack.c.bf16 %v1348_v58, %v1346_v57 }
 0x22b   :  { %v1263_v4 = vadd.f32 %v1262_v63, %v7522_v55  ;;  %v1264_v5 = vpop.f32.mrb[113].mxu1 }
 0x22c   :  { %v1265_v9 = vadd.f32 %v1264_v5, %v7525_v56  ;;  %v1266_v13 = vpop.f32.mrb[114].mxu1  ;;  %1745 = vmatprep.mubr.bf16.mxu0 %v1388_v1 }
 0x22d   :  { %v1267_v15 = vadd.f32 %v1266_v13, %v7522_v55  ;;  %v1268_v18 = vpop.f32.mrb[115].mxu1  ;;  %1746 = vmatmul.mubr.bf16.gmra.mrb[140].mxu0 %v1387_v61  ;;  %v1349_v27 = vmax.f32 %v1263_v4, 0.0 }
 0x22e   :  { %v1269_v24 = vadd.f32 %v1268_v18, %v7525_v56  ;;  %v1350_v0 = vmax.f32 %v1265_v9, 0.0 }
 0x22f   :  { %v1351_v30 = vmax.f32 %v1267_v15, 0.0 }
 0x230   :  { %v1352_v7 = vmax.f32 %v1269_v24, 0.0 }
 0x231   :  { %v1389_v35 = vpack.c.bf16 %v1351_v30, %v1349_v27 }
 0x232   :  { %v1272_v38 = vpop.f32.mrb[116].mxu1  ;;  %v1390_v40 = vpack.c.bf16 %v1352_v7, %v1350_v0 }
 0x233   :  { %v1273_v42 = vadd.f32 %v1272_v38, %v7522_v55  ;;  %v1274_v44 = vpop.f32.mrb[117].mxu1 }
 0x234   :  { %v1275_v45 = vadd.f32 %v1274_v44, %v7525_v56  ;;  %v1276_v48 = vpop.f32.mrb[118].mxu1  ;;  %1755 = vmatprep.mubr.bf16.mxu0 %v1390_v40 }
 0x235   :  { %v1277_v50 = vadd.f32 %v1276_v48, %v7522_v55  ;;  %v1278_v53 = vpop.f32.mrb[119].mxu1  ;;  %1756 = vmatmul.mubr.bf16.gmra.mrb[144].mxu0 %v1389_v35  ;;  %v1353_v57 = vmax.f32 %v1273_v42, 0.0 }
 0x236   :  { %v1279_v32 = vadd.f32 %v1278_v53, %v7525_v56  ;;  %v1354_v61 = vmax.f32 %v1275_v45, 0.0 }
 0x237   :  { %v1355_v58 = vmax.f32 %v1277_v50, 0.0 }
 0x238   :  { %v1356_v63 = vmax.f32 %v1279_v32, 0.0 }
 0x239   :  { %v1391_v1 = vpack.c.bf16 %v1355_v58, %v1353_v57 }
 0x23a   :  { %v1282_v4 = vpop.f32.mrb[120].mxu1  ;;  %v1392_v5 = vpack.c.bf16 %v1356_v63, %v1354_v61 }
 0x23b   :  { %v1283_v9 = vadd.f32 %v1282_v4, %v7522_v55  ;;  %v1284_v13 = vpop.f32.mrb[121].mxu1 }
 0x23c   :  { %v1285_v15 = vadd.f32 %v1284_v13, %v7525_v56  ;;  %v1286_v18 = vpop.f32.mrb[122].mxu1  ;;  %1765 = vmatprep.mubr.bf16.mxu0 %v1392_v5  ;;  %v6815_v5 = vld [vmem:[#allocation2 + $0x300] ss:$8 sps:$4 sm:$0xff]   ;;  %v6818_v13 = vld [vmem:[#allocation2 + $0x310] ss:$8 sps:$4 sm:$0xff]  }
 0x23d   :  { %v1287_v20 = vadd.f32 %v1286_v18, %v7522_v55  ;;  %v1288_v24 = vpop.f32.mrb[123].mxu1  ;;  %1766 = vmatmul.mubr.bf16.gmra.mrb[148].mxu0 %v1391_v1  ;;  %v1357_v27 = vmax.f32 %v1283_v9, 0.0  ;;  %v6817_v9 = vld [vmem:[#allocation2 + $0x304] ss:$8 sps:$4 sm:$0xff]  }
 0x23e   :  { %v1289_v25 = vadd.f32 %v1288_v24, %v7525_v56  ;;  %v1358_v0 = vmax.f32 %v1285_v15, 0.0  ;;  %2593 = vmatprep.subr.bf16.mxu0 %v6817_v9  ;;  %v6820_v15 = vld [vmem:[#allocation2 + $0x314] ss:$8 sps:$4 sm:$0xff]   ;;  %v6823_v18 = vld [vmem:[#allocation2 + $0x324] ss:$8 sps:$4 sm:$0xff]  }
 0x23f   :  { %v1359_v30 = vmax.f32 %v1287_v20, 0.0  ;;  %2594 = vmatpush1.bf16.msra.mxu0 %v6815_v5 }
 0x240   :  { %v1360_v7 = vmax.f32 %v1289_v25, 0.0  ;;  %2595 = vmatprep.subr.bf16.mxu0 %v6820_v15  ;;  %v6824_v25 = vld [vmem:[#allocation2 + $0x330] ss:$8 sps:$4 sm:$0xff]  }
 0x241   :  { %v1393_v35 = vpack.c.bf16 %v1359_v30, %v1357_v27  ;;  %v6826_v27 = vld [vmem:[#allocation2 + $0x334] ss:$8 sps:$4 sm:$0xff]  }
 0x242   :  { %v1292_v38 = vpop.f32.mrb[124].mxu1  ;;  %v1394_v40 = vpack.c.bf16 %v1360_v7, %v1358_v0 }
 0x243   :  { %v1293_v42 = vadd.f32 %v1292_v38, %v7522_v55  ;;  %v1294_v44 = vpop.f32.mrb[125].mxu1  ;;  %2596 = vmatpush1.bf16.msra.mxu0 %v6818_v13 }
 0x244   :  { %v1295_v45 = vadd.f32 %v1294_v44, %v7525_v56  ;;  %v1296_v48 = vpop.f32.mrb[126].mxu1  ;;  %1775 = vmatprep.mubr.bf16.mxu0 %v1394_v40  ;;  %2597 = vmatprep.subr.bf16.mxu0 %v6823_v18  ;;  %v6827_v44 = vld [vmem:[#allocation2 + $0x340] ss:$8 sps:$4 sm:$0xff]  }
 0x245   :  { %v1297_v50 = vadd.f32 %v1296_v48, %v7522_v55  ;;  %v1298_v53 = vpop.f32.mrb[127].mxu1  ;;  %1776 = vmatmul.mubr.bf16.gmra.mrb[152].mxu0 %v1393_v35  ;;  %v1361_v57 = vmax.f32 %v1293_v42, 0.0  ;;  %v5914_v55 = vld [vmem:[%s8844_s4 + $0x2] sm:$0x3] }
 0x246   :  { %v1299_v32 = vadd.f32 %v1298_v53, %v7525_v56  ;;  %v1362_v61 = vmax.f32 %v1295_v45, 0.0  ;;  %v6821_v56 = vld [vmem:[#allocation2 + $0x320] ss:$8 sps:$4 sm:$0xff]   ;;  %v7659_v20 = vrot.slane %v5914_v55, %v7441_v14  ;;  %v7662_v24 = vrot.slane %v5914_v55, %v7446_v29  ;;  %v6829_v45 = vld [vmem:[#allocation2 + $0x344] ss:$8 sps:$4 sm:$0xff]  }
 0x247   :  { %v1363_v58 = vmax.f32 %v1297_v50, 0.0  ;;  %2598 = vmatpush1.bf16.msra.mxu0 %v6821_v56  ;;  %v6832_v50 = vld [vmem:[#allocation2 + $0x354] ss:$8 sps:$4 sm:$0xff]   ;;  %v6833_v56 = vld [vmem:[#allocation2 + $0x360] ss:$8 sps:$4 sm:$0xff]  }
 0x248   :  { %v1364_v63 = vmax.f32 %v1299_v32, 0.0  ;;  %2599 = vmatprep.subr.bf16.mxu0 %v6826_v27  ;;  %v6838_v27 = vld [vmem:[#allocation2 + $0x374] ss:$8 sps:$4 sm:$0xff]  }
 0x249   :  { %v1395_v1 = vpack.c.bf16 %v1363_v58, %v1361_v57 }
 0x24a   :  { %v1396_v4 = vpack.c.bf16 %v1364_v63, %v1362_v61  ;;  %v6830_v61 = vld [vmem:[#allocation2 + $0x350] ss:$8 sps:$4 sm:$0xff]  }
 0x24b   :  { %2600 = vmatpush1.bf16.msra.mxu0 %v6824_v25 }
 0x24c   :  { %1785 = vmatprep.mubr.bf16.mxu0 %v1396_v4  ;;  %2601 = vmatprep.subr.bf16.mxu0 %v6829_v45 }
 0x24d   :  { %1786 = vmatmul.mubr.bf16.gmra.mrb[156].mxu0 %v1395_v1  ;;  %v6835_v1 = vld [vmem:[#allocation2 + $0x364] ss:$8 sps:$4 sm:$0xff]  }
 0x24f   :  { %2602 = vmatpush1.bf16.msra.mxu0 %v6827_v44  ;;  %v6841_v44 = vld [vmem:[#allocation2 + $0x384] ss:$8 sps:$4 sm:$0xff]  }
 0x250   :  { %2603 = vmatprep.subr.bf16.mxu0 %v6832_v50 }
 0x253   :  { %2604 = vmatpush1.bf16.msra.mxu0 %v6830_v61 }
 0x254   :  { %2605 = vmatprep.subr.bf16.mxu0 %v6835_v1  ;;  %v6844_v1 = vld [vmem:[#allocation2 + $0x394] ss:$8 sps:$4 sm:$0xff]  }
 0x257   :  { %2606 = vmatpush1.bf16.msra.mxu0 %v6833_v56 }
 0x258   :  { %2607 = vmatprep.subr.bf16.mxu0 %v6838_v27 }
 0x2a8   :  { %v1637_v30 = vpop.f32.mrb[96].mxu0 }
 0x2a9   :  { %v1638_v0 = vadd.f32 %v1637_v30, %v7659_v20  ;;  %v1639_v7 = vpop.f32.mrb[97].mxu0 }
 0x2aa   :  { %v1640_v35 = vadd.f32 %v1639_v7, %v7662_v24  ;;  %v1641_v38 = vpop.f32.mrb[98].mxu0 }
 0x2ab   :  { %v1642_v40 = vadd.f32 %v1641_v38, %v7659_v20  ;;  %v1643_v42 = vpop.f32.mrb[99].mxu0  ;;  %v1796_v53 = vmax.f32 %v1638_v0, 0.0 }
 0x2ac   :  { %v1644_v48 = vadd.f32 %v1643_v42, %v7662_v24  ;;  %v1797_v57 = vmax.f32 %v1640_v35, 0.0 }
 0x2ad   :  { %v1798_v32 = vmax.f32 %v1642_v40, 0.0  ;;  %v6836_v40 = vld [vmem:[#allocation2 + $0x370] ss:$8 sps:$4 sm:$0xff]  }
 0x2ae   :  { %v1799_v58 = vmax.f32 %v1644_v48, 0.0  ;;  %2608 = vmatpush1.bf16.msra.mxu0 %v6836_v40 }
 0x2af   :  { %v1860_v63 = vpack.c.bf16 %v1798_v32, %v1796_v53  ;;  %2609 = vmatprep.subr.bf16.mxu0 %v6841_v44  ;;  %v6850_v44 = vld [vmem:[#allocation2 + $0x3b4] ss:$8 sps:$4 sm:$0xff]  }
 0x2b0   :  { %v1647_v4 = vpop.f32.mrb[100].mxu0  ;;  %v1861_v5 = vpack.c.bf16 %v1799_v58, %v1797_v57  ;;  %v6839_v58 = vld [vmem:[#allocation2 + $0x380] ss:$8 sps:$4 sm:$0xff]  }
 0x2b1   :  { %v1648_v9 = vadd.f32 %v1647_v4, %v7659_v20  ;;  %v1649_v13 = vpop.f32.mrb[101].mxu0 }
 0x2b2   :  { %v1650_v15 = vadd.f32 %v1649_v13, %v7662_v24  ;;  %v1651_v55 = vpop.f32.mrb[102].mxu0  ;;  %2130 = vmatprep.mubr.bf16.mxu1 %v1861_v5  ;;  %2610 = vmatpush1.bf16.msra.mxu0 %v6839_v58 }
 0x2b3   :  { %v1652_v18 = vadd.f32 %v1651_v55, %v7659_v20  ;;  %v1653_v25 = vpop.f32.mrb[103].mxu0  ;;  %2131 = vmatmul.mubr.bf16.vlgmr.msra.gmra.mrb[128].mxu1 %v1860_v63  ;;  %v1800_v0 = vmax.f32 %v1648_v9, 0.0  ;;  %v6842_v55 = vld [vmem:[#allocation2 + $0x390] ss:$8 sps:$4 sm:$0xff]   ;;  %2611 = vmatprep.subr.bf16.mxu0 %v6844_v1 }
 0x2b4   :  { %v1654_v30 = vadd.f32 %v1653_v25, %v7662_v24  ;;  %v1801_v35 = vmax.f32 %v1650_v15, 0.0 }
 0x2b5   :  { %v1802_v7 = vmax.f32 %v1652_v18, 0.0  ;;  %v6847_v18 = vld [vmem:[#allocation2 + $0x3a4] ss:$8 sps:$4 sm:$0xff]  }
 0x2b6   :  { %v1803_v38 = vmax.f32 %v1654_v30, 0.0  ;;  %2612 = vmatpush1.bf16.msra.mxu0 %v6842_v55 }
 0x2b7   :  { %v1862_v42 = vpack.c.bf16 %v1802_v7, %v1800_v0  ;;  %2613 = vmatprep.subr.bf16.mxu0 %v6847_v18  ;;  %v6856_v18 = vld [vmem:[#allocation2 + $0x3d4] ss:$8 sps:$4 sm:$0xff]  }
 0x2b8   :  { %v1657_v45 = vpop.f32.mrb[104].mxu0  ;;  %v1863_v48 = vpack.c.bf16 %v1803_v38, %v1801_v35  ;;  %v6845_v38 = vld [vmem:[#allocation2 + $0x3a0] ss:$8 sps:$4 sm:$0xff]  }
 0x2b9   :  { %v1658_v50 = vadd.f32 %v1657_v45, %v7659_v20  ;;  %v1659_v53 = vpop.f32.mrb[105].mxu0 }
 0x2ba   :  { %v1660_v32 = vadd.f32 %v1659_v53, %v7662_v24  ;;  %v1661_v57 = vpop.f32.mrb[106].mxu0  ;;  %2140 = vmatprep.mubr.bf16.mxu1 %v1863_v48  ;;  %2614 = vmatpush1.bf16.msra.mxu0 %v6845_v38 }
 0x2bb   :  { %v1662_v61 = vadd.f32 %v1661_v57, %v7659_v20  ;;  %v1663_v63 = vpop.f32.mrb[107].mxu0  ;;  %2141 = vmatmul.mubr.bf16.gmra.mrb[132].mxu1 %v1862_v42  ;;  %v1804_v5 = vmax.f32 %v1658_v50, 0.0  ;;  %v6848_v57 = vld [vmem:[#allocation2 + $0x3b0] ss:$8 sps:$4 sm:$0xff]   ;;  %2615 = vmatprep.subr.bf16.mxu0 %v6850_v44 }
 0x2bc   :  { %v1664_v4 = vadd.f32 %v1663_v63, %v7662_v24  ;;  %v1805_v13 = vmax.f32 %v1660_v32, 0.0 }
 0x2bd   :  { %v1806_v9 = vmax.f32 %v1662_v61, 0.0  ;;  %v6853_v61 = vld [vmem:[#allocation2 + $0x3c4] ss:$8 sps:$4 sm:$0xff]  }
 0x2be   :  { %v1807_v15 = vmax.f32 %v1664_v4, 0.0  ;;  %2616 = vmatpush1.bf16.msra.mxu0 %v6848_v57 }
 0x2bf   :  { %v1864_v56 = vpack.c.bf16 %v1806_v9, %v1804_v5  ;;  %2617 = vmatprep.subr.bf16.mxu0 %v6853_v61 }
 0x2c0   :  { %v1667_v25 = vpop.f32.mrb[108].mxu0  ;;  %v1865_v27 = vpack.c.bf16 %v1807_v15, %v1805_v13  ;;  %v6851_v15 = vld [vmem:[#allocation2 + $0x3c0] ss:$8 sps:$4 sm:$0xff]  }
 0x2c1   :  { %v1668_v30 = vadd.f32 %v1667_v25, %v7659_v20  ;;  %v1669_v0 = vpop.f32.mrb[109].mxu0 }
 0x2c2   :  { %v1670_v7 = vadd.f32 %v1669_v0, %v7662_v24  ;;  %v1671_v35 = vpop.f32.mrb[110].mxu0  ;;  %2150 = vmatprep.mubr.bf16.mxu1 %v1865_v27  ;;  %2618 = vmatpush1.bf16.msra.mxu0 %v6851_v15 }
 0x2c3   :  { %v1672_v40 = vadd.f32 %v1671_v35, %v7659_v20  ;;  %v1673_v42 = vpop.f32.mrb[111].mxu0  ;;  %2151 = vmatmul.mubr.bf16.gmra.mrb[136].mxu1 %v1864_v56  ;;  %v1808_v48 = vmax.f32 %v1668_v30, 0.0  ;;  %v6854_v35 = vld [vmem:[#allocation2 + $0x3d0] ss:$8 sps:$4 sm:$0xff]   ;;  %2619 = vmatprep.subr.bf16.mxu0 %v6856_v18 }
 0x2c4   :  { %v1674_v45 = vadd.f32 %v1673_v42, %v7662_v24  ;;  %v1809_v53 = vmax.f32 %v1670_v7, 0.0 }
 0x2c5   :  { %v1810_v50 = vmax.f32 %v1672_v40, 0.0  ;;  %v6859_v40 = vld [vmem:[#allocation2 + $0x3e4] ss:$8 sps:$4 sm:$0xff]  }
 0x2c6   :  { %v1811_v32 = vmax.f32 %v1674_v45, 0.0  ;;  %2620 = vmatpush1.bf16.msra.mxu0 %v6854_v35 }
 0x2c7   :  { %v1866_v58 = vpack.c.bf16 %v1810_v50, %v1808_v48  ;;  %2621 = vmatprep.subr.bf16.mxu0 %v6859_v40 }
 0x2c8   :  { %v1677_v63 = vpop.f32.mrb[112].mxu0  ;;  %v1867_v1 = vpack.c.bf16 %v1811_v32, %v1809_v53  ;;  %v6857_v32 = vld [vmem:[#allocation2 + $0x3e0] ss:$8 sps:$4 sm:$0xff]  }
 0x2c9   :  { %v1678_v4 = vadd.f32 %v1677_v63, %v7659_v20  ;;  %v1679_v5 = vpop.f32.mrb[113].mxu0 }
 0x2ca   :  { %v1680_v9 = vadd.f32 %v1679_v5, %v7662_v24  ;;  %v1681_v13 = vpop.f32.mrb[114].mxu0  ;;  %2160 = vmatprep.mubr.bf16.mxu1 %v1867_v1  ;;  %2622 = vmatpush1.bf16.msra.mxu0 %v6857_v32 }
 0x2cb   :  { %v1682_v55 = vadd.f32 %v1681_v13, %v7659_v20  ;;  %v1683_v56 = vpop.f32.mrb[115].mxu0  ;;  %2161 = vmatmul.mubr.bf16.gmra.mrb[140].mxu1 %v1866_v58  ;;  %v1812_v27 = vmax.f32 %v1678_v4, 0.0 }
 0x2cc   :  { %v1684_v25 = vadd.f32 %v1683_v56, %v7662_v24  ;;  %v1813_v0 = vmax.f32 %v1680_v9, 0.0 }
 0x2cd   :  { %v1814_v30 = vmax.f32 %v1682_v55, 0.0 }
 0x2ce   :  { %v1815_v7 = vmax.f32 %v1684_v25, 0.0 }
 0x2cf   :  { %v1868_v38 = vpack.c.bf16 %v1814_v30, %v1812_v27 }
 0x2d0   :  { %v1687_v42 = vpop.f32.mrb[116].mxu0  ;;  %v1869_v44 = vpack.c.bf16 %v1815_v7, %v1813_v0 }
 0x2d1   :  { %v1688_v45 = vadd.f32 %v1687_v42, %v7659_v20  ;;  %v1689_v48 = vpop.f32.mrb[117].mxu0 }
 0x2d2   :  { %v1690_v50 = vadd.f32 %v1689_v48, %v7662_v24  ;;  %v1691_v53 = vpop.f32.mrb[118].mxu0  ;;  %2170 = vmatprep.mubr.bf16.mxu1 %v1869_v44 }
 0x2d3   :  { %v1692_v57 = vadd.f32 %v1691_v53, %v7659_v20  ;;  %v1693_v58 = vpop.f32.mrb[119].mxu0  ;;  %2171 = vmatmul.mubr.bf16.gmra.mrb[144].mxu1 %v1868_v38  ;;  %v1816_v63 = vmax.f32 %v1688_v45, 0.0 }
 0x2d4   :  { %v1694_v61 = vadd.f32 %v1693_v58, %v7662_v24  ;;  %v1817_v4 = vmax.f32 %v1690_v50, 0.0 }
 0x2d5   :  { %v1818_v1 = vmax.f32 %v1692_v57, 0.0 }
 0x2d6   :  { %v1819_v5 = vmax.f32 %v1694_v61, 0.0 }
 0x2d7   :  { %v1870_v9 = vpack.c.bf16 %v1818_v1, %v1816_v63 }
 0x2d8   :  { %v1697_v13 = vpop.f32.mrb[120].mxu0  ;;  %v1871_v15 = vpack.c.bf16 %v1819_v5, %v1817_v4 }
 0x2d9   :  { %v1698_v55 = vadd.f32 %v1697_v13, %v7659_v20  ;;  %v1699_v56 = vpop.f32.mrb[121].mxu0 }
 0x2da   :  { %v1700_v18 = vadd.f32 %v1699_v56, %v7662_v24  ;;  %v1701_v25 = vpop.f32.mrb[122].mxu0  ;;  %2180 = vmatprep.mubr.bf16.mxu1 %v1871_v15 }
 0x2db   :  { %v1702_v27 = vadd.f32 %v1701_v25, %v7659_v20  ;;  %v1703_v30 = vpop.f32.mrb[123].mxu0  ;;  %2181 = vmatmul.mubr.bf16.gmra.mrb[148].mxu1 %v1870_v9  ;;  %v1820_v7 = vmax.f32 %v1698_v55, 0.0 }
 0x2dc   :  { %v1704_v0 = vadd.f32 %v1703_v30, %v7662_v24  ;;  %v1821_v38 = vmax.f32 %v1700_v18, 0.0 }
 0x2dd   :  { %v1822_v35 = vmax.f32 %v1702_v27, 0.0 }
 0x2de   :  { %v1823_v40 = vmax.f32 %v1704_v0, 0.0 }
 0x2df   :  { %v1872_v42 = vpack.c.bf16 %v1822_v35, %v1820_v7 }
 0x2e0   :  { %v1707_v44 = vpop.f32.mrb[124].mxu0  ;;  %v1873_v45 = vpack.c.bf16 %v1823_v40, %v1821_v38 }
 0x2e1   :  { %v1708_v48 = vadd.f32 %v1707_v44, %v7659_v20  ;;  %v1709_v50 = vpop.f32.mrb[125].mxu0 }
 0x2e2   :  { %v1710_v53 = vadd.f32 %v1709_v50, %v7662_v24  ;;  %v1711_v32 = vpop.f32.mrb[126].mxu0  ;;  %2190 = vmatprep.mubr.bf16.mxu1 %v1873_v45 }
 0x2e3   :  { %v1712_v57 = vadd.f32 %v1711_v32, %v7659_v20  ;;  %v1713_v58 = vpop.f32.mrb[127].mxu0  ;;  %2191 = vmatmul.mubr.bf16.gmra.mrb[152].mxu1 %v1872_v42  ;;  %v1824_v63 = vmax.f32 %v1708_v48, 0.0 }
 0x2e4   :  { %v1714_v61 = vadd.f32 %v1713_v58, %v7662_v24  ;;  %v1825_v4 = vmax.f32 %v1710_v53, 0.0 }
 0x2e5   :  { %v1826_v1 = vmax.f32 %v1712_v57, 0.0 }
 0x2e6   :  { %v1827_v5 = vmax.f32 %v1714_v61, 0.0 }
 0x2e7   :  { %v1874_v9 = vpack.c.bf16 %v1826_v1, %v1824_v63 }
 0x2e8   :  { %v1717_v13 = vpop.f32.mrb[128].mxu0  ;;  %v1875_v15 = vpack.c.bf16 %v1827_v5, %v1825_v4 }
 0x2e9   :  { %v1718_v55 = vadd.f32 %v1717_v13, %v7659_v20  ;;  %v1719_v56 = vpop.f32.mrb[129].mxu0 }
 0x2ea   :  { %v1720_v18 = vadd.f32 %v1719_v56, %v7662_v24  ;;  %v1721_v25 = vpop.f32.mrb[130].mxu0  ;;  %2200 = vmatprep.mubr.bf16.mxu1 %v1875_v15 }
 0x2eb   :  { %v1722_v27 = vadd.f32 %v1721_v25, %v7659_v20  ;;  %v1723_v30 = vpop.f32.mrb[131].mxu0  ;;  %2201 = vmatmul.mubr.bf16.gmra.mrb[156].mxu1 %v1874_v9  ;;  %v1828_v7 = vmax.f32 %v1718_v55, 0.0 }
 0x2ec   :  { %v1724_v0 = vadd.f32 %v1723_v30, %v7662_v24  ;;  %v1829_v38 = vmax.f32 %v1720_v18, 0.0 }
 0x2ed   :  { %v1830_v35 = vmax.f32 %v1722_v27, 0.0 }
 0x2ee   :  { %v1831_v40 = vmax.f32 %v1724_v0, 0.0 }
 0x2ef   :  { %v1876_v42 = vpack.c.bf16 %v1830_v35, %v1828_v7 }
 0x2f0   :  { %v1727_v44 = vpop.f32.mrb[132].mxu0  ;;  %v1877_v45 = vpack.c.bf16 %v1831_v40, %v1829_v38 }
 0x2f1   :  { %v1728_v48 = vadd.f32 %v1727_v44, %v7659_v20  ;;  %v1729_v50 = vpop.f32.mrb[133].mxu0 }
 0x2f2   :  { %v1730_v53 = vadd.f32 %v1729_v50, %v7662_v24  ;;  %v1731_v32 = vpop.f32.mrb[134].mxu0  ;;  %2210 = vmatprep.mubr.bf16.mxu1 %v1877_v45 }
 0x2f3   :  { %v1732_v57 = vadd.f32 %v1731_v32, %v7659_v20  ;;  %v1733_v58 = vpop.f32.mrb[135].mxu0  ;;  %2211 = vmatmul.mubr.bf16.gmra.mrb[160].mxu1 %v1876_v42  ;;  %v1832_v63 = vmax.f32 %v1728_v48, 0.0 }
 0x2f4   :  { %v1734_v61 = vadd.f32 %v1733_v58, %v7662_v24  ;;  %v1833_v4 = vmax.f32 %v1730_v53, 0.0 }
 0x2f5   :  { %v1834_v1 = vmax.f32 %v1732_v57, 0.0 }
 0x2f6   :  { %v1835_v5 = vmax.f32 %v1734_v61, 0.0 }
 0x2f7   :  { %v1878_v9 = vpack.c.bf16 %v1834_v1, %v1832_v63 }
 0x2f8   :  { %v1737_v13 = vpop.f32.mrb[136].mxu0  ;;  %v1879_v15 = vpack.c.bf16 %v1835_v5, %v1833_v4 }
 0x2f9   :  { %v1738_v55 = vadd.f32 %v1737_v13, %v7659_v20  ;;  %v1739_v56 = vpop.f32.mrb[137].mxu0 }
 0x2fa   :  { %v1740_v18 = vadd.f32 %v1739_v56, %v7662_v24  ;;  %v1741_v25 = vpop.f32.mrb[138].mxu0  ;;  %2220 = vmatprep.mubr.bf16.mxu1 %v1879_v15 }
 0x2fb   :  { %v1742_v27 = vadd.f32 %v1741_v25, %v7659_v20  ;;  %v1743_v30 = vpop.f32.mrb[139].mxu0  ;;  %2221 = vmatmul.mubr.bf16.gmra.mrb[164].mxu1 %v1878_v9  ;;  %v1836_v7 = vmax.f32 %v1738_v55, 0.0 }
 0x2fc   :  { %v1744_v0 = vadd.f32 %v1743_v30, %v7662_v24  ;;  %v1837_v38 = vmax.f32 %v1740_v18, 0.0 }
 0x2fd   :  { %v1838_v35 = vmax.f32 %v1742_v27, 0.0 }
 0x2fe   :  { %v1839_v40 = vmax.f32 %v1744_v0, 0.0  ;;  %v6862_v0 = vld [vmem:[#allocation2 + $0x3f4] ss:$8 sps:$4 sm:$0xff]  }
 0x2ff   :  { %v1880_v42 = vpack.c.bf16 %v1838_v35, %v1836_v7  ;;  %v6860_v35 = vld [vmem:[#allocation2 + $0x3f0] ss:$8 sps:$4 sm:$0xff]   ;;  %2623 = vmatprep.subr.bf16.mxu0 %v6862_v0 }
 0x300   :  { %v1747_v44 = vpop.f32.mrb[140].mxu0  ;;  %v1881_v45 = vpack.c.bf16 %v1839_v40, %v1837_v38  ;;  %2624 = vmatpush1.bf16.msra.mxu0 %v6860_v35 }
 0x301   :  { %v1748_v48 = vadd.f32 %v1747_v44, %v7659_v20  ;;  %v1749_v50 = vpop.f32.mrb[141].mxu0 }
 0x302   :  { %v1750_v53 = vadd.f32 %v1749_v50, %v7662_v24  ;;  %v1751_v32 = vpop.f32.mrb[142].mxu0  ;;  %2230 = vmatprep.mubr.bf16.mxu1 %v1881_v45 }
 0x303   :  { %v1752_v57 = vadd.f32 %v1751_v32, %v7659_v20  ;;  %v1753_v58 = vpop.f32.mrb[143].mxu0  ;;  %2231 = vmatmul.mubr.bf16.gmra.mrb[168].mxu1 %v1880_v42  ;;  %v1840_v63 = vmax.f32 %v1748_v48, 0.0 }
 0x304   :  { %v1754_v61 = vadd.f32 %v1753_v58, %v7662_v24  ;;  %v1841_v4 = vmax.f32 %v1750_v53, 0.0 }
 0x305   :  { %v1842_v1 = vmax.f32 %v1752_v57, 0.0 }
 0x306   :  { %v1843_v5 = vmax.f32 %v1754_v61, 0.0 }
 0x307   :  { %v1882_v9 = vpack.c.bf16 %v1842_v1, %v1840_v63 }
 0x308   :  { %v1757_v13 = vpop.f32.mrb[144].mxu0  ;;  %v1883_v15 = vpack.c.bf16 %v1843_v5, %v1841_v4 }
 0x309   :  { %v1758_v55 = vadd.f32 %v1757_v13, %v7659_v20  ;;  %v1759_v56 = vpop.f32.mrb[145].mxu0 }
 0x30a   :  { %v1760_v18 = vadd.f32 %v1759_v56, %v7662_v24  ;;  %v1761_v25 = vpop.f32.mrb[146].mxu0  ;;  %2240 = vmatprep.mubr.bf16.mxu1 %v1883_v15 }
 0x30b   :  { %v1762_v27 = vadd.f32 %v1761_v25, %v7659_v20  ;;  %v1763_v30 = vpop.f32.mrb[147].mxu0  ;;  %2241 = vmatmul.mubr.bf16.gmra.mrb[172].mxu1 %v1882_v9  ;;  %v1844_v38 = vmax.f32 %v1758_v55, 0.0 }
 0x30c   :  { %v1764_v7 = vadd.f32 %v1763_v30, %v7662_v24  ;;  %v1845_v42 = vmax.f32 %v1760_v18, 0.0 }
 0x30d   :  { %v1846_v40 = vmax.f32 %v1762_v27, 0.0 }
 0x30e   :  { %v1847_v44 = vmax.f32 %v1764_v7, 0.0 }
 0x30f   :  { %v1884_v45 = vpack.c.bf16 %v1846_v40, %v1844_v38 }
 0x310   :  { %v1767_v48 = vpop.f32.mrb[148].mxu0  ;;  %v1885_v50 = vpack.c.bf16 %v1847_v44, %v1845_v42 }
 0x311   :  { %v1768_v53 = vadd.f32 %v1767_v48, %v7659_v20  ;;  %v1769_v32 = vpop.f32.mrb[149].mxu0 }
 0x312   :  { %v1770_v57 = vadd.f32 %v1769_v32, %v7662_v24  ;;  %v1771_v58 = vpop.f32.mrb[150].mxu0  ;;  %2250 = vmatprep.mubr.bf16.mxu1 %v1885_v50 }
 0x313   :  { %v1772_v61 = vadd.f32 %v1771_v58, %v7659_v20  ;;  %v1773_v63 = vpop.f32.mrb[151].mxu0  ;;  %2251 = vmatmul.mubr.bf16.gmra.mrb[176].mxu1 %v1884_v45  ;;  %v1848_v4 = vmax.f32 %v1768_v53, 0.0 }
 0x314   :  { %v1774_v1 = vadd.f32 %v1773_v63, %v7662_v24  ;;  %v1849_v9 = vmax.f32 %v1770_v57, 0.0 }
 0x315   :  { %v1850_v5 = vmax.f32 %v1772_v61, 0.0 }
 0x316   :  { %v1851_v13 = vmax.f32 %v1774_v1, 0.0 }
 0x317   :  { %v1886_v15 = vpack.c.bf16 %v1850_v5, %v1848_v4 }
 0x318   :  { %v1777_v55 = vpop.f32.mrb[152].mxu0  ;;  %v1887_v56 = vpack.c.bf16 %v1851_v13, %v1849_v9 }
 0x319   :  { %v1778_v18 = vadd.f32 %v1777_v55, %v7659_v20  ;;  %v1779_v25 = vpop.f32.mrb[153].mxu0 }
 0x31a   :  { %v1780_v27 = vadd.f32 %v1779_v25, %v7662_v24  ;;  %v1781_v30 = vpop.f32.mrb[154].mxu0  ;;  %2260 = vmatprep.mubr.bf16.mxu1 %v1887_v56  ;;  %v6863_v56 = vld [vmem:[#allocation2 + $0x400] ss:$8 sps:$4 sm:$0xff]   ;;  %v6866_v25 = vld [vmem:[#allocation2 + $0x410] ss:$8 sps:$4 sm:$0xff]  }
 0x31b   :  { %v1782_v0 = vadd.f32 %v1781_v30, %v7659_v20  ;;  %v1783_v7 = vpop.f32.mrb[155].mxu0  ;;  %2261 = vmatmul.mubr.bf16.gmra.mrb[180].mxu1 %v1886_v15  ;;  %v1852_v38 = vmax.f32 %v1778_v18, 0.0  ;;  %v6865_v18 = vld [vmem:[#allocation2 + $0x404] ss:$8 sps:$4 sm:$0xff]  }
 0x31c   :  { %v1784_v35 = vadd.f32 %v1783_v7, %v7662_v24  ;;  %v1853_v42 = vmax.f32 %v1780_v27, 0.0  ;;  %3088 = vmatprep.subr.bf16.mxu1 %v6865_v18  ;;  %v6868_v27 = vld [vmem:[#allocation2 + $0x414] ss:$8 sps:$4 sm:$0xff]   ;;  %v6871_v30 = vld [vmem:[#allocation2 + $0x424] ss:$8 sps:$4 sm:$0xff]  }
 0x31d   :  { %v1854_v40 = vmax.f32 %v1782_v0, 0.0  ;;  %3089 = vmatpush1.bf16.msra.mxu1 %v6863_v56  ;;  %v6883_v56 = vld [vmem:[#allocation2 + $0x464] ss:$8 sps:$4 sm:$0xff]  }
 0x31e   :  { %v1855_v44 = vmax.f32 %v1784_v35, 0.0  ;;  %3090 = vmatprep.subr.bf16.mxu1 %v6868_v27 }
 0x31f   :  { %v1888_v45 = vpack.c.bf16 %v1854_v40, %v1852_v38  ;;  %v6872_v38 = vld [vmem:[#allocation2 + $0x430] ss:$8 sps:$4 sm:$0xff]   ;;  %v6874_v40 = vld [vmem:[#allocation2 + $0x434] ss:$8 sps:$4 sm:$0xff]  }
 0x320   :  { %v1787_v48 = vpop.f32.mrb[156].mxu0  ;;  %v1889_v50 = vpack.c.bf16 %v1855_v44, %v1853_v42 }
 0x321   :  { %v1788_v53 = vadd.f32 %v1787_v48, %v7659_v20  ;;  %v1789_v32 = vpop.f32.mrb[157].mxu0  ;;  %3091 = vmatpush1.bf16.msra.mxu1 %v6866_v25 }
 0x322   :  { %v1790_v57 = vadd.f32 %v1789_v32, %v7662_v24  ;;  %v1791_v58 = vpop.f32.mrb[158].mxu0  ;;  %2270 = vmatprep.mubr.bf16.mxu1 %v1889_v50  ;;  %3092 = vmatprep.subr.bf16.mxu1 %v6871_v30  ;;  %v6875_v32 = vld [vmem:[#allocation2 + $0x440] ss:$8 sps:$4 sm:$0xff]  }
 0x323   :  { %v1792_v61 = vadd.f32 %v1791_v58, %v7659_v20  ;;  %v1793_v63 = vpop.f32.mrb[159].mxu0  ;;  %2271 = vmatmul.mubr.bf16.gmra.mrb[184].mxu1 %v1888_v45  ;;  %v1856_v4 = vmax.f32 %v1788_v53, 0.0  ;;  %v5947_v20 = vld [vmem:[%s8844_s4 + $0x4] sm:$0x3] }
 0x324   :  { %v1794_v1 = vadd.f32 %v1793_v63, %v7662_v24  ;;  %v1857_v9 = vmax.f32 %v1790_v57, 0.0  ;;  %v6869_v24 = vld [vmem:[#allocation2 + $0x420] ss:$8 sps:$4 sm:$0xff]   ;;  %v7732_v0 = vrot.slane %v5947_v20, %v7441_v14  ;;  %v7735_v7 = vrot.slane %v5947_v20, %v7446_v29  ;;  %v6877_v57 = vld [vmem:[#allocation2 + $0x444] ss:$8 sps:$4 sm:$0xff]  }
 0x325   :  { %v1858_v5 = vmax.f32 %v1792_v61, 0.0  ;;  %3093 = vmatpush1.bf16.msra.mxu1 %v6869_v24  ;;  %v6880_v61 = vld [vmem:[#allocation2 + $0x454] ss:$8 sps:$4 sm:$0xff]  }
 0x326   :  { %v1859_v13 = vmax.f32 %v1794_v1, 0.0  ;;  %3094 = vmatprep.subr.bf16.mxu1 %v6874_v40  ;;  %v6886_v40 = vld [vmem:[#allocation2 + $0x474] ss:$8 sps:$4 sm:$0xff]  }
 0x327   :  { %v1890_v15 = vpack.c.bf16 %v1858_v5, %v1856_v4 }
 0x328   :  { %v1891_v55 = vpack.c.bf16 %v1859_v13, %v1857_v9  ;;  %v6878_v13 = vld [vmem:[#allocation2 + $0x450] ss:$8 sps:$4 sm:$0xff]  }
 0x329   :  { %3095 = vmatpush1.bf16.msra.mxu1 %v6872_v38 }
 0x32a   :  { %2280 = vmatprep.mubr.bf16.mxu1 %v1891_v55  ;;  %3096 = vmatprep.subr.bf16.mxu1 %v6877_v57 }
 0x32b   :  { %2281 = vmatmul.mubr.bf16.gmra.mrb[188].mxu1 %v1890_v15 }
 0x32d   :  { %3097 = vmatpush1.bf16.msra.mxu1 %v6875_v32 }
 0x32e   :  { %3098 = vmatprep.subr.bf16.mxu1 %v6880_v61 }
 0x331   :  { %3099 = vmatpush1.bf16.msra.mxu1 %v6878_v13  ;;  %v6887_v13 = vld [vmem:[#allocation2 + $0x480] ss:$8 sps:$4 sm:$0xff]  }
 0x332   :  { %3100 = vmatprep.subr.bf16.mxu1 %v6883_v56 }
 0x386   :  { %v2132_v35 = vpop.f32.mrb[128].mxu1 }
 0x387   :  { %v2133_v42 = vadd.f32 %v2132_v35, %v7732_v0  ;;  %v2134_v44 = vpop.f32.mrb[129].mxu1  ;;  %v6881_v35 = vld [vmem:[#allocation2 + $0x460] ss:$8 sps:$4 sm:$0xff]  }
 0x388   :  { %v2135_v45 = vadd.f32 %v2134_v44, %v7735_v7  ;;  %v2136_v48 = vpop.f32.mrb[130].mxu1  ;;  %3101 = vmatpush1.bf16.msra.mxu1 %v6881_v35 }
 0x389   :  { %v2137_v50 = vadd.f32 %v2136_v48, %v7732_v0  ;;  %v2138_v53 = vpop.f32.mrb[131].mxu1  ;;  %v2291_v63 = vmax.f32 %v2133_v42, 0.0  ;;  %3102 = vmatprep.subr.bf16.mxu1 %v6886_v40 }
 0x38a   :  { %v2139_v58 = vadd.f32 %v2138_v53, %v7735_v7  ;;  %v2292_v4 = vmax.f32 %v2135_v45, 0.0  ;;  %v6884_v53 = vld [vmem:[#allocation2 + $0x470] ss:$8 sps:$4 sm:$0xff]  }
 0x38b   :  { %v2293_v1 = vmax.f32 %v2137_v50, 0.0 }
 0x38c   :  { %v2294_v5 = vmax.f32 %v2139_v58, 0.0  ;;  %v6889_v58 = vld [vmem:[#allocation2 + $0x484] ss:$8 sps:$4 sm:$0xff]   ;;  %3103 = vmatpush1.bf16.msra.mxu1 %v6884_v53  ;;  %v6893_v53 = vld [vmem:[#allocation2 + $0x4a0] ss:$8 sps:$4 sm:$0xff]  }
 0x38d   :  { %v2355_v9 = vpack.c.bf16 %v2293_v1, %v2291_v63  ;;  %3104 = vmatprep.subr.bf16.mxu1 %v6889_v58 }
 0x38e   :  { %v2142_v15 = vpop.f32.mrb[132].mxu1  ;;  %v2356_v55 = vpack.c.bf16 %v2294_v5, %v2292_v4 }
 0x38f   :  { %v2143_v18 = vadd.f32 %v2142_v15, %v7732_v0  ;;  %v2144_v25 = vpop.f32.mrb[133].mxu1 }
 0x390   :  { %v2145_v27 = vadd.f32 %v2144_v25, %v7735_v7  ;;  %v2146_v20 = vpop.f32.mrb[134].mxu1  ;;  %2625 = vmatprep.mubr.bf16.mxu0 %v2356_v55  ;;  %v6892_v55 = vld [vmem:[#allocation2 + $0x494] ss:$8 sps:$4 sm:$0xff]   ;;  %3105 = vmatpush1.bf16.msra.mxu1 %v6887_v13 }
 0x391   :  { %v2147_v24 = vadd.f32 %v2146_v20, %v7732_v0  ;;  %v2148_v30 = vpop.f32.mrb[135].mxu1  ;;  %2626 = vmatmul.mubr.bf16.vlgmr.msra.gmra.mrb[160].mxu0 %v2355_v9  ;;  %v2295_v42 = vmax.f32 %v2143_v18, 0.0  ;;  %3106 = vmatprep.subr.bf16.mxu1 %v6892_v55 }
 0x392   :  { %v2149_v38 = vadd.f32 %v2148_v30, %v7735_v7  ;;  %v2296_v45 = vmax.f32 %v2145_v27, 0.0 }
 0x393   :  { %v2297_v44 = vmax.f32 %v2147_v24, 0.0  ;;  %v6890_v24 = vld [vmem:[#allocation2 + $0x490] ss:$8 sps:$4 sm:$0xff]  }
 0x394   :  { %v2298_v48 = vmax.f32 %v2149_v38, 0.0  ;;  %v6895_v38 = vld [vmem:[#allocation2 + $0x4a4] ss:$8 sps:$4 sm:$0xff]   ;;  %3107 = vmatpush1.bf16.msra.mxu1 %v6890_v24  ;;  %v6899_v24 = vld [vmem:[#allocation2 + $0x4c0] ss:$8 sps:$4 sm:$0xff]  }
 0x395   :  { %v2357_v50 = vpack.c.bf16 %v2297_v44, %v2295_v42  ;;  %3108 = vmatprep.subr.bf16.mxu1 %v6895_v38 }
 0x396   :  { %v2152_v32 = vpop.f32.mrb[136].mxu1  ;;  %v2358_v57 = vpack.c.bf16 %v2298_v48, %v2296_v45 }
 0x397   :  { %v2153_v61 = vadd.f32 %v2152_v32, %v7732_v0  ;;  %v2154_v63 = vpop.f32.mrb[137].mxu1 }
 0x398   :  { %v2155_v1 = vadd.f32 %v2154_v63, %v7735_v7  ;;  %v2156_v4 = vpop.f32.mrb[138].mxu1  ;;  %2635 = vmatprep.mubr.bf16.mxu0 %v2358_v57  ;;  %v6898_v57 = vld [vmem:[#allocation2 + $0x4b4] ss:$8 sps:$4 sm:$0xff]   ;;  %3109 = vmatpush1.bf16.msra.mxu1 %v6893_v53 }
 0x399   :  { %v2157_v5 = vadd.f32 %v2156_v4, %v7732_v0  ;;  %v2158_v9 = vpop.f32.mrb[139].mxu1  ;;  %2636 = vmatmul.mubr.bf16.gmra.mrb[164].mxu0 %v2357_v50  ;;  %v2299_v56 = vmax.f32 %v2153_v61, 0.0  ;;  %3110 = vmatprep.subr.bf16.mxu1 %v6898_v57 }
 0x39a   :  { %v2159_v15 = vadd.f32 %v2158_v9, %v7735_v7  ;;  %v2300_v25 = vmax.f32 %v2155_v1, 0.0 }
 0x39b   :  { %v2301_v18 = vmax.f32 %v2157_v5, 0.0  ;;  %v6896_v5 = vld [vmem:[#allocation2 + $0x4b0] ss:$8 sps:$4 sm:$0xff]  }
 0x39c   :  { %v2302_v27 = vmax.f32 %v2159_v15, 0.0  ;;  %v6901_v15 = vld [vmem:[#allocation2 + $0x4c4] ss:$8 sps:$4 sm:$0xff]   ;;  %3111 = vmatpush1.bf16.msra.mxu1 %v6896_v5  ;;  %v6905_v5 = vld [vmem:[#allocation2 + $0x4e0] ss:$8 sps:$4 sm:$0xff]  }
 0x39d   :  { %v2359_v20 = vpack.c.bf16 %v2301_v18, %v2299_v56  ;;  %3112 = vmatprep.subr.bf16.mxu1 %v6901_v15 }
 0x39e   :  { %v2162_v30 = vpop.f32.mrb[140].mxu1  ;;  %v2360_v35 = vpack.c.bf16 %v2302_v27, %v2300_v25 }
 0x39f   :  { %v2163_v40 = vadd.f32 %v2162_v30, %v7732_v0  ;;  %v2164_v42 = vpop.f32.mrb[141].mxu1 }
 0x3a0   :  { %v2165_v44 = vadd.f32 %v2164_v42, %v7735_v7  ;;  %v2166_v45 = vpop.f32.mrb[142].mxu1  ;;  %2645 = vmatprep.mubr.bf16.mxu0 %v2360_v35  ;;  %v6904_v35 = vld [vmem:[#allocation2 + $0x4d4] ss:$8 sps:$4 sm:$0xff]   ;;  %3113 = vmatpush1.bf16.msra.mxu1 %v6899_v24 }
 0x3a1   :  { %v2167_v48 = vadd.f32 %v2166_v45, %v7732_v0  ;;  %v2168_v50 = vpop.f32.mrb[143].mxu1  ;;  %2646 = vmatmul.mubr.bf16.gmra.mrb[168].mxu0 %v2359_v20  ;;  %v2303_v58 = vmax.f32 %v2163_v40, 0.0  ;;  %3114 = vmatprep.subr.bf16.mxu1 %v6904_v35 }
 0x3a2   :  { %v2169_v32 = vadd.f32 %v2168_v50, %v7735_v7  ;;  %v2304_v63 = vmax.f32 %v2165_v44, 0.0 }
 0x3a3   :  { %v2305_v61 = vmax.f32 %v2167_v48, 0.0  ;;  %v6902_v48 = vld [vmem:[#allocation2 + $0x4d0] ss:$8 sps:$4 sm:$0xff]  }
 0x3a4   :  { %v2306_v1 = vmax.f32 %v2169_v32, 0.0  ;;  %v6907_v32 = vld [vmem:[#allocation2 + $0x4e4] ss:$8 sps:$4 sm:$0xff]   ;;  %3115 = vmatpush1.bf16.msra.mxu1 %v6902_v48 }
 0x3a5   :  { %v2361_v4 = vpack.c.bf16 %v2305_v61, %v2303_v58  ;;  %3116 = vmatprep.subr.bf16.mxu1 %v6907_v32 }
 0x3a6   :  { %v2172_v9 = vpop.f32.mrb[144].mxu1  ;;  %v2362_v13 = vpack.c.bf16 %v2306_v1, %v2304_v63 }
 0x3a7   :  { %v2173_v55 = vadd.f32 %v2172_v9, %v7732_v0  ;;  %v2174_v56 = vpop.f32.mrb[145].mxu1 }
 0x3a8   :  { %v2175_v18 = vadd.f32 %v2174_v56, %v7735_v7  ;;  %v2176_v25 = vpop.f32.mrb[146].mxu1  ;;  %2655 = vmatprep.mubr.bf16.mxu0 %v2362_v13  ;;  %3117 = vmatpush1.bf16.msra.mxu1 %v6905_v5 }
 0x3a9   :  { %v2177_v27 = vadd.f32 %v2176_v25, %v7732_v0  ;;  %v2178_v20 = vpop.f32.mrb[147].mxu1  ;;  %2656 = vmatmul.mubr.bf16.gmra.mrb[172].mxu0 %v2361_v4  ;;  %v2307_v38 = vmax.f32 %v2173_v55, 0.0 }
 0x3aa   :  { %v2179_v30 = vadd.f32 %v2178_v20, %v7735_v7  ;;  %v2308_v42 = vmax.f32 %v2175_v18, 0.0 }
 0x3ab   :  { %v2309_v40 = vmax.f32 %v2177_v27, 0.0 }
 0x3ac   :  { %v2310_v44 = vmax.f32 %v2179_v30, 0.0 }
 0x3ad   :  { %v2363_v45 = vpack.c.bf16 %v2309_v40, %v2307_v38 }
 0x3ae   :  { %v2182_v50 = vpop.f32.mrb[148].mxu1  ;;  %v2364_v53 = vpack.c.bf16 %v2310_v44, %v2308_v42 }
 0x3af   :  { %v2183_v57 = vadd.f32 %v2182_v50, %v7732_v0  ;;  %v2184_v58 = vpop.f32.mrb[149].mxu1 }
 0x3b0   :  { %v2185_v61 = vadd.f32 %v2184_v58, %v7735_v7  ;;  %v2186_v63 = vpop.f32.mrb[150].mxu1  ;;  %2665 = vmatprep.mubr.bf16.mxu0 %v2364_v53 }
 0x3b1   :  { %v2187_v1 = vadd.f32 %v2186_v63, %v7732_v0  ;;  %v2188_v4 = vpop.f32.mrb[151].mxu1  ;;  %2666 = vmatmul.mubr.bf16.gmra.mrb[176].mxu0 %v2363_v45  ;;  %v2311_v13 = vmax.f32 %v2183_v57, 0.0 }
 0x3b2   :  { %v2189_v9 = vadd.f32 %v2188_v4, %v7735_v7  ;;  %v2312_v55 = vmax.f32 %v2185_v61, 0.0 }
 0x3b3   :  { %v2313_v15 = vmax.f32 %v2187_v1, 0.0 }
 0x3b4   :  { %v2314_v56 = vmax.f32 %v2189_v9, 0.0 }
 0x3b5   :  { %v2365_v18 = vpack.c.bf16 %v2313_v15, %v2311_v13 }
 0x3b6   :  { %v2192_v25 = vpop.f32.mrb[152].mxu1  ;;  %v2366_v27 = vpack.c.bf16 %v2314_v56, %v2312_v55 }
 0x3b7   :  { %v2193_v20 = vadd.f32 %v2192_v25, %v7732_v0  ;;  %v2194_v24 = vpop.f32.mrb[153].mxu1 }
 0x3b8   :  { %v2195_v30 = vadd.f32 %v2194_v24, %v7735_v7  ;;  %v2196_v35 = vpop.f32.mrb[154].mxu1  ;;  %2675 = vmatprep.mubr.bf16.mxu0 %v2366_v27 }
 0x3b9   :  { %v2197_v38 = vadd.f32 %v2196_v35, %v7732_v0  ;;  %v2198_v40 = vpop.f32.mrb[155].mxu1  ;;  %2676 = vmatmul.mubr.bf16.gmra.mrb[180].mxu0 %v2365_v18  ;;  %v2315_v44 = vmax.f32 %v2193_v20, 0.0 }
 0x3ba   :  { %v2199_v42 = vadd.f32 %v2198_v40, %v7735_v7  ;;  %v2316_v48 = vmax.f32 %v2195_v30, 0.0 }
 0x3bb   :  { %v2317_v45 = vmax.f32 %v2197_v38, 0.0 }
 0x3bc   :  { %v2318_v50 = vmax.f32 %v2199_v42, 0.0 }
 0x3bd   :  { %v2367_v53 = vpack.c.bf16 %v2317_v45, %v2315_v44 }
 0x3be   :  { %v2202_v32 = vpop.f32.mrb[156].mxu1  ;;  %v2368_v57 = vpack.c.bf16 %v2318_v50, %v2316_v48 }
 0x3bf   :  { %v2203_v58 = vadd.f32 %v2202_v32, %v7732_v0  ;;  %v2204_v61 = vpop.f32.mrb[157].mxu1 }
 0x3c0   :  { %v2205_v63 = vadd.f32 %v2204_v61, %v7735_v7  ;;  %v2206_v1 = vpop.f32.mrb[158].mxu1  ;;  %2685 = vmatprep.mubr.bf16.mxu0 %v2368_v57 }
 0x3c1   :  { %v2207_v4 = vadd.f32 %v2206_v1, %v7732_v0  ;;  %v2208_v5 = vpop.f32.mrb[159].mxu1  ;;  %2686 = vmatmul.mubr.bf16.gmra.mrb[184].mxu0 %v2367_v53  ;;  %v2319_v13 = vmax.f32 %v2203_v58, 0.0 }
 0x3c2   :  { %v2209_v9 = vadd.f32 %v2208_v5, %v7735_v7  ;;  %v2320_v55 = vmax.f32 %v2205_v63, 0.0 }
 0x3c3   :  { %v2321_v15 = vmax.f32 %v2207_v4, 0.0 }
 0x3c4   :  { %v2322_v56 = vmax.f32 %v2209_v9, 0.0 }
 0x3c5   :  { %v2369_v18 = vpack.c.bf16 %v2321_v15, %v2319_v13 }
 0x3c6   :  { %v2212_v25 = vpop.f32.mrb[160].mxu1  ;;  %v2370_v27 = vpack.c.bf16 %v2322_v56, %v2320_v55 }
 0x3c7   :  { %v2213_v20 = vadd.f32 %v2212_v25, %v7732_v0  ;;  %v2214_v24 = vpop.f32.mrb[161].mxu1 }
 0x3c8   :  { %v2215_v30 = vadd.f32 %v2214_v24, %v7735_v7  ;;  %v2216_v35 = vpop.f32.mrb[162].mxu1  ;;  %2695 = vmatprep.mubr.bf16.mxu0 %v2370_v27 }
 0x3c9   :  { %v2217_v38 = vadd.f32 %v2216_v35, %v7732_v0  ;;  %v2218_v40 = vpop.f32.mrb[163].mxu1  ;;  %2696 = vmatmul.mubr.bf16.gmra.mrb[188].mxu0 %v2369_v18  ;;  %v2323_v44 = vmax.f32 %v2213_v20, 0.0 }
 0x3ca   :  { %v2219_v42 = vadd.f32 %v2218_v40, %v7735_v7  ;;  %v2324_v48 = vmax.f32 %v2215_v30, 0.0 }
 0x3cb   :  { %v2325_v45 = vmax.f32 %v2217_v38, 0.0 }
 0x3cc   :  { %v2326_v50 = vmax.f32 %v2219_v42, 0.0 }
 0x3cd   :  { %v2371_v53 = vpack.c.bf16 %v2325_v45, %v2323_v44 }
 0x3ce   :  { %v2372_v32 = vpack.c.bf16 %v2326_v50, %v2324_v48  ;;  %v2222_v57 = vpop.f32.mrb[164].mxu1 }
 0x3cf   :  { %v2223_v58 = vadd.f32 %v2222_v57, %v7732_v0  ;;  %v2224_v61 = vpop.f32.mrb[165].mxu1 }
 0x3d0   :  { %v2225_v63 = vadd.f32 %v2224_v61, %v7735_v7  ;;  %v2226_v1 = vpop.f32.mrb[166].mxu1  ;;  %2705 = vmatprep.mubr.bf16.mxu0 %v2372_v32 }
 0x3d1   :  { %v2227_v4 = vadd.f32 %v2226_v1, %v7732_v0  ;;  %v2228_v5 = vpop.f32.mrb[167].mxu1  ;;  %2706 = vmatmul.mubr.bf16.gmra.mrb[192].mxu0 %v2371_v53  ;;  %v2327_v13 = vmax.f32 %v2223_v58, 0.0 }
 0x3d2   :  { %v2229_v9 = vadd.f32 %v2228_v5, %v7735_v7  ;;  %v2328_v55 = vmax.f32 %v2225_v63, 0.0 }
 0x3d3   :  { %v2329_v15 = vmax.f32 %v2227_v4, 0.0 }
 0x3d4   :  { %v2330_v56 = vmax.f32 %v2229_v9, 0.0 }
 0x3d5   :  { %v2373_v18 = vpack.c.bf16 %v2329_v15, %v2327_v13 }
 0x3d6   :  { %v2374_v25 = vpack.c.bf16 %v2330_v56, %v2328_v55  ;;  %v2232_v27 = vpop.f32.mrb[168].mxu1 }
 0x3d7   :  { %v2233_v20 = vadd.f32 %v2232_v27, %v7732_v0  ;;  %v2234_v24 = vpop.f32.mrb[169].mxu1 }
 0x3d8   :  { %v2235_v30 = vadd.f32 %v2234_v24, %v7735_v7  ;;  %v2236_v35 = vpop.f32.mrb[170].mxu1  ;;  %2715 = vmatprep.mubr.bf16.mxu0 %v2374_v25 }
 0x3d9   :  { %v2237_v38 = vadd.f32 %v2236_v35, %v7732_v0  ;;  %v2238_v40 = vpop.f32.mrb[171].mxu1  ;;  %2716 = vmatmul.mubr.bf16.gmra.mrb[196].mxu0 %v2373_v18  ;;  %v2331_v44 = vmax.f32 %v2233_v20, 0.0 }
 0x3da   :  { %v2239_v42 = vadd.f32 %v2238_v40, %v7735_v7  ;;  %v2332_v48 = vmax.f32 %v2235_v30, 0.0 }
 0x3db   :  { %v2333_v45 = vmax.f32 %v2237_v38, 0.0 }
 0x3dc   :  { %v2334_v50 = vmax.f32 %v2239_v42, 0.0  ;;  %v6910_v42 = vld [vmem:[#allocation2 + $0x4f4] ss:$8 sps:$4 sm:$0xff]  }
 0x3dd   :  { %v2375_v53 = vpack.c.bf16 %v2333_v45, %v2331_v44  ;;  %v6908_v45 = vld [vmem:[#allocation2 + $0x4f0] ss:$8 sps:$4 sm:$0xff]   ;;  %3118 = vmatprep.subr.bf16.mxu1 %v6910_v42 }
 0x3de   :  { %v2376_v32 = vpack.c.bf16 %v2334_v50, %v2332_v48  ;;  %v2242_v57 = vpop.f32.mrb[172].mxu1  ;;  %3119 = vmatpush1.bf16.msra.mxu1 %v6908_v45 }
 0x3df   :  { %v2243_v58 = vadd.f32 %v2242_v57, %v7732_v0  ;;  %v2244_v61 = vpop.f32.mrb[173].mxu1 }
 0x3e0   :  { %v2245_v63 = vadd.f32 %v2244_v61, %v7735_v7  ;;  %v2246_v1 = vpop.f32.mrb[174].mxu1  ;;  %2725 = vmatprep.mubr.bf16.mxu0 %v2376_v32 }
 0x3e1   :  { %v2247_v4 = vadd.f32 %v2246_v1, %v7732_v0  ;;  %v2248_v5 = vpop.f32.mrb[175].mxu1  ;;  %2726 = vmatmul.mubr.bf16.gmra.mrb[200].mxu0 %v2375_v53  ;;  %v2335_v13 = vmax.f32 %v2243_v58, 0.0 }
 0x3e2   :  { %v2249_v9 = vadd.f32 %v2248_v5, %v7735_v7  ;;  %v2336_v55 = vmax.f32 %v2245_v63, 0.0 }
 0x3e3   :  { %v2337_v15 = vmax.f32 %v2247_v4, 0.0 }
 0x3e4   :  { %v2338_v56 = vmax.f32 %v2249_v9, 0.0 }
 0x3e5   :  { %v2377_v18 = vpack.c.bf16 %v2337_v15, %v2335_v13 }
 0x3e6   :  { %v2378_v25 = vpack.c.bf16 %v2338_v56, %v2336_v55  ;;  %v2252_v27 = vpop.f32.mrb[176].mxu1 }
 0x3e7   :  { %v2253_v20 = vadd.f32 %v2252_v27, %v7732_v0  ;;  %v2254_v24 = vpop.f32.mrb[177].mxu1 }
 0x3e8   :  { %v2255_v30 = vadd.f32 %v2254_v24, %v7735_v7  ;;  %v2256_v35 = vpop.f32.mrb[178].mxu1  ;;  %2735 = vmatprep.mubr.bf16.mxu0 %v2378_v25 }
 0x3e9   :  { %v2257_v38 = vadd.f32 %v2256_v35, %v7732_v0  ;;  %v2258_v40 = vpop.f32.mrb[179].mxu1  ;;  %2736 = vmatmul.mubr.bf16.gmra.mrb[204].mxu0 %v2377_v18  ;;  %v2339_v48 = vmax.f32 %v2253_v20, 0.0 }
 0x3ea   :  { %v2259_v44 = vadd.f32 %v2258_v40, %v7735_v7  ;;  %v2340_v53 = vmax.f32 %v2255_v30, 0.0 }
 0x3eb   :  { %v2341_v50 = vmax.f32 %v2257_v38, 0.0 }
 0x3ec   :  { %v2342_v32 = vmax.f32 %v2259_v44, 0.0 }
 0x3ed   :  { %v2379_v57 = vpack.c.bf16 %v2341_v50, %v2339_v48 }
 0x3ee   :  { %v2380_v58 = vpack.c.bf16 %v2342_v32, %v2340_v53  ;;  %v2262_v61 = vpop.f32.mrb[180].mxu1 }
 0x3ef   :  { %v2263_v63 = vadd.f32 %v2262_v61, %v7732_v0  ;;  %v2264_v1 = vpop.f32.mrb[181].mxu1 }
 0x3f0   :  { %v2265_v4 = vadd.f32 %v2264_v1, %v7735_v7  ;;  %v2266_v5 = vpop.f32.mrb[182].mxu1  ;;  %2745 = vmatprep.mubr.bf16.mxu0 %v2380_v58 }
 0x3f1   :  { %v2267_v9 = vadd.f32 %v2266_v5, %v7732_v0  ;;  %v2268_v13 = vpop.f32.mrb[183].mxu1  ;;  %2746 = vmatmul.mubr.bf16.gmra.mrb[208].mxu0 %v2379_v57  ;;  %v2343_v55 = vmax.f32 %v2263_v63, 0.0 }
 0x3f2   :  { %v2269_v15 = vadd.f32 %v2268_v13, %v7735_v7  ;;  %v2344_v18 = vmax.f32 %v2265_v4, 0.0 }
 0x3f3   :  { %v2345_v56 = vmax.f32 %v2267_v9, 0.0 }
 0x3f4   :  { %v2346_v25 = vmax.f32 %v2269_v15, 0.0 }
 0x3f5   :  { %v2381_v27 = vpack.c.bf16 %v2345_v56, %v2343_v55 }
 0x3f6   :  { %v2382_v20 = vpack.c.bf16 %v2346_v25, %v2344_v18  ;;  %v2272_v24 = vpop.f32.mrb[184].mxu1 }
 0x3f7   :  { %v2273_v30 = vadd.f32 %v2272_v24, %v7732_v0  ;;  %v2274_v35 = vpop.f32.mrb[185].mxu1  ;;  %v6911_v24 = vld [vmem:[#allocation2 + $0x500] ss:$8 sps:$4 sm:$0xff]  }
 0x3f8   :  { %v2275_v38 = vadd.f32 %v2274_v35, %v7735_v7  ;;  %v2276_v40 = vpop.f32.mrb[186].mxu1  ;;  %2755 = vmatprep.mubr.bf16.mxu0 %v2382_v20  ;;  %v6914_v35 = vld [vmem:[#allocation2 + $0x510] ss:$8 sps:$4 sm:$0xff]  }
 0x3f9   :  { %v2277_v42 = vadd.f32 %v2276_v40, %v7732_v0  ;;  %v2278_v44 = vpop.f32.mrb[187].mxu1  ;;  %2756 = vmatmul.mubr.bf16.gmra.mrb[212].mxu0 %v2381_v27  ;;  %v2347_v48 = vmax.f32 %v2273_v30, 0.0  ;;  %v6913_v30 = vld [vmem:[#allocation2 + $0x504] ss:$8 sps:$4 sm:$0xff]  }
 0x3fa   :  { %v2279_v45 = vadd.f32 %v2278_v44, %v7735_v7  ;;  %v2348_v53 = vmax.f32 %v2275_v38, 0.0  ;;  %3647 = vmatprep.subr.bf16.mxu0 %v6913_v30  ;;  %v6916_v38 = vld [vmem:[#allocation2 + $0x514] ss:$8 sps:$4 sm:$0xff]   ;;  %v6919_v40 = vld [vmem:[#allocation2 + $0x524] ss:$8 sps:$4 sm:$0xff]  }
 0x3fb   :  { %v2349_v50 = vmax.f32 %v2277_v42, 0.0  ;;  %3648 = vmatpush1.bf16.msra.mxu0 %v6911_v24  ;;  %v6931_v24 = vld [vmem:[#allocation2 + $0x564] ss:$8 sps:$4 sm:$0xff]  }
 0x3fc   :  { %v2350_v32 = vmax.f32 %v2279_v45, 0.0  ;;  %3649 = vmatprep.subr.bf16.mxu0 %v6916_v38 }
 0x3fd   :  { %v2383_v57 = vpack.c.bf16 %v2349_v50, %v2347_v48  ;;  %v6920_v48 = vld [vmem:[#allocation2 + $0x530] ss:$8 sps:$4 sm:$0xff]   ;;  %v6922_v50 = vld [vmem:[#allocation2 + $0x534] ss:$8 sps:$4 sm:$0xff]  }
 0x3fe   :  { %v2384_v58 = vpack.c.bf16 %v2350_v32, %v2348_v53  ;;  %v2282_v61 = vpop.f32.mrb[188].mxu1 }
 0x3ff   :  { %v2283_v63 = vadd.f32 %v2282_v61, %v7732_v0  ;;  %v2284_v1 = vpop.f32.mrb[189].mxu1  ;;  %3650 = vmatpush1.bf16.msra.mxu0 %v6914_v35 }
 0x400   :  { %v2285_v4 = vadd.f32 %v2284_v1, %v7735_v7  ;;  %v2286_v5 = vpop.f32.mrb[190].mxu1  ;;  %2765 = vmatprep.mubr.bf16.mxu0 %v2384_v58  ;;  %3651 = vmatprep.subr.bf16.mxu0 %v6919_v40  ;;  %v6923_v1 = vld [vmem:[#allocation2 + $0x540] ss:$8 sps:$4 sm:$0xff]  }
 0x401   :  { %v2287_v9 = vadd.f32 %v2286_v5, %v7732_v0  ;;  %v2288_v13 = vpop.f32.mrb[191].mxu1  ;;  %2766 = vmatmul.mubr.bf16.gmra.mrb[216].mxu0 %v2383_v57  ;;  %v2351_v55 = vmax.f32 %v2283_v63, 0.0  ;;  %v5980_v0 = vld [vmem:[%s8844_s4 + $0x6] sm:$0x3] }
 0x402   :  { %v2289_v15 = vadd.f32 %v2288_v13, %v7735_v7  ;;  %v2352_v18 = vmax.f32 %v2285_v4, 0.0  ;;  %v6917_v7 = vld [vmem:[#allocation2 + $0x520] ss:$8 sps:$4 sm:$0xff]   ;;  %v7805_v42 = vrot.slane %v5980_v0, %v7441_v14  ;;  %v7808_v44 = vrot.slane %v5980_v0, %v7446_v29  ;;  %v6925_v4 = vld [vmem:[#allocation2 + $0x544] ss:$8 sps:$4 sm:$0xff]  }
 0x403   :  { %v2353_v56 = vmax.f32 %v2287_v9, 0.0  ;;  %3652 = vmatpush1.bf16.msra.mxu0 %v6917_v7  ;;  %v6928_v9 = vld [vmem:[#allocation2 + $0x554] ss:$8 sps:$4 sm:$0xff]  }
 0x404   :  { %v2354_v25 = vmax.f32 %v2289_v15, 0.0  ;;  %3653 = vmatprep.subr.bf16.mxu0 %v6922_v50  ;;  %v6934_v50 = vld [vmem:[#allocation2 + $0x574] ss:$8 sps:$4 sm:$0xff]  }
 0x405   :  { %v2385_v27 = vpack.c.bf16 %v2353_v56, %v2351_v55 }
 0x406   :  { %v2386_v20 = vpack.c.bf16 %v2354_v25, %v2352_v18  ;;  %v6926_v25 = vld [vmem:[#allocation2 + $0x550] ss:$8 sps:$4 sm:$0xff]  }
 0x407   :  { %3654 = vmatpush1.bf16.msra.mxu0 %v6920_v48 }
 0x408   :  { %2775 = vmatprep.mubr.bf16.mxu0 %v2386_v20  ;;  %3655 = vmatprep.subr.bf16.mxu0 %v6925_v4 }
 0x409   :  { %2776 = vmatmul.mubr.bf16.gmra.mrb[220].mxu0 %v2385_v27 }
 0x40b   :  { %3656 = vmatpush1.bf16.msra.mxu0 %v6923_v1 }
 0x40c   :  { %3657 = vmatprep.subr.bf16.mxu0 %v6928_v9 }
 0x40f   :  { %3658 = vmatpush1.bf16.msra.mxu0 %v6926_v25  ;;  %v6935_v25 = vld [vmem:[#allocation2 + $0x580] ss:$8 sps:$4 sm:$0xff]  }
 0x410   :  { %3659 = vmatprep.subr.bf16.mxu0 %v6931_v24 }
 0x464   :  { %v2627_v45 = vpop.f32.mrb[160].mxu0 }
 0x465   :  { %v2628_v53 = vadd.f32 %v2627_v45, %v7805_v42  ;;  %v2629_v32 = vpop.f32.mrb[161].mxu0  ;;  %v6929_v45 = vld [vmem:[#allocation2 + $0x560] ss:$8 sps:$4 sm:$0xff]  }
 0x466   :  { %v2630_v57 = vadd.f32 %v2629_v32, %v7808_v44  ;;  %v2631_v58 = vpop.f32.mrb[162].mxu0  ;;  %3660 = vmatpush1.bf16.msra.mxu0 %v6929_v45 }
 0x467   :  { %v2632_v61 = vadd.f32 %v2631_v58, %v7805_v42  ;;  %v2633_v63 = vpop.f32.mrb[163].mxu0  ;;  %v2786_v13 = vmax.f32 %v2628_v53, 0.0  ;;  %3661 = vmatprep.subr.bf16.mxu0 %v6934_v50 }
 0x468   :  { %v2634_v5 = vadd.f32 %v2633_v63, %v7808_v44  ;;  %v2787_v55 = vmax.f32 %v2630_v57, 0.0  ;;  %v6932_v63 = vld [vmem:[#allocation2 + $0x570] ss:$8 sps:$4 sm:$0xff]  }
 0x469   :  { %v2788_v15 = vmax.f32 %v2632_v61, 0.0 }
 0x46a   :  { %v2789_v56 = vmax.f32 %v2634_v5, 0.0  ;;  %v6937_v5 = vld [vmem:[#allocation2 + $0x584] ss:$8 sps:$4 sm:$0xff]   ;;  %3662 = vmatpush1.bf16.msra.mxu0 %v6932_v63  ;;  %v6941_v63 = vld [vmem:[#allocation2 + $0x5a0] ss:$8 sps:$4 sm:$0xff]  }
 0x46b   :  { %v2850_v18 = vpack.c.bf16 %v2788_v15, %v2786_v13  ;;  %3663 = vmatprep.subr.bf16.mxu0 %v6937_v5 }
 0x46c   :  { %v2851_v27 = vpack.c.bf16 %v2789_v56, %v2787_v55  ;;  %v2637_v20 = vpop.f32.mrb[164].mxu0 }
 0x46d   :  { %v2638_v30 = vadd.f32 %v2637_v20, %v7805_v42  ;;  %v2639_v35 = vpop.f32.mrb[165].mxu0  ;;  %v6940_v20 = vld [vmem:[#allocation2 + $0x594] ss:$8 sps:$4 sm:$0xff]  }
 0x46e   :  { %v2640_v38 = vadd.f32 %v2639_v35, %v7808_v44  ;;  %v2641_v0 = vpop.f32.mrb[166].mxu0  ;;  %3120 = vmatprep.mubr.bf16.mxu1 %v2851_v27  ;;  %3664 = vmatpush1.bf16.msra.mxu0 %v6935_v25 }
 0x46f   :  { %v2642_v7 = vadd.f32 %v2641_v0, %v7805_v42  ;;  %v2643_v40 = vpop.f32.mrb[167].mxu0  ;;  %3121 = vmatmul.mubr.bf16.vlgmr.msra.gmra.mrb[0].mxu1 %v2850_v18  ;;  %v2790_v53 = vmax.f32 %v2638_v30, 0.0  ;;  %3665 = vmatprep.subr.bf16.mxu0 %v6940_v20 }
 0x470   :  { %v2644_v48 = vadd.f32 %v2643_v40, %v7808_v44  ;;  %v2791_v57 = vmax.f32 %v2640_v38, 0.0 }
 0x471   :  { %v2792_v32 = vmax.f32 %v2642_v7, 0.0  ;;  %v6938_v7 = vld [vmem:[#allocation2 + $0x590] ss:$8 sps:$4 sm:$0xff]  }
 0x472   :  { %v2793_v58 = vmax.f32 %v2644_v48, 0.0  ;;  %v6943_v48 = vld [vmem:[#allocation2 + $0x5a4] ss:$8 sps:$4 sm:$0xff]   ;;  %3666 = vmatpush1.bf16.msra.mxu0 %v6938_v7  ;;  %v6947_v7 = vld [vmem:[#allocation2 + $0x5c0] ss:$8 sps:$4 sm:$0xff]  }
 0x473   :  { %v2852_v61 = vpack.c.bf16 %v2792_v32, %v2790_v53  ;;  %3667 = vmatprep.subr.bf16.mxu0 %v6943_v48 }
 0x474   :  { %v2853_v1 = vpack.c.bf16 %v2793_v58, %v2791_v57  ;;  %v2647_v4 = vpop.f32.mrb[168].mxu0 }
 0x475   :  { %v2648_v9 = vadd.f32 %v2647_v4, %v7805_v42  ;;  %v2649_v13 = vpop.f32.mrb[169].mxu0  ;;  %v6946_v4 = vld [vmem:[#allocation2 + $0x5b4] ss:$8 sps:$4 sm:$0xff]  }
 0x476   :  { %v2650_v15 = vadd.f32 %v2649_v13, %v7808_v44  ;;  %v2651_v55 = vpop.f32.mrb[170].mxu0  ;;  %3130 = vmatprep.mubr.bf16.mxu1 %v2853_v1  ;;  %3668 = vmatpush1.bf16.msra.mxu0 %v6941_v63 }
 0x477   :  { %v2652_v56 = vadd.f32 %v2651_v55, %v7805_v42  ;;  %v2653_v18 = vpop.f32.mrb[171].mxu0  ;;  %3131 = vmatmul.mubr.bf16.gmra.mrb[4].mxu1 %v2852_v61  ;;  %v2794_v24 = vmax.f32 %v2648_v9, 0.0  ;;  %3669 = vmatprep.subr.bf16.mxu0 %v6946_v4 }
 0x478   :  { %v2654_v27 = vadd.f32 %v2653_v18, %v7808_v44  ;;  %v2795_v35 = vmax.f32 %v2650_v15, 0.0 }
 0x479   :  { %v2796_v30 = vmax.f32 %v2652_v56, 0.0  ;;  %v6944_v56 = vld [vmem:[#allocation2 + $0x5b0] ss:$8 sps:$4 sm:$0xff]  }
 0x47a   :  { %v2797_v38 = vmax.f32 %v2654_v27, 0.0  ;;  %v6949_v27 = vld [vmem:[#allocation2 + $0x5c4] ss:$8 sps:$4 sm:$0xff]   ;;  %3670 = vmatpush1.bf16.msra.mxu0 %v6944_v56  ;;  %v6953_v56 = vld [vmem:[#allocation2 + $0x5e0] ss:$8 sps:$4 sm:$0xff]  }
 0x47b   :  { %v2854_v0 = vpack.c.bf16 %v2796_v30, %v2794_v24  ;;  %3671 = vmatprep.subr.bf16.mxu0 %v6949_v27 }
 0x47c   :  { %v2855_v40 = vpack.c.bf16 %v2797_v38, %v2795_v35  ;;  %v2657_v45 = vpop.f32.mrb[172].mxu0 }
 0x47d   :  { %v2658_v50 = vadd.f32 %v2657_v45, %v7805_v42  ;;  %v2659_v53 = vpop.f32.mrb[173].mxu0  ;;  %v6952_v45 = vld [vmem:[#allocation2 + $0x5d4] ss:$8 sps:$4 sm:$0xff]  }
 0x47e   :  { %v2660_v32 = vadd.f32 %v2659_v53, %v7808_v44  ;;  %v2661_v57 = vpop.f32.mrb[174].mxu0  ;;  %3140 = vmatprep.mubr.bf16.mxu1 %v2855_v40  ;;  %3672 = vmatpush1.bf16.msra.mxu0 %v6947_v7 }
 0x47f   :  { %v2662_v58 = vadd.f32 %v2661_v57, %v7805_v42  ;;  %v2663_v61 = vpop.f32.mrb[175].mxu0  ;;  %3141 = vmatmul.mubr.bf16.gmra.mrb[8].mxu1 %v2854_v0  ;;  %v2798_v5 = vmax.f32 %v2658_v50, 0.0  ;;  %3673 = vmatprep.subr.bf16.mxu0 %v6952_v45 }
 0x480   :  { %v2664_v1 = vadd.f32 %v2663_v61, %v7808_v44  ;;  %v2799_v13 = vmax.f32 %v2660_v32, 0.0 }
 0x481   :  { %v2800_v9 = vmax.f32 %v2662_v58, 0.0  ;;  %v6950_v58 = vld [vmem:[#allocation2 + $0x5d0] ss:$8 sps:$4 sm:$0xff]  }
 0x482   :  { %v2801_v15 = vmax.f32 %v2664_v1, 0.0  ;;  %v6955_v1 = vld [vmem:[#allocation2 + $0x5e4] ss:$8 sps:$4 sm:$0xff]   ;;  %3674 = vmatpush1.bf16.msra.mxu0 %v6950_v58 }
 0x483   :  { %v2856_v55 = vpack.c.bf16 %v2800_v9, %v2798_v5  ;;  %3675 = vmatprep.subr.bf16.mxu0 %v6955_v1 }
 0x484   :  { %v2857_v18 = vpack.c.bf16 %v2801_v15, %v2799_v13  ;;  %v2667_v25 = vpop.f32.mrb[176].mxu0 }
 0x485   :  { %v2668_v20 = vadd.f32 %v2667_v25, %v7805_v42  ;;  %v2669_v24 = vpop.f32.mrb[177].mxu0 }
 0x486   :  { %v2670_v30 = vadd.f32 %v2669_v24, %v7808_v44  ;;  %v2671_v35 = vpop.f32.mrb[178].mxu0  ;;  %3150 = vmatprep.mubr.bf16.mxu1 %v2857_v18  ;;  %3676 = vmatpush1.bf16.msra.mxu0 %v6953_v56 }
 0x487   :  { %v2672_v38 = vadd.f32 %v2671_v35, %v7805_v42  ;;  %v2673_v0 = vpop.f32.mrb[179].mxu0  ;;  %3151 = vmatmul.mubr.bf16.gmra.mrb[12].mxu1 %v2856_v55  ;;  %v2802_v48 = vmax.f32 %v2668_v20, 0.0 }
 0x488   :  { %v2674_v40 = vadd.f32 %v2673_v0, %v7808_v44  ;;  %v2803_v53 = vmax.f32 %v2670_v30, 0.0 }
 0x489   :  { %v2804_v50 = vmax.f32 %v2672_v38, 0.0 }
 0x48a   :  { %v2805_v32 = vmax.f32 %v2674_v40, 0.0 }
 0x48b   :  { %v2858_v57 = vpack.c.bf16 %v2804_v50, %v2802_v48 }
 0x48c   :  { %v2859_v61 = vpack.c.bf16 %v2805_v32, %v2803_v53  ;;  %v2677_v63 = vpop.f32.mrb[180].mxu0 }
 0x48d   :  { %v2678_v4 = vadd.f32 %v2677_v63, %v7805_v42  ;;  %v2679_v5 = vpop.f32.mrb[181].mxu0 }
 0x48e   :  { %v2680_v9 = vadd.f32 %v2679_v5, %v7808_v44  ;;  %v2681_v13 = vpop.f32.mrb[182].mxu0  ;;  %3160 = vmatprep.mubr.bf16.mxu1 %v2859_v61 }
 0x48f   :  { %v2682_v15 = vadd.f32 %v2681_v13, %v7805_v42  ;;  %v2683_v55 = vpop.f32.mrb[183].mxu0  ;;  %3161 = vmatmul.mubr.bf16.gmra.mrb[16].mxu1 %v2858_v57  ;;  %v2806_v25 = vmax.f32 %v2678_v4, 0.0 }
 0x490   :  { %v2684_v18 = vadd.f32 %v2683_v55, %v7808_v44  ;;  %v2807_v20 = vmax.f32 %v2680_v9, 0.0 }
 0x491   :  { %v2808_v27 = vmax.f32 %v2682_v15, 0.0 }
 0x492   :  { %v2809_v24 = vmax.f32 %v2684_v18, 0.0 }
 0x493   :  { %v2860_v30 = vpack.c.bf16 %v2808_v27, %v2806_v25 }
 0x494   :  { %v2861_v35 = vpack.c.bf16 %v2809_v24, %v2807_v20  ;;  %v2687_v38 = vpop.f32.mrb[184].mxu0 }
 0x495   :  { %v2688_v0 = vadd.f32 %v2687_v38, %v7805_v42  ;;  %v2689_v7 = vpop.f32.mrb[185].mxu0 }
 0x496   :  { %v2690_v40 = vadd.f32 %v2689_v7, %v7808_v44  ;;  %v2691_v45 = vpop.f32.mrb[186].mxu0  ;;  %3170 = vmatprep.mubr.bf16.mxu1 %v2861_v35 }
 0x497   :  { %v2692_v48 = vadd.f32 %v2691_v45, %v7805_v42  ;;  %v2693_v50 = vpop.f32.mrb[187].mxu0  ;;  %3171 = vmatmul.mubr.bf16.gmra.mrb[20].mxu1 %v2860_v30  ;;  %v2810_v32 = vmax.f32 %v2688_v0, 0.0 }
 0x498   :  { %v2694_v53 = vadd.f32 %v2693_v50, %v7808_v44  ;;  %v2811_v58 = vmax.f32 %v2690_v40, 0.0 }
 0x499   :  { %v2812_v57 = vmax.f32 %v2692_v48, 0.0 }
 0x49a   :  { %v2813_v61 = vmax.f32 %v2694_v53, 0.0 }
 0x49b   :  { %v2862_v63 = vpack.c.bf16 %v2812_v57, %v2810_v32 }
 0x49c   :  { %v2863_v1 = vpack.c.bf16 %v2813_v61, %v2811_v58  ;;  %v2697_v4 = vpop.f32.mrb[188].mxu0 }
 0x49d   :  { %v2698_v5 = vadd.f32 %v2697_v4, %v7805_v42  ;;  %v2699_v9 = vpop.f32.mrb[189].mxu0 }
 0x49e   :  { %v2700_v13 = vadd.f32 %v2699_v9, %v7808_v44  ;;  %v2701_v15 = vpop.f32.mrb[190].mxu0  ;;  %3180 = vmatprep.mubr.bf16.mxu1 %v2863_v1 }
 0x49f   :  { %v2702_v55 = vadd.f32 %v2701_v15, %v7805_v42  ;;  %v2703_v56 = vpop.f32.mrb[191].mxu0  ;;  %3181 = vmatmul.mubr.bf16.gmra.mrb[24].mxu1 %v2862_v63  ;;  %v2814_v25 = vmax.f32 %v2698_v5, 0.0 }
 0x4a0   :  { %v2704_v18 = vadd.f32 %v2703_v56, %v7808_v44  ;;  %v2815_v20 = vmax.f32 %v2700_v13, 0.0 }
 0x4a1   :  { %v2816_v27 = vmax.f32 %v2702_v55, 0.0 }
 0x4a2   :  { %v2817_v24 = vmax.f32 %v2704_v18, 0.0 }
 0x4a3   :  { %v2864_v30 = vpack.c.bf16 %v2816_v27, %v2814_v25 }
 0x4a4   :  { %v2865_v35 = vpack.c.bf16 %v2817_v24, %v2815_v20  ;;  %v2707_v38 = vpop.f32.mrb[192].mxu0 }
 0x4a5   :  { %v2708_v0 = vadd.f32 %v2707_v38, %v7805_v42  ;;  %v2709_v7 = vpop.f32.mrb[193].mxu0 }
 0x4a6   :  { %v2710_v40 = vadd.f32 %v2709_v7, %v7808_v44  ;;  %v2711_v45 = vpop.f32.mrb[194].mxu0  ;;  %3190 = vmatprep.mubr.bf16.mxu1 %v2865_v35 }
 0x4a7   :  { %v2712_v48 = vadd.f32 %v2711_v45, %v7805_v42  ;;  %v2713_v50 = vpop.f32.mrb[195].mxu0  ;;  %3191 = vmatmul.mubr.bf16.gmra.mrb[28].mxu1 %v2864_v30  ;;  %v2818_v32 = vmax.f32 %v2708_v0, 0.0 }
 0x4a8   :  { %v2714_v53 = vadd.f32 %v2713_v50, %v7808_v44  ;;  %v2819_v58 = vmax.f32 %v2710_v40, 0.0 }
 0x4a9   :  { %v2820_v57 = vmax.f32 %v2712_v48, 0.0 }
 0x4aa   :  { %v2821_v61 = vmax.f32 %v2714_v53, 0.0 }
 0x4ab   :  { %v2866_v63 = vpack.c.bf16 %v2820_v57, %v2818_v32 }
 0x4ac   :  { %v2867_v1 = vpack.c.bf16 %v2821_v61, %v2819_v58  ;;  %v2717_v4 = vpop.f32.mrb[196].mxu0 }
 0x4ad   :  { %v2718_v5 = vadd.f32 %v2717_v4, %v7805_v42  ;;  %v2719_v9 = vpop.f32.mrb[197].mxu0 }
 0x4ae   :  { %v2720_v13 = vadd.f32 %v2719_v9, %v7808_v44  ;;  %v2721_v15 = vpop.f32.mrb[198].mxu0  ;;  %3200 = vmatprep.mubr.bf16.mxu1 %v2867_v1 }
 0x4af   :  { %v2722_v55 = vadd.f32 %v2721_v15, %v7805_v42  ;;  %v2723_v56 = vpop.f32.mrb[199].mxu0  ;;  %3201 = vmatmul.mubr.bf16.gmra.mrb[32].mxu1 %v2866_v63  ;;  %v2822_v25 = vmax.f32 %v2718_v5, 0.0 }
 0x4b0   :  { %v2724_v18 = vadd.f32 %v2723_v56, %v7808_v44  ;;  %v2823_v20 = vmax.f32 %v2720_v13, 0.0 }
 0x4b1   :  { %v2824_v27 = vmax.f32 %v2722_v55, 0.0 }
 0x4b2   :  { %v2825_v24 = vmax.f32 %v2724_v18, 0.0 }
 0x4b3   :  { %v2868_v30 = vpack.c.bf16 %v2824_v27, %v2822_v25 }
 0x4b4   :  { %v2869_v35 = vpack.c.bf16 %v2825_v24, %v2823_v20  ;;  %v2727_v38 = vpop.f32.mrb[200].mxu0 }
 0x4b5   :  { %v2728_v0 = vadd.f32 %v2727_v38, %v7805_v42  ;;  %v2729_v7 = vpop.f32.mrb[201].mxu0 }
 0x4b6   :  { %v2730_v40 = vadd.f32 %v2729_v7, %v7808_v44  ;;  %v2731_v45 = vpop.f32.mrb[202].mxu0  ;;  %3210 = vmatprep.mubr.bf16.mxu1 %v2869_v35 }
 0x4b7   :  { %v2732_v48 = vadd.f32 %v2731_v45, %v7805_v42  ;;  %v2733_v50 = vpop.f32.mrb[203].mxu0  ;;  %3211 = vmatmul.mubr.bf16.gmra.mrb[36].mxu1 %v2868_v30  ;;  %v2826_v32 = vmax.f32 %v2728_v0, 0.0 }
 0x4b8   :  { %v2734_v53 = vadd.f32 %v2733_v50, %v7808_v44  ;;  %v2827_v58 = vmax.f32 %v2730_v40, 0.0 }
 0x4b9   :  { %v2828_v57 = vmax.f32 %v2732_v48, 0.0 }
 0x4ba   :  { %v2829_v61 = vmax.f32 %v2734_v53, 0.0  ;;  %v6958_v53 = vld [vmem:[#allocation2 + $0x5f4] ss:$8 sps:$4 sm:$0xff]  }
 0x4bb   :  { %v2870_v63 = vpack.c.bf16 %v2828_v57, %v2826_v32  ;;  %v6956_v57 = vld [vmem:[#allocation2 + $0x5f0] ss:$8 sps:$4 sm:$0xff]   ;;  %3677 = vmatprep.subr.bf16.mxu0 %v6958_v53 }
 0x4bc   :  { %v2871_v1 = vpack.c.bf16 %v2829_v61, %v2827_v58  ;;  %v2737_v4 = vpop.f32.mrb[204].mxu0  ;;  %3678 = vmatpush1.bf16.msra.mxu0 %v6956_v57 }
 0x4bd   :  { %v2738_v5 = vadd.f32 %v2737_v4, %v7805_v42  ;;  %v2739_v9 = vpop.f32.mrb[205].mxu0 }
 0x4be   :  { %v2740_v13 = vadd.f32 %v2739_v9, %v7808_v44  ;;  %v2741_v15 = vpop.f32.mrb[206].mxu0  ;;  %3220 = vmatprep.mubr.bf16.mxu1 %v2871_v1 }
 0x4bf   :  { %v2742_v55 = vadd.f32 %v2741_v15, %v7805_v42  ;;  %v2743_v56 = vpop.f32.mrb[207].mxu0  ;;  %3221 = vmatmul.mubr.bf16.gmra.mrb[40].mxu1 %v2870_v63  ;;  %v2830_v25 = vmax.f32 %v2738_v5, 0.0 }
 0x4c0   :  { %v2744_v18 = vadd.f32 %v2743_v56, %v7808_v44  ;;  %v2831_v20 = vmax.f32 %v2740_v13, 0.0 }
 0x4c1   :  { %v2832_v27 = vmax.f32 %v2742_v55, 0.0 }
 0x4c2   :  { %v2833_v24 = vmax.f32 %v2744_v18, 0.0 }
 0x4c3   :  { %v2872_v30 = vpack.c.bf16 %v2832_v27, %v2830_v25 }
 0x4c4   :  { %v2873_v35 = vpack.c.bf16 %v2833_v24, %v2831_v20  ;;  %v2747_v38 = vpop.f32.mrb[208].mxu0 }
 0x4c5   :  { %v2748_v0 = vadd.f32 %v2747_v38, %v7805_v42  ;;  %v2749_v7 = vpop.f32.mrb[209].mxu0 }
 0x4c6   :  { %v2750_v40 = vadd.f32 %v2749_v7, %v7808_v44  ;;  %v2751_v45 = vpop.f32.mrb[210].mxu0  ;;  %3230 = vmatprep.mubr.bf16.mxu1 %v2873_v35 }
 0x4c7   :  { %v2752_v48 = vadd.f32 %v2751_v45, %v7805_v42  ;;  %v2753_v50 = vpop.f32.mrb[211].mxu0  ;;  %3231 = vmatmul.mubr.bf16.gmra.mrb[44].mxu1 %v2872_v30  ;;  %v2834_v58 = vmax.f32 %v2748_v0, 0.0 }
 0x4c8   :  { %v2754_v32 = vadd.f32 %v2753_v50, %v7808_v44  ;;  %v2835_v63 = vmax.f32 %v2750_v40, 0.0 }
 0x4c9   :  { %v2836_v61 = vmax.f32 %v2752_v48, 0.0 }
 0x4ca   :  { %v2837_v1 = vmax.f32 %v2754_v32, 0.0 }
 0x4cb   :  { %v2874_v4 = vpack.c.bf16 %v2836_v61, %v2834_v58 }
 0x4cc   :  { %v2875_v5 = vpack.c.bf16 %v2837_v1, %v2835_v63  ;;  %v2757_v9 = vpop.f32.mrb[212].mxu0 }
 0x4cd   :  { %v2758_v13 = vadd.f32 %v2757_v9, %v7805_v42  ;;  %v2759_v15 = vpop.f32.mrb[213].mxu0 }
 0x4ce   :  { %v2760_v55 = vadd.f32 %v2759_v15, %v7808_v44  ;;  %v2761_v56 = vpop.f32.mrb[214].mxu0  ;;  %3240 = vmatprep.mubr.bf16.mxu1 %v2875_v5 }
 0x4cf   :  { %v2762_v18 = vadd.f32 %v2761_v56, %v7805_v42  ;;  %v2763_v25 = vpop.f32.mrb[215].mxu0  ;;  %3241 = vmatmul.mubr.bf16.gmra.mrb[48].mxu1 %v2874_v4  ;;  %v2838_v20 = vmax.f32 %v2758_v13, 0.0 }
 0x4d0   :  { %v2764_v27 = vadd.f32 %v2763_v25, %v7808_v44  ;;  %v2839_v30 = vmax.f32 %v2760_v55, 0.0 }
 0x4d1   :  { %v2840_v24 = vmax.f32 %v2762_v18, 0.0 }
 0x4d2   :  { %v2841_v35 = vmax.f32 %v2764_v27, 0.0 }
 0x4d3   :  { %v2876_v38 = vpack.c.bf16 %v2840_v24, %v2838_v20 }
 0x4d4   :  { %v2877_v0 = vpack.c.bf16 %v2841_v35, %v2839_v30  ;;  %v2767_v7 = vpop.f32.mrb[216].mxu0 }
 0x4d5   :  { %v2768_v40 = vadd.f32 %v2767_v7, %v7805_v42  ;;  %v2769_v45 = vpop.f32.mrb[217].mxu0  ;;  %v6959_v7 = vld [vmem:[#allocation2 + $0x600] ss:$8 sps:$4 sm:$0xff]  }
 0x4d6   :  { %v2770_v48 = vadd.f32 %v2769_v45, %v7808_v44  ;;  %v2771_v50 = vpop.f32.mrb[218].mxu0  ;;  %3250 = vmatprep.mubr.bf16.mxu1 %v2877_v0  ;;  %v6962_v45 = vld [vmem:[#allocation2 + $0x610] ss:$8 sps:$4 sm:$0xff]  }
 0x4d7   :  { %v2772_v53 = vadd.f32 %v2771_v50, %v7805_v42  ;;  %v2773_v32 = vpop.f32.mrb[219].mxu0  ;;  %3251 = vmatmul.mubr.bf16.gmra.mrb[52].mxu1 %v2876_v38  ;;  %v2842_v58 = vmax.f32 %v2768_v40, 0.0  ;;  %v6961_v40 = vld [vmem:[#allocation2 + $0x604] ss:$8 sps:$4 sm:$0xff]  }
 0x4d8   :  { %v2774_v57 = vadd.f32 %v2773_v32, %v7808_v44  ;;  %v2843_v63 = vmax.f32 %v2770_v48, 0.0  ;;  %4142 = vmatprep.subr.bf16.mxu1 %v6961_v40  ;;  %v6964_v48 = vld [vmem:[#allocation2 + $0x614] ss:$8 sps:$4 sm:$0xff]   ;;  %v6967_v50 = vld [vmem:[#allocation2 + $0x624] ss:$8 sps:$4 sm:$0xff]  }
 0x4d9   :  { %v2844_v61 = vmax.f32 %v2772_v53, 0.0  ;;  %4143 = vmatpush1.bf16.msra.mxu1 %v6959_v7  ;;  %v6979_v7 = vld [vmem:[#allocation2 + $0x664] ss:$8 sps:$4 sm:$0xff]  }
 0x4da   :  { %v2845_v1 = vmax.f32 %v2774_v57, 0.0  ;;  %4144 = vmatprep.subr.bf16.mxu1 %v6964_v48 }
 0x4db   :  { %v2878_v4 = vpack.c.bf16 %v2844_v61, %v2842_v58  ;;  %v6968_v58 = vld [vmem:[#allocation2 + $0x630] ss:$8 sps:$4 sm:$0xff]   ;;  %v6970_v61 = vld [vmem:[#allocation2 + $0x634] ss:$8 sps:$4 sm:$0xff]  }
 0x4dc   :  { %v2879_v5 = vpack.c.bf16 %v2845_v1, %v2843_v63  ;;  %v2777_v9 = vpop.f32.mrb[220].mxu0 }
 0x4dd   :  { %v2778_v13 = vadd.f32 %v2777_v9, %v7805_v42  ;;  %v2779_v15 = vpop.f32.mrb[221].mxu0  ;;  %4145 = vmatpush1.bf16.msra.mxu1 %v6962_v45 }
 0x4de   :  { %v2780_v55 = vadd.f32 %v2779_v15, %v7808_v44  ;;  %v2781_v56 = vpop.f32.mrb[222].mxu0  ;;  %3260 = vmatprep.mubr.bf16.mxu1 %v2879_v5  ;;  %4146 = vmatprep.subr.bf16.mxu1 %v6967_v50  ;;  %v6971_v15 = vld [vmem:[#allocation2 + $0x640] ss:$8 sps:$4 sm:$0xff]  }
 0x4df   :  { %v2782_v18 = vadd.f32 %v2781_v56, %v7805_v42  ;;  %v2783_v25 = vpop.f32.mrb[223].mxu0  ;;  %3261 = vmatmul.mubr.bf16.gmra.mrb[56].mxu1 %v2878_v4  ;;  %v2846_v20 = vmax.f32 %v2778_v13, 0.0  ;;  %v6013_v42 = vld [vmem:[%s8844_s4 + $0x8] sm:$0x3] }
 0x4e0   :  { %v2784_v27 = vadd.f32 %v2783_v25, %v7808_v44  ;;  %v2847_v30 = vmax.f32 %v2780_v55, 0.0  ;;  %v6965_v44 = vld [vmem:[#allocation2 + $0x620] ss:$8 sps:$4 sm:$0xff]   ;;  %v7878_v53 = vrot.slane %v6013_v42, %v7441_v14  ;;  %v7881_v32 = vrot.slane %v6013_v42, %v7446_v29  ;;  %v6973_v55 = vld [vmem:[#allocation2 + $0x644] ss:$8 sps:$4 sm:$0xff]  }
 0x4e1   :  { %v2848_v24 = vmax.f32 %v2782_v18, 0.0  ;;  %4147 = vmatpush1.bf16.msra.mxu1 %v6965_v44  ;;  %v6976_v18 = vld [vmem:[#allocation2 + $0x654] ss:$8 sps:$4 sm:$0xff]  }
 0x4e2   :  { %v2849_v35 = vmax.f32 %v2784_v27, 0.0  ;;  %4148 = vmatprep.subr.bf16.mxu1 %v6970_v61  ;;  %v6982_v61 = vld [vmem:[#allocation2 + $0x674] ss:$8 sps:$4 sm:$0xff]  }
 0x4e3   :  { %v2880_v38 = vpack.c.bf16 %v2848_v24, %v2846_v20 }
 0x4e4   :  { %v2881_v0 = vpack.c.bf16 %v2849_v35, %v2847_v30  ;;  %v6974_v35 = vld [vmem:[#allocation2 + $0x650] ss:$8 sps:$4 sm:$0xff]  }
 0x4e5   :  { %4149 = vmatpush1.bf16.msra.mxu1 %v6968_v58 }
 0x4e6   :  { %3270 = vmatprep.mubr.bf16.mxu1 %v2881_v0  ;;  %4150 = vmatprep.subr.bf16.mxu1 %v6973_v55 }
 0x4e7   :  { %3271 = vmatmul.mubr.bf16.gmra.mrb[60].mxu1 %v2880_v38 }
 0x4e9   :  { %4151 = vmatpush1.bf16.msra.mxu1 %v6971_v15 }
 0x4ea   :  { %4152 = vmatprep.subr.bf16.mxu1 %v6976_v18 }
 0x4ed   :  { %4153 = vmatpush1.bf16.msra.mxu1 %v6974_v35  ;;  %v6983_v35 = vld [vmem:[#allocation2 + $0x680] ss:$8 sps:$4 sm:$0xff]  }
 0x4ee   :  { %4154 = vmatprep.subr.bf16.mxu1 %v6979_v7 }
 0x542   :  { %v3122_v57 = vpop.f32.mrb[0].mxu1 }
 0x543   :  { %v3123_v63 = vadd.f32 %v3122_v57, %v7878_v53  ;;  %v3124_v1 = vpop.f32.mrb[1].mxu1  ;;  %v6977_v57 = vld [vmem:[#allocation2 + $0x660] ss:$8 sps:$4 sm:$0xff]  }
 0x544   :  { %v3125_v4 = vadd.f32 %v3124_v1, %v7881_v32  ;;  %v3126_v5 = vpop.f32.mrb[2].mxu1  ;;  %4155 = vmatpush1.bf16.msra.mxu1 %v6977_v57 }
 0x545   :  { %v3127_v9 = vadd.f32 %v3126_v5, %v7878_v53  ;;  %v3128_v13 = vpop.f32.mrb[3].mxu1  ;;  %v3345_v25 = vmax.f32 %v3123_v63, 0.0  ;;  %4156 = vmatprep.subr.bf16.mxu1 %v6982_v61 }
 0x546   :  { %v3129_v56 = vadd.f32 %v3128_v13, %v7881_v32  ;;  %v3346_v20 = vmax.f32 %v3125_v4, 0.0  ;;  %v6980_v13 = vld [vmem:[#allocation2 + $0x670] ss:$8 sps:$4 sm:$0xff]  }
 0x547   :  { %v3347_v27 = vmax.f32 %v3127_v9, 0.0 }
 0x548   :  { %v3348_v24 = vmax.f32 %v3129_v56, 0.0  ;;  %v6985_v56 = vld [vmem:[#allocation2 + $0x684] ss:$8 sps:$4 sm:$0xff]   ;;  %4157 = vmatpush1.bf16.msra.mxu1 %v6980_v13  ;;  %v6989_v13 = vld [vmem:[#allocation2 + $0x6a0] ss:$8 sps:$4 sm:$0xff]  }
 0x549   :  { %v3409_v30 = vpack.c.bf16 %v3347_v27, %v3345_v25  ;;  %4158 = vmatprep.subr.bf16.mxu1 %v6985_v56 }
 0x54a   :  { %v3410_v38 = vpack.c.bf16 %v3348_v24, %v3346_v20  ;;  %v3132_v0 = vpop.f32.mrb[4].mxu1 }
 0x54b   :  { %v3133_v40 = vadd.f32 %v3132_v0, %v7878_v53  ;;  %v3134_v45 = vpop.f32.mrb[5].mxu1  ;;  %v6988_v0 = vld [vmem:[#allocation2 + $0x694] ss:$8 sps:$4 sm:$0xff]  }
 0x54c   :  { %v3135_v48 = vadd.f32 %v3134_v45, %v7881_v32  ;;  %v3136_v42 = vpop.f32.mrb[6].mxu1  ;;  %3679 = vmatprep.mubr.bf16.mxu0 %v3410_v38  ;;  %4159 = vmatpush1.bf16.msra.mxu1 %v6983_v35 }
 0x54d   :  { %v3137_v44 = vadd.f32 %v3136_v42, %v7878_v53  ;;  %v3138_v50 = vpop.f32.mrb[7].mxu1  ;;  %3680 = vmatmul.mubr.bf16.vlgmr.msra.gmra.mrb[224].mxu0 %v3409_v30  ;;  %v3349_v63 = vmax.f32 %v3133_v40, 0.0  ;;  %4160 = vmatprep.subr.bf16.mxu1 %v6988_v0 }
 0x54e   :  { %v3139_v58 = vadd.f32 %v3138_v50, %v7881_v32  ;;  %v3350_v4 = vmax.f32 %v3135_v48, 0.0 }
 0x54f   :  { %v3351_v1 = vmax.f32 %v3137_v44, 0.0  ;;  %v6986_v44 = vld [vmem:[#allocation2 + $0x690] ss:$8 sps:$4 sm:$0xff]  }
 0x550   :  { %v3352_v5 = vmax.f32 %v3139_v58, 0.0  ;;  %v6991_v58 = vld [vmem:[#allocation2 + $0x6a4] ss:$8 sps:$4 sm:$0xff]   ;;  %4161 = vmatpush1.bf16.msra.mxu1 %v6986_v44  ;;  %v6995_v44 = vld [vmem:[#allocation2 + $0x6c0] ss:$8 sps:$4 sm:$0xff]  }
 0x551   :  { %v3411_v9 = vpack.c.bf16 %v3351_v1, %v3349_v63  ;;  %4162 = vmatprep.subr.bf16.mxu1 %v6991_v58 }
 0x552   :  { %v3412_v15 = vpack.c.bf16 %v3352_v5, %v3350_v4  ;;  %v3142_v55 = vpop.f32.mrb[8].mxu1 }
 0x553   :  { %v3143_v18 = vadd.f32 %v3142_v55, %v7878_v53  ;;  %v3144_v25 = vpop.f32.mrb[9].mxu1  ;;  %v6994_v55 = vld [vmem:[#allocation2 + $0x6b4] ss:$8 sps:$4 sm:$0xff]  }
 0x554   :  { %v3145_v27 = vadd.f32 %v3144_v25, %v7881_v32  ;;  %v3146_v20 = vpop.f32.mrb[10].mxu1  ;;  %3689 = vmatprep.mubr.bf16.mxu0 %v3412_v15  ;;  %4163 = vmatpush1.bf16.msra.mxu1 %v6989_v13 }
 0x555   :  { %v3147_v24 = vadd.f32 %v3146_v20, %v7878_v53  ;;  %v3148_v30 = vpop.f32.mrb[11].mxu1  ;;  %3690 = vmatmul.mubr.bf16.gmra.mrb[228].mxu0 %v3411_v9  ;;  %v3353_v7 = vmax.f32 %v3143_v18, 0.0  ;;  %4164 = vmatprep.subr.bf16.mxu1 %v6994_v55 }
 0x556   :  { %v3149_v38 = vadd.f32 %v3148_v30, %v7881_v32  ;;  %v3354_v45 = vmax.f32 %v3145_v27, 0.0 }
 0x557   :  { %v3355_v40 = vmax.f32 %v3147_v24, 0.0  ;;  %v6992_v24 = vld [vmem:[#allocation2 + $0x6b0] ss:$8 sps:$4 sm:$0xff]  }
 0x558   :  { %v3356_v48 = vmax.f32 %v3149_v38, 0.0  ;;  %v6997_v38 = vld [vmem:[#allocation2 + $0x6c4] ss:$8 sps:$4 sm:$0xff]   ;;  %4165 = vmatpush1.bf16.msra.mxu1 %v6992_v24  ;;  %v7001_v24 = vld [vmem:[#allocation2 + $0x6e0] ss:$8 sps:$4 sm:$0xff]  }
 0x559   :  { %v3413_v42 = vpack.c.bf16 %v3355_v40, %v3353_v7  ;;  %4166 = vmatprep.subr.bf16.mxu1 %v6997_v38 }
 0x55a   :  { %v3414_v50 = vpack.c.bf16 %v3356_v48, %v3354_v45  ;;  %v3152_v57 = vpop.f32.mrb[12].mxu1 }
 0x55b   :  { %v3153_v61 = vadd.f32 %v3152_v57, %v7878_v53  ;;  %v3154_v63 = vpop.f32.mrb[13].mxu1  ;;  %v7000_v57 = vld [vmem:[#allocation2 + $0x6d4] ss:$8 sps:$4 sm:$0xff]  }
 0x55c   :  { %v3155_v1 = vadd.f32 %v3154_v63, %v7881_v32  ;;  %v3156_v4 = vpop.f32.mrb[14].mxu1  ;;  %3699 = vmatprep.mubr.bf16.mxu0 %v3414_v50  ;;  %4167 = vmatpush1.bf16.msra.mxu1 %v6995_v44 }
 0x55d   :  { %v3157_v5 = vadd.f32 %v3156_v4, %v7878_v53  ;;  %v3158_v9 = vpop.f32.mrb[15].mxu1  ;;  %3700 = vmatmul.mubr.bf16.gmra.mrb[232].mxu0 %v3413_v42  ;;  %v3357_v56 = vmax.f32 %v3153_v61, 0.0  ;;  %4168 = vmatprep.subr.bf16.mxu1 %v7000_v57 }
 0x55e   :  { %v3159_v15 = vadd.f32 %v3158_v9, %v7881_v32  ;;  %v3358_v25 = vmax.f32 %v3155_v1, 0.0 }
 0x55f   :  { %v3359_v18 = vmax.f32 %v3157_v5, 0.0  ;;  %v6998_v5 = vld [vmem:[#allocation2 + $0x6d0] ss:$8 sps:$4 sm:$0xff]  }
 0x560   :  { %v3360_v27 = vmax.f32 %v3159_v15, 0.0  ;;  %v7003_v15 = vld [vmem:[#allocation2 + $0x6e4] ss:$8 sps:$4 sm:$0xff]   ;;  %4169 = vmatpush1.bf16.msra.mxu1 %v6998_v5 }
 0x561   :  { %v3415_v20 = vpack.c.bf16 %v3359_v18, %v3357_v56  ;;  %4170 = vmatprep.subr.bf16.mxu1 %v7003_v15 }
 0x562   :  { %v3416_v30 = vpack.c.bf16 %v3360_v27, %v3358_v25  ;;  %v3162_v35 = vpop.f32.mrb[16].mxu1 }
 0x563   :  { %v3163_v0 = vadd.f32 %v3162_v35, %v7878_v53  ;;  %v3164_v7 = vpop.f32.mrb[17].mxu1 }
 0x564   :  { %v3165_v40 = vadd.f32 %v3164_v7, %v7881_v32  ;;  %v3166_v45 = vpop.f32.mrb[18].mxu1  ;;  %3709 = vmatprep.mubr.bf16.mxu0 %v3416_v30  ;;  %4171 = vmatpush1.bf16.msra.mxu1 %v7001_v24 }
 0x565   :  { %v3167_v48 = vadd.f32 %v3166_v45, %v7878_v53  ;;  %v3168_v42 = vpop.f32.mrb[19].mxu1  ;;  %3710 = vmatmul.mubr.bf16.gmra.mrb[236].mxu0 %v3415_v20  ;;  %v3361_v58 = vmax.f32 %v3163_v0, 0.0 }
 0x566   :  { %v3169_v50 = vadd.f32 %v3168_v42, %v7881_v32  ;;  %v3362_v63 = vmax.f32 %v3165_v40, 0.0 }
 0x567   :  { %v3363_v61 = vmax.f32 %v3167_v48, 0.0 }
 0x568   :  { %v3364_v1 = vmax.f32 %v3169_v50, 0.0 }
 0x569   :  { %v3417_v4 = vpack.c.bf16 %v3363_v61, %v3361_v58 }
 0x56a   :  { %v3418_v9 = vpack.c.bf16 %v3364_v1, %v3362_v63  ;;  %v3172_v13 = vpop.f32.mrb[20].mxu1 }
 0x56b   :  { %v3173_v55 = vadd.f32 %v3172_v13, %v7878_v53  ;;  %v3174_v56 = vpop.f32.mrb[21].mxu1 }
 0x56c   :  { %v3175_v18 = vadd.f32 %v3174_v56, %v7881_v32  ;;  %v3176_v25 = vpop.f32.mrb[22].mxu1  ;;  %3719 = vmatprep.mubr.bf16.mxu0 %v3418_v9 }
 0x56d   :  { %v3177_v27 = vadd.f32 %v3176_v25, %v7878_v53  ;;  %v3178_v20 = vpop.f32.mrb[23].mxu1  ;;  %3720 = vmatmul.mubr.bf16.gmra.mrb[240].mxu0 %v3417_v4  ;;  %v3365_v35 = vmax.f32 %v3173_v55, 0.0 }
 0x56e   :  { %v3179_v30 = vadd.f32 %v3178_v20, %v7881_v32  ;;  %v3366_v0 = vmax.f32 %v3175_v18, 0.0 }
 0x56f   :  { %v3367_v38 = vmax.f32 %v3177_v27, 0.0 }
 0x570   :  { %v3368_v7 = vmax.f32 %v3179_v30, 0.0 }
 0x571   :  { %v3419_v40 = vpack.c.bf16 %v3367_v38, %v3365_v35 }
 0x572   :  { %v3420_v45 = vpack.c.bf16 %v3368_v7, %v3366_v0  ;;  %v3182_v48 = vpop.f32.mrb[24].mxu1 }
 0x573   :  { %v3183_v42 = vadd.f32 %v3182_v48, %v7878_v53  ;;  %v3184_v44 = vpop.f32.mrb[25].mxu1 }
 0x574   :  { %v3185_v50 = vadd.f32 %v3184_v44, %v7881_v32  ;;  %v3186_v57 = vpop.f32.mrb[26].mxu1  ;;  %3729 = vmatprep.mubr.bf16.mxu0 %v3420_v45 }
 0x575   :  { %v3187_v58 = vadd.f32 %v3186_v57, %v7878_v53  ;;  %v3188_v61 = vpop.f32.mrb[27].mxu1  ;;  %3730 = vmatmul.mubr.bf16.gmra.mrb[244].mxu0 %v3419_v40  ;;  %v3369_v1 = vmax.f32 %v3183_v42, 0.0 }
 0x576   :  { %v3189_v63 = vadd.f32 %v3188_v61, %v7881_v32  ;;  %v3370_v5 = vmax.f32 %v3185_v50, 0.0 }
 0x577   :  { %v3371_v4 = vmax.f32 %v3187_v58, 0.0 }
 0x578   :  { %v3372_v9 = vmax.f32 %v3189_v63, 0.0 }
 0x579   :  { %v3421_v13 = vpack.c.bf16 %v3371_v4, %v3369_v1 }
 0x57a   :  { %v3422_v15 = vpack.c.bf16 %v3372_v9, %v3370_v5  ;;  %v3192_v55 = vpop.f32.mrb[28].mxu1 }
 0x57b   :  { %v3193_v56 = vadd.f32 %v3192_v55, %v7878_v53  ;;  %v3194_v18 = vpop.f32.mrb[29].mxu1 }
 0x57c   :  { %v3195_v25 = vadd.f32 %v3194_v18, %v7881_v32  ;;  %v3196_v27 = vpop.f32.mrb[30].mxu1  ;;  %3739 = vmatprep.mubr.bf16.mxu0 %v3422_v15 }
 0x57d   :  { %v3197_v20 = vadd.f32 %v3196_v27, %v7878_v53  ;;  %v3198_v24 = vpop.f32.mrb[31].mxu1  ;;  %3740 = vmatmul.mubr.bf16.gmra.mrb[248].mxu0 %v3421_v13  ;;  %v3373_v35 = vmax.f32 %v3193_v56, 0.0 }
 0x57e   :  { %v3199_v30 = vadd.f32 %v3198_v24, %v7881_v32  ;;  %v3374_v0 = vmax.f32 %v3195_v25, 0.0 }
 0x57f   :  { %v3375_v38 = vmax.f32 %v3197_v20, 0.0 }
 0x580   :  { %v3376_v7 = vmax.f32 %v3199_v30, 0.0 }
 0x581   :  { %v3423_v40 = vpack.c.bf16 %v3375_v38, %v3373_v35 }
 0x582   :  { %v3424_v45 = vpack.c.bf16 %v3376_v7, %v3374_v0  ;;  %v3202_v48 = vpop.f32.mrb[32].mxu1 }
 0x583   :  { %v3203_v42 = vadd.f32 %v3202_v48, %v7878_v53  ;;  %v3204_v44 = vpop.f32.mrb[33].mxu1 }
 0x584   :  { %v3205_v50 = vadd.f32 %v3204_v44, %v7881_v32  ;;  %v3206_v57 = vpop.f32.mrb[34].mxu1  ;;  %3749 = vmatprep.mubr.bf16.mxu0 %v3424_v45 }
 0x585   :  { %v3207_v58 = vadd.f32 %v3206_v57, %v7878_v53  ;;  %v3208_v61 = vpop.f32.mrb[35].mxu1  ;;  %3750 = vmatmul.mubr.bf16.gmra.mrb[252].mxu0 %v3423_v40  ;;  %v3377_v1 = vmax.f32 %v3203_v42, 0.0 }
 0x586   :  { %v3209_v63 = vadd.f32 %v3208_v61, %v7881_v32  ;;  %v3378_v5 = vmax.f32 %v3205_v50, 0.0 }
 0x587   :  { %v3379_v4 = vmax.f32 %v3207_v58, 0.0 }
 0x588   :  { %v3380_v9 = vmax.f32 %v3209_v63, 0.0 }
 0x589   :  { %v3425_v13 = vpack.c.bf16 %v3379_v4, %v3377_v1 }
 0x58a   :  { %v3426_v15 = vpack.c.bf16 %v3380_v9, %v3378_v5  ;;  %v3212_v55 = vpop.f32.mrb[36].mxu1 }
 0x58b   :  { %v3213_v56 = vadd.f32 %v3212_v55, %v7878_v53  ;;  %v3214_v18 = vpop.f32.mrb[37].mxu1 }
 0x58c   :  { %v3215_v25 = vadd.f32 %v3214_v18, %v7881_v32  ;;  %v3216_v27 = vpop.f32.mrb[38].mxu1  ;;  %3759 = vmatprep.mubr.bf16.mxu0 %v3426_v15 }
 0x58d   :  { %v3217_v20 = vadd.f32 %v3216_v27, %v7878_v53  ;;  %v3218_v24 = vpop.f32.mrb[39].mxu1  ;;  %3760 = vmatmul.mubr.bf16.gmra.mrb[0].mxu0 %v3425_v13  ;;  %v3381_v35 = vmax.f32 %v3213_v56, 0.0 }
 0x58e   :  { %v3219_v30 = vadd.f32 %v3218_v24, %v7881_v32  ;;  %v3382_v0 = vmax.f32 %v3215_v25, 0.0 }
 0x58f   :  { %v3383_v38 = vmax.f32 %v3217_v20, 0.0 }
 0x590   :  { %v3384_v7 = vmax.f32 %v3219_v30, 0.0 }
 0x591   :  { %v3427_v40 = vpack.c.bf16 %v3383_v38, %v3381_v35 }
 0x592   :  { %v3428_v45 = vpack.c.bf16 %v3384_v7, %v3382_v0  ;;  %v3222_v48 = vpop.f32.mrb[40].mxu1 }
 0x593   :  { %v3223_v42 = vadd.f32 %v3222_v48, %v7878_v53  ;;  %v3224_v44 = vpop.f32.mrb[41].mxu1 }
 0x594   :  { %v3225_v50 = vadd.f32 %v3224_v44, %v7881_v32  ;;  %v3226_v57 = vpop.f32.mrb[42].mxu1  ;;  %3769 = vmatprep.mubr.bf16.mxu0 %v3428_v45 }
 0x595   :  { %v3227_v58 = vadd.f32 %v3226_v57, %v7878_v53  ;;  %v3228_v61 = vpop.f32.mrb[43].mxu1  ;;  %3770 = vmatmul.mubr.bf16.gmra.mrb[4].mxu0 %v3427_v40  ;;  %v3385_v1 = vmax.f32 %v3223_v42, 0.0 }
 0x596   :  { %v3229_v63 = vadd.f32 %v3228_v61, %v7881_v32  ;;  %v3386_v5 = vmax.f32 %v3225_v50, 0.0 }
 0x597   :  { %v3387_v4 = vmax.f32 %v3227_v58, 0.0 }
 0x598   :  { %v3388_v9 = vmax.f32 %v3229_v63, 0.0  ;;  %v7006_v63 = vld [vmem:[#allocation2 + $0x6f4] ss:$8 sps:$4 sm:$0xff]  }
 0x599   :  { %v3429_v13 = vpack.c.bf16 %v3387_v4, %v3385_v1  ;;  %v7004_v4 = vld [vmem:[#allocation2 + $0x6f0] ss:$8 sps:$4 sm:$0xff]   ;;  %4172 = vmatprep.subr.bf16.mxu1 %v7006_v63 }
 0x59a   :  { %v3430_v15 = vpack.c.bf16 %v3388_v9, %v3386_v5  ;;  %v3232_v55 = vpop.f32.mrb[44].mxu1  ;;  %4173 = vmatpush1.bf16.msra.mxu1 %v7004_v4 }
 0x59b   :  { %v3233_v56 = vadd.f32 %v3232_v55, %v7878_v53  ;;  %v3234_v18 = vpop.f32.mrb[45].mxu1 }
 0x59c   :  { %v3235_v25 = vadd.f32 %v3234_v18, %v7881_v32  ;;  %v3236_v27 = vpop.f32.mrb[46].mxu1  ;;  %3779 = vmatprep.mubr.bf16.mxu0 %v3430_v15 }
 0x59d   :  { %v3237_v20 = vadd.f32 %v3236_v27, %v7878_v53  ;;  %v3238_v24 = vpop.f32.mrb[47].mxu1  ;;  %3780 = vmatmul.mubr.bf16.gmra.mrb[8].mxu0 %v3429_v13  ;;  %v3389_v35 = vmax.f32 %v3233_v56, 0.0 }
 0x59e   :  { %v3239_v30 = vadd.f32 %v3238_v24, %v7881_v32  ;;  %v3390_v0 = vmax.f32 %v3235_v25, 0.0 }
 0x59f   :  { %v3391_v38 = vmax.f32 %v3237_v20, 0.0 }
 0x5a0   :  { %v3392_v7 = vmax.f32 %v3239_v30, 0.0 }
 0x5a1   :  { %v3431_v40 = vpack.c.bf16 %v3391_v38, %v3389_v35 }
 0x5a2   :  { %v3432_v45 = vpack.c.bf16 %v3392_v7, %v3390_v0  ;;  %v3242_v48 = vpop.f32.mrb[48].mxu1 }
 0x5a3   :  { %v3243_v42 = vadd.f32 %v3242_v48, %v7878_v53  ;;  %v3244_v44 = vpop.f32.mrb[49].mxu1 }
 0x5a4   :  { %v3245_v50 = vadd.f32 %v3244_v44, %v7881_v32  ;;  %v3246_v57 = vpop.f32.mrb[50].mxu1  ;;  %3789 = vmatprep.mubr.bf16.mxu0 %v3432_v45 }
 0x5a5   :  { %v3247_v58 = vadd.f32 %v3246_v57, %v7878_v53  ;;  %v3248_v61 = vpop.f32.mrb[51].mxu1  ;;  %3790 = vmatmul.mubr.bf16.gmra.mrb[12].mxu0 %v3431_v40  ;;  %v3393_v5 = vmax.f32 %v3243_v42, 0.0 }
 0x5a6   :  { %v3249_v1 = vadd.f32 %v3248_v61, %v7881_v32  ;;  %v3394_v13 = vmax.f32 %v3245_v50, 0.0 }
 0x5a7   :  { %v3395_v9 = vmax.f32 %v3247_v58, 0.0 }
 0x5a8   :  { %v3396_v15 = vmax.f32 %v3249_v1, 0.0 }
 0x5a9   :  { %v3433_v55 = vpack.c.bf16 %v3395_v9, %v3393_v5 }
 0x5aa   :  { %v3434_v56 = vpack.c.bf16 %v3396_v15, %v3394_v13  ;;  %v3252_v18 = vpop.f32.mrb[52].mxu1 }
 0x5ab   :  { %v3253_v25 = vadd.f32 %v3252_v18, %v7878_v53  ;;  %v3254_v27 = vpop.f32.mrb[53].mxu1 }
 0x5ac   :  { %v3255_v20 = vadd.f32 %v3254_v27, %v7881_v32  ;;  %v3256_v24 = vpop.f32.mrb[54].mxu1  ;;  %3799 = vmatprep.mubr.bf16.mxu0 %v3434_v56 }
 0x5ad   :  { %v3257_v30 = vadd.f32 %v3256_v24, %v7878_v53  ;;  %v3258_v35 = vpop.f32.mrb[55].mxu1  ;;  %3800 = vmatmul.mubr.bf16.gmra.mrb[16].mxu0 %v3433_v55  ;;  %v3397_v0 = vmax.f32 %v3253_v25, 0.0 }
 0x5ae   :  { %v3259_v38 = vadd.f32 %v3258_v35, %v7881_v32  ;;  %v3398_v40 = vmax.f32 %v3255_v20, 0.0 }
 0x5af   :  { %v3399_v7 = vmax.f32 %v3257_v30, 0.0 }
 0x5b0   :  { %v3400_v45 = vmax.f32 %v3259_v38, 0.0 }
 0x5b1   :  { %v3435_v48 = vpack.c.bf16 %v3399_v7, %v3397_v0 }
 0x5b2   :  { %v3436_v42 = vpack.c.bf16 %v3400_v45, %v3398_v40  ;;  %v3262_v44 = vpop.f32.mrb[56].mxu1 }
 0x5b3   :  { %v3263_v50 = vadd.f32 %v3262_v44, %v7878_v53  ;;  %v3264_v57 = vpop.f32.mrb[57].mxu1  ;;  %v7007_v44 = vld [vmem:[%s8845_s5] ss:$8 sps:$4 sm:$0xff]  }
 0x5b4   :  { %v3265_v58 = vadd.f32 %v3264_v57, %v7881_v32  ;;  %v3266_v61 = vpop.f32.mrb[58].mxu1  ;;  %3809 = vmatprep.mubr.bf16.mxu0 %v3436_v42  ;;  %v6046_v57 = vld [vmem:[%s8844_s4 + $0xa] sm:$0x3] }
 0x5b5   :  { %v3267_v63 = vadd.f32 %v3266_v61, %v7878_v53  ;;  %v3268_v1 = vpop.f32.mrb[59].mxu1  ;;  %3810 = vmatmul.mubr.bf16.gmra.mrb[20].mxu0 %v3435_v48  ;;  %v3401_v5 = vmax.f32 %v3263_v50, 0.0  ;;  %v7012_v50 = vld [vmem:[%s8845_s5 + $0x14] ss:$8 sps:$4 sm:$0xff]   ;;  %v7015_v61 = vld [vmem:[%s8845_s5 + $0x24] ss:$8 sps:$4 sm:$0xff]  }
 0x5b6   :  { %v3269_v4 = vadd.f32 %v3268_v1, %v7881_v32  ;;  %v3402_v13 = vmax.f32 %v3265_v58, 0.0  ;;  %v7013_v58 = vld [vmem:[%s8845_s5 + $0x20] ss:$8 sps:$4 sm:$0xff]   ;;  %v7972_v1 = vrot.slane %v6046_v57, %v7446_v29 }
 0x5b7   :  { %v3403_v9 = vmax.f32 %v3267_v63, 0.0  ;;  %v7969_v63 = vrot.slane %v6046_v57, %v7441_v14 }
 0x5b8   :  { %v3404_v15 = vmax.f32 %v3269_v4, 0.0 }
 0x5b9   :  { %v3437_v55 = vpack.c.bf16 %v3403_v9, %v3401_v5  ;;  %v7016_v5 = vld [vmem:[%s8845_s5 + $0x30] ss:$8 sps:$4 sm:$0xff]   ;;  %v7018_v9 = vld [vmem:[%s8845_s5 + $0x34] ss:$8 sps:$4 sm:$0xff]  }
 0x5ba   :  { %v3438_v56 = vpack.c.bf16 %v3404_v15, %v3402_v13  ;;  %v3272_v18 = vpop.f32.mrb[60].mxu1 }
 0x5bb   :  { %v3273_v25 = vadd.f32 %v3272_v18, %v7878_v53  ;;  %v3274_v27 = vpop.f32.mrb[61].mxu1 }
 0x5bc   :  { %v3275_v20 = vadd.f32 %v3274_v27, %v7881_v32  ;;  %v3276_v24 = vpop.f32.mrb[62].mxu1  ;;  %3819 = vmatprep.mubr.bf16.mxu0 %v3438_v56  ;;  %v7019_v27 = vld [vmem:[%s8845_s5 + $0x40] ss:$8 sps:$4 sm:$0xff]  }
 0x5bd   :  { %v3277_v30 = vadd.f32 %v3276_v24, %v7878_v53  ;;  %v3278_v35 = vpop.f32.mrb[63].mxu1  ;;  %3820 = vmatmul.mubr.bf16.gmra.mrb[24].mxu0 %v3437_v55  ;;  %v3405_v0 = vmax.f32 %v3273_v25, 0.0  ;;  %v7009_v53 = vld [vmem:[%s8845_s5 + $0x4] ss:$8 sps:$4 sm:$0xff]  }
 0x5be   :  { %v3279_v38 = vadd.f32 %v3278_v35, %v7881_v32  ;;  %v3406_v40 = vmax.f32 %v3275_v20, 0.0  ;;  %4635 = vmatprep.subr.bf16.mxu0 %v7009_v53  ;;  %v7010_v32 = vld [vmem:[%s8845_s5 + $0x10] ss:$8 sps:$4 sm:$0xff]   ;;  %v7021_v20 = vld [vmem:[%s8845_s5 + $0x44] ss:$8 sps:$4 sm:$0xff]  }
 0x5bf   :  { %v3407_v7 = vmax.f32 %v3277_v30, 0.0  ;;  %4636 = vmatpush1.bf16.msra.mxu0 %v7007_v44  ;;  %v7024_v30 = vld [vmem:[%s8845_s5 + $0x54] ss:$8 sps:$4 sm:$0xff]   ;;  %v7027_v44 = vld [vmem:[%s8845_s5 + $0x64] ss:$8 sps:$4 sm:$0xff]  }
 0x5c0   :  { %v3408_v45 = vmax.f32 %v3279_v38, 0.0  ;;  %4637 = vmatprep.subr.bf16.mxu0 %v7012_v50 }
 0x5c1   :  { %v3439_v48 = vpack.c.bf16 %v3407_v7, %v3405_v0 }
 0x5c2   :  { %v3440_v42 = vpack.c.bf16 %v3408_v45, %v3406_v40  ;;  %v7022_v45 = vld [vmem:[%s8845_s5 + $0x50] ss:$8 sps:$4 sm:$0xff]  }
 0x5c3   :  { %4638 = vmatpush1.bf16.msra.mxu0 %v7010_v32 }
 0x5c4   :  { %3829 = vmatprep.mubr.bf16.mxu0 %v3440_v42  ;;  %4639 = vmatprep.subr.bf16.mxu0 %v7015_v61 }
 0x5c5   :  { %3830 = vmatmul.mubr.bf16.gmra.mrb[28].mxu0 %v3439_v48 }
 0x5c7   :  { %4640 = vmatpush1.bf16.msra.mxu0 %v7013_v58 }
 0x5c8   :  { %4641 = vmatprep.subr.bf16.mxu0 %v7018_v9  ;;  %v7030_v9 = vld [vmem:[%s8845_s5 + $0x74] ss:$8 sps:$4 sm:$0xff]  }
 0x5cb   :  { %4642 = vmatpush1.bf16.msra.mxu0 %v7016_v5 }
 0x5cc   :  { %4643 = vmatprep.subr.bf16.mxu0 %v7021_v20 }
 0x5cf   :  { %4644 = vmatpush1.bf16.msra.mxu0 %v7019_v27 }
 0x5d0   :  { %4645 = vmatprep.subr.bf16.mxu0 %v7024_v30 }
 0x5d3   :  { %4646 = vmatpush1.bf16.msra.mxu0 %v7022_v45  ;;  %v7031_v45 = vld [vmem:[%s8845_s5 + $0x80] ss:$8 sps:$4 sm:$0xff]  }
 0x5d4   :  { %4647 = vmatprep.subr.bf16.mxu0 %v7027_v44 }
 0x620   :  { %v3681_v4 = vpop.f32.mrb[224].mxu0 }
 0x621   :  { %v3682_v13 = vadd.f32 %v3681_v4, %v7969_v63  ;;  %v3683_v15 = vpop.f32.mrb[225].mxu0  ;;  %v7025_v4 = vld [vmem:[%s8845_s5 + $0x60] ss:$8 sps:$4 sm:$0xff]  }
 0x622   :  { %v3684_v55 = vadd.f32 %v3683_v15, %v7972_v1  ;;  %v3685_v56 = vpop.f32.mrb[226].mxu0  ;;  %4648 = vmatpush1.bf16.msra.mxu0 %v7025_v4 }
 0x623   :  { %v3686_v18 = vadd.f32 %v3685_v56, %v7969_v63  ;;  %v3687_v25 = vpop.f32.mrb[227].mxu0  ;;  %v3840_v35 = vmax.f32 %v3682_v13, 0.0  ;;  %4649 = vmatprep.subr.bf16.mxu0 %v7030_v9 }
 0x624   :  { %v3688_v24 = vadd.f32 %v3687_v25, %v7972_v1  ;;  %v3841_v0 = vmax.f32 %v3684_v55, 0.0  ;;  %v7028_v25 = vld [vmem:[%s8845_s5 + $0x70] ss:$8 sps:$4 sm:$0xff]  }
 0x625   :  { %v3842_v38 = vmax.f32 %v3686_v18, 0.0 }
 0x626   :  { %v3843_v7 = vmax.f32 %v3688_v24, 0.0  ;;  %v7033_v24 = vld [vmem:[%s8845_s5 + $0x84] ss:$8 sps:$4 sm:$0xff]   ;;  %4650 = vmatpush1.bf16.msra.mxu0 %v7028_v25  ;;  %v7037_v25 = vld [vmem:[%s8845_s5 + $0xa0] ss:$8 sps:$4 sm:$0xff]  }
 0x627   :  { %v3904_v40 = vpack.c.bf16 %v3842_v38, %v3840_v35  ;;  %4651 = vmatprep.subr.bf16.mxu0 %v7033_v24 }
 0x628   :  { %v3905_v48 = vpack.c.bf16 %v3843_v7, %v3841_v0  ;;  %v3691_v42 = vpop.f32.mrb[228].mxu0 }
 0x629   :  { %v3692_v53 = vadd.f32 %v3691_v42, %v7969_v63  ;;  %v3693_v32 = vpop.f32.mrb[229].mxu0  ;;  %v7036_v42 = vld [vmem:[%s8845_s5 + $0x94] ss:$8 sps:$4 sm:$0xff]  }
 0x62a   :  { %v3694_v50 = vadd.f32 %v3693_v32, %v7972_v1  ;;  %v3695_v57 = vpop.f32.mrb[230].mxu0  ;;  %4174 = vmatprep.mubr.bf16.mxu1 %v3905_v48  ;;  %4652 = vmatpush1.bf16.msra.mxu0 %v7031_v45 }
 0x62b   :  { %v3696_v58 = vadd.f32 %v3695_v57, %v7969_v63  ;;  %v3697_v61 = vpop.f32.mrb[231].mxu0  ;;  %4175 = vmatmul.mubr.bf16.vlgmr.msra.gmra.mrb[192].mxu1 %v3904_v40  ;;  %v3844_v13 = vmax.f32 %v3692_v53, 0.0  ;;  %4653 = vmatprep.subr.bf16.mxu0 %v7036_v42 }
 0x62c   :  { %v3698_v5 = vadd.f32 %v3697_v61, %v7972_v1  ;;  %v3845_v55 = vmax.f32 %v3694_v50, 0.0 }
 0x62d   :  { %v3846_v15 = vmax.f32 %v3696_v58, 0.0  ;;  %v7034_v58 = vld [vmem:[%s8845_s5 + $0x90] ss:$8 sps:$4 sm:$0xff]  }
 0x62e   :  { %v3847_v56 = vmax.f32 %v3698_v5, 0.0  ;;  %v7039_v5 = vld [vmem:[%s8845_s5 + $0xa4] ss:$8 sps:$4 sm:$0xff]   ;;  %4654 = vmatpush1.bf16.msra.mxu0 %v7034_v58  ;;  %v7043_v58 = vld [vmem:[%s8845_s5 + $0xc0] ss:$8 sps:$4 sm:$0xff]  }
 0x62f   :  { %v3906_v18 = vpack.c.bf16 %v3846_v15, %v3844_v13  ;;  %4655 = vmatprep.subr.bf16.mxu0 %v7039_v5 }
 0x630   :  { %v3907_v27 = vpack.c.bf16 %v3847_v56, %v3845_v55  ;;  %v3701_v20 = vpop.f32.mrb[232].mxu0 }
 0x631   :  { %v3702_v30 = vadd.f32 %v3701_v20, %v7969_v63  ;;  %v3703_v35 = vpop.f32.mrb[233].mxu0  ;;  %v7042_v20 = vld [vmem:[%s8845_s5 + $0xb4] ss:$8 sps:$4 sm:$0xff]  }
 0x632   :  { %v3704_v38 = vadd.f32 %v3703_v35, %v7972_v1  ;;  %v3705_v0 = vpop.f32.mrb[234].mxu0  ;;  %4184 = vmatprep.mubr.bf16.mxu1 %v3907_v27  ;;  %4656 = vmatpush1.bf16.msra.mxu0 %v7037_v25 }
 0x633   :  { %v3706_v7 = vadd.f32 %v3705_v0, %v7969_v63  ;;  %v3707_v40 = vpop.f32.mrb[235].mxu0  ;;  %4185 = vmatmul.mubr.bf16.gmra.mrb[196].mxu1 %v3906_v18  ;;  %v3848_v44 = vmax.f32 %v3702_v30, 0.0  ;;  %4657 = vmatprep.subr.bf16.mxu0 %v7042_v20 }
 0x634   :  { %v3708_v48 = vadd.f32 %v3707_v40, %v7972_v1  ;;  %v3849_v32 = vmax.f32 %v3704_v38, 0.0 }
 0x635   :  { %v3850_v53 = vmax.f32 %v3706_v7, 0.0  ;;  %v7040_v7 = vld [vmem:[%s8845_s5 + $0xb0] ss:$8 sps:$4 sm:$0xff]  }
 0x636   :  { %v3851_v50 = vmax.f32 %v3708_v48, 0.0  ;;  %v7045_v48 = vld [vmem:[%s8845_s5 + $0xc4] ss:$8 sps:$4 sm:$0xff]   ;;  %4658 = vmatpush1.bf16.msra.mxu0 %v7040_v7  ;;  %v7049_v7 = vld [vmem:[%s8845_s5 + $0xe0] ss:$8 sps:$4 sm:$0xff]  }
 0x637   :  { %v3908_v57 = vpack.c.bf16 %v3850_v53, %v3848_v44  ;;  %4659 = vmatprep.subr.bf16.mxu0 %v7045_v48 }
 0x638   :  { %v3909_v61 = vpack.c.bf16 %v3851_v50, %v3849_v32  ;;  %v3711_v4 = vpop.f32.mrb[236].mxu0 }
 0x639   :  { %v3712_v9 = vadd.f32 %v3711_v4, %v7969_v63  ;;  %v3713_v13 = vpop.f32.mrb[237].mxu0  ;;  %v7048_v4 = vld [vmem:[%s8845_s5 + $0xd4] ss:$8 sps:$4 sm:$0xff]  }
 0x63a   :  { %v3714_v15 = vadd.f32 %v3713_v13, %v7972_v1  ;;  %v3715_v55 = vpop.f32.mrb[238].mxu0  ;;  %4194 = vmatprep.mubr.bf16.mxu1 %v3909_v61  ;;  %4660 = vmatpush1.bf16.msra.mxu0 %v7043_v58 }
 0x63b   :  { %v3716_v56 = vadd.f32 %v3715_v55, %v7969_v63  ;;  %v3717_v18 = vpop.f32.mrb[239].mxu0  ;;  %4195 = vmatmul.mubr.bf16.gmra.mrb[200].mxu1 %v3908_v57  ;;  %v3852_v24 = vmax.f32 %v3712_v9, 0.0  ;;  %4661 = vmatprep.subr.bf16.mxu0 %v7048_v4 }
 0x63c   :  { %v3718_v27 = vadd.f32 %v3717_v18, %v7972_v1  ;;  %v3853_v35 = vmax.f32 %v3714_v15, 0.0 }
 0x63d   :  { %v3854_v30 = vmax.f32 %v3716_v56, 0.0  ;;  %v7046_v56 = vld [vmem:[%s8845_s5 + $0xd0] ss:$8 sps:$4 sm:$0xff]  }
 0x63e   :  { %v3855_v38 = vmax.f32 %v3718_v27, 0.0  ;;  %v7051_v27 = vld [vmem:[%s8845_s5 + $0xe4] ss:$8 sps:$4 sm:$0xff]   ;;  %4662 = vmatpush1.bf16.msra.mxu0 %v7046_v56 }
 0x63f   :  { %v3910_v0 = vpack.c.bf16 %v3854_v30, %v3852_v24  ;;  %4663 = vmatprep.subr.bf16.mxu0 %v7051_v27 }
 0x640   :  { %v3911_v40 = vpack.c.bf16 %v3855_v38, %v3853_v35  ;;  %v3721_v45 = vpop.f32.mrb[240].mxu0 }
 0x641   :  { %v3722_v42 = vadd.f32 %v3721_v45, %v7969_v63  ;;  %v3723_v44 = vpop.f32.mrb[241].mxu0 }
 0x642   :  { %v3724_v53 = vadd.f32 %v3723_v44, %v7972_v1  ;;  %v3725_v32 = vpop.f32.mrb[242].mxu0  ;;  %4204 = vmatprep.mubr.bf16.mxu1 %v3911_v40  ;;  %4664 = vmatpush1.bf16.msra.mxu0 %v7049_v7 }
 0x643   :  { %v3726_v50 = vadd.f32 %v3725_v32, %v7969_v63  ;;  %v3727_v57 = vpop.f32.mrb[243].mxu0  ;;  %4205 = vmatmul.mubr.bf16.gmra.mrb[204].mxu1 %v3910_v0  ;;  %v3856_v5 = vmax.f32 %v3722_v42, 0.0 }
 0x644   :  { %v3728_v61 = vadd.f32 %v3727_v57, %v7972_v1  ;;  %v3857_v13 = vmax.f32 %v3724_v53, 0.0 }
 0x645   :  { %v3858_v9 = vmax.f32 %v3726_v50, 0.0 }
 0x646   :  { %v3859_v15 = vmax.f32 %v3728_v61, 0.0 }
 0x647   :  { %v3912_v55 = vpack.c.bf16 %v3858_v9, %v3856_v5 }
 0x648   :  { %v3913_v18 = vpack.c.bf16 %v3859_v15, %v3857_v13  ;;  %v3731_v25 = vpop.f32.mrb[244].mxu0 }
 0x649   :  { %v3732_v20 = vadd.f32 %v3731_v25, %v7969_v63  ;;  %v3733_v24 = vpop.f32.mrb[245].mxu0 }
 0x64a   :  { %v3734_v30 = vadd.f32 %v3733_v24, %v7972_v1  ;;  %v3735_v35 = vpop.f32.mrb[246].mxu0  ;;  %4214 = vmatprep.mubr.bf16.mxu1 %v3913_v18 }
 0x64b   :  { %v3736_v38 = vadd.f32 %v3735_v35, %v7969_v63  ;;  %v3737_v0 = vpop.f32.mrb[247].mxu0  ;;  %4215 = vmatmul.mubr.bf16.gmra.mrb[208].mxu1 %v3912_v55  ;;  %v3860_v45 = vmax.f32 %v3732_v20, 0.0 }
 0x64c   :  { %v3738_v40 = vadd.f32 %v3737_v0, %v7972_v1  ;;  %v3861_v42 = vmax.f32 %v3734_v30, 0.0 }
 0x64d   :  { %v3862_v48 = vmax.f32 %v3736_v38, 0.0 }
 0x64e   :  { %v3863_v44 = vmax.f32 %v3738_v40, 0.0 }
 0x64f   :  { %v3914_v53 = vpack.c.bf16 %v3862_v48, %v3860_v45 }
 0x650   :  { %v3915_v32 = vpack.c.bf16 %v3863_v44, %v3861_v42  ;;  %v3741_v50 = vpop.f32.mrb[248].mxu0 }
 0x651   :  { %v3742_v57 = vadd.f32 %v3741_v50, %v7969_v63  ;;  %v3743_v58 = vpop.f32.mrb[249].mxu0 }
 0x652   :  { %v3744_v61 = vadd.f32 %v3743_v58, %v7972_v1  ;;  %v3745_v4 = vpop.f32.mrb[250].mxu0  ;;  %4224 = vmatprep.mubr.bf16.mxu1 %v3915_v32 }
 0x653   :  { %v3746_v5 = vadd.f32 %v3745_v4, %v7969_v63  ;;  %v3747_v9 = vpop.f32.mrb[251].mxu0  ;;  %4225 = vmatmul.mubr.bf16.gmra.mrb[212].mxu1 %v3914_v53  ;;  %v3864_v15 = vmax.f32 %v3742_v57, 0.0 }
 0x654   :  { %v3748_v13 = vadd.f32 %v3747_v9, %v7972_v1  ;;  %v3865_v56 = vmax.f32 %v3744_v61, 0.0 }
 0x655   :  { %v3866_v55 = vmax.f32 %v3746_v5, 0.0 }
 0x656   :  { %v3867_v18 = vmax.f32 %v3748_v13, 0.0 }
 0x657   :  { %v3916_v25 = vpack.c.bf16 %v3866_v55, %v3864_v15 }
 0x658   :  { %v3917_v27 = vpack.c.bf16 %v3867_v18, %v3865_v56  ;;  %v3751_v20 = vpop.f32.mrb[252].mxu0 }
 0x659   :  { %v3752_v24 = vadd.f32 %v3751_v20, %v7969_v63  ;;  %v3753_v30 = vpop.f32.mrb[253].mxu0 }
 0x65a   :  { %v3754_v35 = vadd.f32 %v3753_v30, %v7972_v1  ;;  %v3755_v38 = vpop.f32.mrb[254].mxu0  ;;  %4234 = vmatprep.mubr.bf16.mxu1 %v3917_v27 }
 0x65b   :  { %v3756_v0 = vadd.f32 %v3755_v38, %v7969_v63  ;;  %v3757_v7 = vpop.f32.mrb[255].mxu0  ;;  %4235 = vmatmul.mubr.bf16.gmra.mrb[216].mxu1 %v3916_v25  ;;  %v3868_v45 = vmax.f32 %v3752_v24, 0.0 }
 0x65c   :  { %v3758_v40 = vadd.f32 %v3757_v7, %v7972_v1  ;;  %v3869_v42 = vmax.f32 %v3754_v35, 0.0 }
 0x65d   :  { %v3870_v48 = vmax.f32 %v3756_v0, 0.0 }
 0x65e   :  { %v3871_v44 = vmax.f32 %v3758_v40, 0.0 }
 0x65f   :  { %v3918_v53 = vpack.c.bf16 %v3870_v48, %v3868_v45 }
 0x660   :  { %v3919_v32 = vpack.c.bf16 %v3871_v44, %v3869_v42  ;;  %v3761_v50 = vpop.f32.mrb[0].mxu0 }
 0x661   :  { %v3762_v57 = vadd.f32 %v3761_v50, %v7969_v63  ;;  %v3763_v58 = vpop.f32.mrb[1].mxu0 }
 0x662   :  { %v3764_v61 = vadd.f32 %v3763_v58, %v7972_v1  ;;  %v3765_v4 = vpop.f32.mrb[2].mxu0  ;;  %4244 = vmatprep.mubr.bf16.mxu1 %v3919_v32 }
 0x663   :  { %v3766_v5 = vadd.f32 %v3765_v4, %v7969_v63  ;;  %v3767_v9 = vpop.f32.mrb[3].mxu0  ;;  %4245 = vmatmul.mubr.bf16.gmra.mrb[220].mxu1 %v3918_v53  ;;  %v3872_v15 = vmax.f32 %v3762_v57, 0.0 }
 0x664   :  { %v3768_v13 = vadd.f32 %v3767_v9, %v7972_v1  ;;  %v3873_v56 = vmax.f32 %v3764_v61, 0.0 }
 0x665   :  { %v3874_v55 = vmax.f32 %v3766_v5, 0.0 }
 0x666   :  { %v3875_v18 = vmax.f32 %v3768_v13, 0.0 }
 0x667   :  { %v3920_v25 = vpack.c.bf16 %v3874_v55, %v3872_v15 }
 0x668   :  { %v3921_v27 = vpack.c.bf16 %v3875_v18, %v3873_v56  ;;  %v3771_v20 = vpop.f32.mrb[4].mxu0 }
 0x669   :  { %v3772_v24 = vadd.f32 %v3771_v20, %v7969_v63  ;;  %v3773_v30 = vpop.f32.mrb[5].mxu0 }
 0x66a   :  { %v3774_v35 = vadd.f32 %v3773_v30, %v7972_v1  ;;  %v3775_v38 = vpop.f32.mrb[6].mxu0  ;;  %4254 = vmatprep.mubr.bf16.mxu1 %v3921_v27 }
 0x66b   :  { %v3776_v0 = vadd.f32 %v3775_v38, %v7969_v63  ;;  %v3777_v7 = vpop.f32.mrb[7].mxu0  ;;  %4255 = vmatmul.mubr.bf16.gmra.mrb[224].mxu1 %v3920_v25  ;;  %v3876_v45 = vmax.f32 %v3772_v24, 0.0 }
 0x66c   :  { %v3778_v40 = vadd.f32 %v3777_v7, %v7972_v1  ;;  %v3877_v42 = vmax.f32 %v3774_v35, 0.0 }
 0x66d   :  { %v3878_v48 = vmax.f32 %v3776_v0, 0.0 }
 0x66e   :  { %v3879_v44 = vmax.f32 %v3778_v40, 0.0 }
 0x66f   :  { %v3922_v53 = vpack.c.bf16 %v3878_v48, %v3876_v45 }
 0x670   :  { %v3923_v32 = vpack.c.bf16 %v3879_v44, %v3877_v42  ;;  %v3781_v50 = vpop.f32.mrb[8].mxu0 }
 0x671   :  { %v3782_v57 = vadd.f32 %v3781_v50, %v7969_v63  ;;  %v3783_v58 = vpop.f32.mrb[9].mxu0 }
 0x672   :  { %v3784_v61 = vadd.f32 %v3783_v58, %v7972_v1  ;;  %v3785_v4 = vpop.f32.mrb[10].mxu0  ;;  %4264 = vmatprep.mubr.bf16.mxu1 %v3923_v32 }
 0x673   :  { %v3786_v5 = vadd.f32 %v3785_v4, %v7969_v63  ;;  %v3787_v9 = vpop.f32.mrb[11].mxu0  ;;  %4265 = vmatmul.mubr.bf16.gmra.mrb[228].mxu1 %v3922_v53  ;;  %v3880_v15 = vmax.f32 %v3782_v57, 0.0 }
 0x674   :  { %v3788_v13 = vadd.f32 %v3787_v9, %v7972_v1  ;;  %v3881_v56 = vmax.f32 %v3784_v61, 0.0 }
 0x675   :  { %v3882_v55 = vmax.f32 %v3786_v5, 0.0 }
 0x676   :  { %v3883_v18 = vmax.f32 %v3788_v13, 0.0  ;;  %v7054_v13 = vld [vmem:[%s8845_s5 + $0xf4] ss:$8 sps:$4 sm:$0xff]  }
 0x677   :  { %v3924_v25 = vpack.c.bf16 %v3882_v55, %v3880_v15  ;;  %v7052_v55 = vld [vmem:[%s8845_s5 + $0xf0] ss:$8 sps:$4 sm:$0xff]   ;;  %4665 = vmatprep.subr.bf16.mxu0 %v7054_v13 }
 0x678   :  { %v3925_v27 = vpack.c.bf16 %v3883_v18, %v3881_v56  ;;  %v3791_v20 = vpop.f32.mrb[12].mxu0  ;;  %4666 = vmatpush1.bf16.msra.mxu0 %v7052_v55 }
 0x679   :  { %v3792_v24 = vadd.f32 %v3791_v20, %v7969_v63  ;;  %v3793_v30 = vpop.f32.mrb[13].mxu0 }
 0x67a   :  { %v3794_v35 = vadd.f32 %v3793_v30, %v7972_v1  ;;  %v3795_v38 = vpop.f32.mrb[14].mxu0  ;;  %4274 = vmatprep.mubr.bf16.mxu1 %v3925_v27 }
 0x67b   :  { %v3796_v0 = vadd.f32 %v3795_v38, %v7969_v63  ;;  %v3797_v7 = vpop.f32.mrb[15].mxu0  ;;  %4275 = vmatmul.mubr.bf16.gmra.mrb[232].mxu1 %v3924_v25  ;;  %v3884_v45 = vmax.f32 %v3792_v24, 0.0 }
 0x67c   :  { %v3798_v40 = vadd.f32 %v3797_v7, %v7972_v1  ;;  %v3885_v42 = vmax.f32 %v3794_v35, 0.0 }
 0x67d   :  { %v3886_v48 = vmax.f32 %v3796_v0, 0.0 }
 0x67e   :  { %v3887_v44 = vmax.f32 %v3798_v40, 0.0 }
 0x67f   :  { %v3926_v53 = vpack.c.bf16 %v3886_v48, %v3884_v45 }
 0x680   :  { %v3927_v32 = vpack.c.bf16 %v3887_v44, %v3885_v42  ;;  %v3801_v50 = vpop.f32.mrb[16].mxu0 }
 0x681   :  { %v3802_v57 = vadd.f32 %v3801_v50, %v7969_v63  ;;  %v3803_v58 = vpop.f32.mrb[17].mxu0 }
 0x682   :  { %v3804_v61 = vadd.f32 %v3803_v58, %v7972_v1  ;;  %v3805_v4 = vpop.f32.mrb[18].mxu0  ;;  %4284 = vmatprep.mubr.bf16.mxu1 %v3927_v32 }
 0x683   :  { %v3806_v5 = vadd.f32 %v3805_v4, %v7969_v63  ;;  %v3807_v9 = vpop.f32.mrb[19].mxu0  ;;  %4285 = vmatmul.mubr.bf16.gmra.mrb[236].mxu1 %v3926_v53  ;;  %v3888_v56 = vmax.f32 %v3802_v57, 0.0 }
 0x684   :  { %v3808_v15 = vadd.f32 %v3807_v9, %v7972_v1  ;;  %v3889_v25 = vmax.f32 %v3804_v61, 0.0 }
 0x685   :  { %v3890_v18 = vmax.f32 %v3806_v5, 0.0 }
 0x686   :  { %v3891_v27 = vmax.f32 %v3808_v15, 0.0 }
 0x687   :  { %v3928_v20 = vpack.c.bf16 %v3890_v18, %v3888_v56 }
 0x688   :  { %v3929_v24 = vpack.c.bf16 %v3891_v27, %v3889_v25  ;;  %v3811_v30 = vpop.f32.mrb[20].mxu0 }
 0x689   :  { %v3812_v35 = vadd.f32 %v3811_v30, %v7969_v63  ;;  %v3813_v38 = vpop.f32.mrb[21].mxu0 }
 0x68a   :  { %v3814_v0 = vadd.f32 %v3813_v38, %v7972_v1  ;;  %v3815_v7 = vpop.f32.mrb[22].mxu0  ;;  %4294 = vmatprep.mubr.bf16.mxu1 %v3929_v24 }
 0x68b   :  { %v3816_v40 = vadd.f32 %v3815_v7, %v7969_v63  ;;  %v3817_v45 = vpop.f32.mrb[23].mxu0  ;;  %4295 = vmatmul.mubr.bf16.gmra.mrb[240].mxu1 %v3928_v20  ;;  %v3892_v42 = vmax.f32 %v3812_v35, 0.0 }
 0x68c   :  { %v3818_v48 = vadd.f32 %v3817_v45, %v7972_v1  ;;  %v3893_v53 = vmax.f32 %v3814_v0, 0.0 }
 0x68d   :  { %v3894_v44 = vmax.f32 %v3816_v40, 0.0 }
 0x68e   :  { %v3895_v32 = vmax.f32 %v3818_v48, 0.0 }
 0x68f   :  { %v3930_v50 = vpack.c.bf16 %v3894_v44, %v3892_v42 }
 0x690   :  { %v3931_v57 = vpack.c.bf16 %v3895_v32, %v3893_v53  ;;  %v3821_v58 = vpop.f32.mrb[24].mxu0 }
 0x691   :  { %v3822_v61 = vadd.f32 %v3821_v58, %v7969_v63  ;;  %v3823_v4 = vpop.f32.mrb[25].mxu0  ;;  %v7055_v58 = vld [vmem:[%s8847_s7 + $0x40] sm:$0xff]  }
 0x692   :  { %v3824_v5 = vadd.f32 %v3823_v4, %v7972_v1  ;;  %v3825_v9 = vpop.f32.mrb[26].mxu0  ;;  %4304 = vmatprep.mubr.bf16.mxu1 %v3931_v57  ;;  %6203 = vmatprep.subr.bf16.mxu1 %v7055_v58  ;;  %v7064_v4 = vld [vmem:[%s8847_s7 + $0x8] sm:$0xff]  }
 0x693   :  { %v3826_v13 = vadd.f32 %v3825_v9, %v7969_v63  ;;  %v3827_v15 = vpop.f32.mrb[27].mxu0  ;;  %4305 = vmatmul.mubr.bf16.gmra.mrb[244].mxu1 %v3930_v50  ;;  %v3896_v56 = vmax.f32 %v3822_v61, 0.0  ;;  %v7063_v61 = vld [vmem:[%s8847_s7 + $0x48] sm:$0xff]  }
 0x694   :  { %v3828_v55 = vadd.f32 %v3827_v15, %v7972_v1  ;;  %v3897_v25 = vmax.f32 %v3824_v5, 0.0  ;;  %v6079_v5 = vld [vmem:[%s8844_s4 + $0xc] sm:$0x3] }
 0x695   :  { %v3898_v18 = vmax.f32 %v3826_v13, 0.0  ;;  %v8135_v9 = vrot.slane %v6079_v5, %v7441_v14  ;;  %v8138_v13 = vrot.slane %v6079_v5, %v7446_v29 }
 0x696   :  { %v3899_v27 = vmax.f32 %v3828_v55, 0.0 }
 0x697   :  { %v3932_v20 = vpack.c.bf16 %v3898_v18, %v3896_v56 }
 0x698   :  { %v3933_v24 = vpack.c.bf16 %v3899_v27, %v3897_v25  ;;  %v3831_v30 = vpop.f32.mrb[28].mxu0 }
 0x699   :  { %v3832_v35 = vadd.f32 %v3831_v30, %v7969_v63  ;;  %v3833_v38 = vpop.f32.mrb[29].mxu0  ;;  %v7073_v30 = vld [vmem:[%s8847_s7 + $0x50] sm:$0xff]  }
 0x69a   :  { %v3834_v0 = vadd.f32 %v3833_v38, %v7972_v1  ;;  %v3835_v7 = vpop.f32.mrb[30].mxu0  ;;  %4314 = vmatprep.mubr.bf16.mxu1 %v3933_v24 }
 0x69b   :  { %v3836_v40 = vadd.f32 %v3835_v7, %v7969_v63  ;;  %v3837_v45 = vpop.f32.mrb[31].mxu0  ;;  %4315 = vmatmul.mubr.bf16.gmra.mrb[248].mxu1 %v3932_v20  ;;  %v3900_v42 = vmax.f32 %v3832_v35, 0.0  ;;  %v7056_v63 = vld [vmem:[%s8847_s7] sm:$0xff]   ;;  %v7074_v35 = vld [vmem:[%s8847_s7 + $0x10] sm:$0xff]  }
 0x69c   :  { %v3838_v48 = vadd.f32 %v3837_v45, %v7972_v1  ;;  %v3901_v53 = vmax.f32 %v3834_v0, 0.0  ;;  %v7057_v1 = vld [vmem:[%s8850_s10 + $0x40] sm:$0xff]   ;;  %6204 = vmatpush3.bf16.msra.mxu1 %v7056_v63 }
 0x69d   :  { %v3902_v44 = vmax.f32 %v3836_v40, 0.0  ;;  %6315 = vmatprep.subr.bf16.mxu0 %v7057_v1  ;;  %6205 = vmatprep.subr.bf16.mxu1 %v7063_v61 }
 0x69e   :  { %v3903_v32 = vmax.f32 %v3838_v48, 0.0 }
 0x69f   :  { %v3934_v50 = vpack.c.bf16 %v3902_v44, %v3900_v42  ;;  %v7058_v44 = vld [vmem:[%s8850_s10] sm:$0xff]  }
 0x6a0   :  { %v3935_v57 = vpack.c.bf16 %v3903_v32, %v3901_v53  ;;  %6206 = vmatpush3.bf16.msra.mxu1 %v7064_v4  ;;  %v7060_v4 = vld [vmem:[%s8850_s10 + $0x8] sm:$0xff]  }
 0x6a1   :  { %6207 = vmatprep.subr.bf16.mxu1 %v7073_v30 }
 0x6a2   :  { %4324 = vmatprep.mubr.bf16.mxu1 %v3935_v57 }
 0x6a3   :  { %4325 = vmatmul.mubr.bf16.gmra.mrb[252].mxu1 %v3934_v50  ;;  %v7059_v50 = vld [vmem:[%s8850_s10 + $0x48] sm:$0xff]  }
 0x6a4   :  { %6208 = vmatpush3.bf16.msra.mxu1 %v7074_v35 }
 0x6fe   :  { %v4176_v15 = vpop.f32.mrb[192].mxu1 }
 0x6ff   :  { %v4177_v55 = vadd.f32 %v4176_v15, %v8135_v9  ;;  %v4178_v56 = vpop.f32.mrb[193].mxu1 }
 0x700   :  { %v4179_v18 = vadd.f32 %v4178_v56, %v8138_v13  ;;  %v4180_v25 = vpop.f32.mrb[194].mxu1 }
 0x701   :  { %v4181_v27 = vadd.f32 %v4180_v25, %v8135_v9  ;;  %v4182_v20 = vpop.f32.mrb[195].mxu1  ;;  %v4335_v38 = vmax.f32 %v4177_v55, 0.0  ;;  %v7061_v55 = vld [vmem:[%s8850_s10 + $0x50] sm:$0xff]  }
 0x702   :  { %v4183_v24 = vadd.f32 %v4182_v20, %v8138_v13  ;;  %v4336_v7 = vmax.f32 %v4179_v18, 0.0 }
 0x703   :  { %v4337_v0 = vmax.f32 %v4181_v27, 0.0 }
 0x704   :  { %v4338_v40 = vmax.f32 %v4183_v24, 0.0  ;;  %v7062_v24 = vld [vmem:[%s8850_s10 + $0x10] sm:$0xff]  }
 0x705   :  { %v8150_v45 = vpack.c.bf16 %v4337_v0, %v4335_v38  ;;  %v7065_v38 = vld [vmem:[%s8850_s10 + $0x58] sm:$0xff]  }
 0x706   :  { %v8152_v48 = vpack.c.bf16 %v4338_v40, %v4336_v7  ;;  %v4186_v42 = vpop.f32.mrb[196].mxu1 }
 0x707   :  { %v4187_v53 = vadd.f32 %v4186_v42, %v8135_v9  ;;  %v4188_v32 = vpop.f32.mrb[197].mxu1 }
 0x708   :  { %v4189_v57 = vadd.f32 %v4188_v32, %v8138_v13  ;;  %v4190_v58 = vpop.f32.mrb[198].mxu1  ;;  %4667 = vmatprep.mubr.bf16.mxu0 %v8152_v48  ;;  %v7077_v32 = vld [vmem:[%s8847_s7 + $0x58] sm:$0xff]  }
 0x709   :  { %v4191_v63 = vadd.f32 %v4190_v58, %v8135_v9  ;;  %v4192_v1 = vpop.f32.mrb[199].mxu1  ;;  %4668 = vmatmul.mubr.bf16.vlgmr.msra.gmra.mrb[32].mxu0 %v8150_v45  ;;  %v4339_v5 = vmax.f32 %v4187_v53, 0.0  ;;  %v7066_v53 = vld [vmem:[%s8850_s10 + $0x18] sm:$0xff]   ;;  %6209 = vmatprep.subr.bf16.mxu1 %v7077_v32 }
 0x70a   :  { %v4193_v61 = vadd.f32 %v4192_v1, %v8138_v13  ;;  %6316 = vmatpush3.bf16.msra.mxu0 %v7058_v44  ;;  %v4340_v56 = vmax.f32 %v4189_v57, 0.0 }
 0x70b   :  { %v4341_v15 = vmax.f32 %v4191_v63, 0.0  ;;  %6317 = vmatprep.subr.bf16.mxu0 %v7059_v50  ;;  %v7078_v50 = vld [vmem:[%s8847_s7 + $0x18] sm:$0xff]   ;;  %v7067_v63 = vld [vmem:[%s8850_s10 + $0x60] sm:$0xff]  }
 0x70c   :  { %v4342_v18 = vmax.f32 %v4193_v61, 0.0  ;;  %6210 = vmatpush3.bf16.msra.mxu1 %v7078_v50 }
 0x70d   :  { %v8172_v25 = vpack.c.bf16 %v4341_v15, %v4339_v5 }
 0x70e   :  { %v8174_v27 = vpack.c.bf16 %v4342_v18, %v4340_v56  ;;  %v4196_v20 = vpop.f32.mrb[200].mxu1  ;;  %6318 = vmatpush3.bf16.msra.mxu0 %v7060_v4 }
 0x70f   :  { %v4197_v30 = vadd.f32 %v4196_v20, %v8135_v9  ;;  %v4198_v35 = vpop.f32.mrb[201].mxu1  ;;  %6319 = vmatprep.subr.bf16.mxu0 %v7061_v55  ;;  %v7068_v55 = vld [vmem:[%s8850_s10 + $0x20] sm:$0xff]   ;;  %v7069_v20 = vld [vmem:[%s8850_s10 + $0x68] sm:$0xff]  }
 0x710   :  { %v4199_v0 = vadd.f32 %v4198_v35, %v8138_v13  ;;  %v4200_v7 = vpop.f32.mrb[202].mxu1  ;;  %4677 = vmatprep.mubr.bf16.mxu0 %v8174_v27 }
 0x711   :  { %v4201_v40 = vadd.f32 %v4200_v7, %v8135_v9  ;;  %v4202_v42 = vpop.f32.mrb[203].mxu1  ;;  %4678 = vmatmul.mubr.bf16.gmra.mrb[36].mxu0 %v8172_v25  ;;  %v4343_v57 = vmax.f32 %v4197_v30, 0.0  ;;  %v7070_v7 = vld [vmem:[%s8850_s10 + $0x28] sm:$0xff]  }
 0x712   :  { %v4203_v44 = vadd.f32 %v4202_v42, %v8138_v13  ;;  %6320 = vmatpush3.bf16.msra.mxu0 %v7062_v24  ;;  %v4344_v1 = vmax.f32 %v4199_v0, 0.0 }
 0x713   :  { %v4345_v58 = vmax.f32 %v4201_v40, 0.0  ;;  %6321 = vmatprep.subr.bf16.mxu0 %v7065_v38 }
 0x714   :  { %v4346_v61 = vmax.f32 %v4203_v44, 0.0  ;;  %v7071_v44 = vld [vmem:[%s8850_s10 + $0x70] sm:$0xff]  }
 0x715   :  { %v8200_v4 = vpack.c.bf16 %v4345_v58, %v4343_v57 }
 0x716   :  { %v8202_v5 = vpack.c.bf16 %v4346_v61, %v4344_v1  ;;  %v4206_v15 = vpop.f32.mrb[204].mxu1  ;;  %6322 = vmatpush3.bf16.msra.mxu0 %v7066_v53 }
 0x717   :  { %v4207_v56 = vadd.f32 %v4206_v15, %v8135_v9  ;;  %v4208_v18 = vpop.f32.mrb[205].mxu1  ;;  %6323 = vmatprep.subr.bf16.mxu0 %v7067_v63  ;;  %v7072_v63 = vld [vmem:[%s8850_s10 + $0x30] sm:$0xff]   ;;  %v7075_v15 = vld [vmem:[%s8850_s10 + $0x78] sm:$0xff]  }
 0x718   :  { %v4209_v24 = vadd.f32 %v4208_v18, %v8138_v13  ;;  %v4210_v30 = vpop.f32.mrb[206].mxu1  ;;  %4687 = vmatprep.mubr.bf16.mxu0 %v8202_v5 }
 0x719   :  { %v4211_v35 = vadd.f32 %v4210_v30, %v8135_v9  ;;  %v4212_v38 = vpop.f32.mrb[207].mxu1  ;;  %4688 = vmatmul.mubr.bf16.gmra.mrb[40].mxu0 %v8200_v4  ;;  %v4347_v40 = vmax.f32 %v4207_v56, 0.0  ;;  %v7076_v30 = vld [vmem:[%s8850_s10 + $0x38] sm:$0xff]  }
 0x71a   :  { %v4213_v0 = vadd.f32 %v4212_v38, %v8138_v13  ;;  %6324 = vmatpush3.bf16.msra.mxu0 %v7068_v55  ;;  %v4348_v53 = vmax.f32 %v4209_v24, 0.0  ;;  %v7080_v38 = vld [vmem:[%s8847_s7 + $0x20] sm:$0xff]  }
 0x71b   :  { %v4349_v42 = vmax.f32 %v4211_v35, 0.0  ;;  %6325 = vmatprep.subr.bf16.mxu0 %v7069_v20  ;;  %v7079_v35 = vld [vmem:[%s8847_s7 + $0x60] sm:$0xff]  }
 0x71c   :  { %v4350_v32 = vmax.f32 %v4213_v0, 0.0  ;;  %6211 = vmatprep.subr.bf16.mxu1 %v7079_v35 }
 0x71d   :  { %v8222_v50 = vpack.c.bf16 %v4349_v42, %v4347_v40  ;;  %6212 = vmatpush3.bf16.msra.mxu1 %v7080_v38 }
 0x71e   :  { %v8224_v57 = vpack.c.bf16 %v4350_v32, %v4348_v53  ;;  %v4216_v58 = vpop.f32.mrb[208].mxu1  ;;  %6326 = vmatpush3.bf16.msra.mxu0 %v7070_v7 }
 0x71f   :  { %v4217_v1 = vadd.f32 %v4216_v58, %v8135_v9  ;;  %v4218_v61 = vpop.f32.mrb[209].mxu1  ;;  %6327 = vmatprep.subr.bf16.mxu0 %v7071_v44 }
 0x720   :  { %v4219_v55 = vadd.f32 %v4218_v61, %v8138_v13  ;;  %v4220_v56 = vpop.f32.mrb[210].mxu1  ;;  %4697 = vmatprep.mubr.bf16.mxu0 %v8224_v57 }
 0x721   :  { %v4221_v18 = vadd.f32 %v4220_v56, %v8135_v9  ;;  %v4222_v20 = vpop.f32.mrb[211].mxu1  ;;  %4698 = vmatmul.mubr.bf16.gmra.mrb[44].mxu0 %v8222_v50  ;;  %v4351_v0 = vmax.f32 %v4217_v1, 0.0 }
 0x722   :  { %v4223_v24 = vadd.f32 %v4222_v20, %v8138_v13  ;;  %6328 = vmatpush3.bf16.msra.mxu0 %v7072_v63  ;;  %v4352_v40 = vmax.f32 %v4219_v55, 0.0 }
 0x723   :  { %v4353_v7 = vmax.f32 %v4221_v18, 0.0  ;;  %6329 = vmatprep.subr.bf16.mxu0 %v7075_v15 }
 0x724   :  { %v4354_v42 = vmax.f32 %v4223_v24, 0.0 }
 0x725   :  { %v8247_v44 = vpack.c.bf16 %v4353_v7, %v4351_v0 }
 0x726   :  { %v8249_v53 = vpack.c.bf16 %v4354_v42, %v4352_v40  ;;  %v4226_v32 = vpop.f32.mrb[212].mxu1  ;;  %6330 = vmatpush3.bf16.msra.mxu0 %v7076_v30 }
 0x727   :  { %v4227_v58 = vadd.f32 %v4226_v32, %v8135_v9  ;;  %v4228_v63 = vpop.f32.mrb[213].mxu1 }
 0x728   :  { %v4229_v61 = vadd.f32 %v4228_v63, %v8138_v13  ;;  %v4230_v56 = vpop.f32.mrb[214].mxu1  ;;  %4707 = vmatprep.mubr.bf16.mxu0 %v8249_v53 }
 0x729   :  { %v4231_v1 = vadd.f32 %v4230_v56, %v8135_v9  ;;  %v4232_v15 = vpop.f32.mrb[215].mxu1  ;;  %4708 = vmatmul.mubr.bf16.gmra.mrb[48].mxu0 %v8247_v44  ;;  %v4355_v18 = vmax.f32 %v4227_v58, 0.0 }
 0x72a   :  { %v4233_v55 = vadd.f32 %v4232_v15, %v8138_v13  ;;  %v4356_v24 = vmax.f32 %v4229_v61, 0.0  ;;  %v7081_v61 = vld [vmem:[%s8847_s7 + $0x68] sm:$0xff]  }
 0x72b   :  { %v4357_v20 = vmax.f32 %v4231_v1, 0.0  ;;  %v7082_v1 = vld [vmem:[%s8847_s7 + $0x28] sm:$0xff]   ;;  %6213 = vmatprep.subr.bf16.mxu1 %v7081_v61 }
 0x72c   :  { %v4358_v35 = vmax.f32 %v4233_v55, 0.0  ;;  %6214 = vmatpush3.bf16.msra.mxu1 %v7082_v1 }
 0x72d   :  { %v8257_v30 = vpack.c.bf16 %v4357_v20, %v4355_v18 }
 0x72e   :  { %v8259_v38 = vpack.c.bf16 %v4358_v35, %v4356_v24  ;;  %v4236_v0 = vpop.f32.mrb[216].mxu1 }
 0x72f   :  { %v4237_v7 = vadd.f32 %v4236_v0, %v8135_v9  ;;  %v4238_v40 = vpop.f32.mrb[217].mxu1 }
 0x730   :  { %v4239_v42 = vadd.f32 %v4238_v40, %v8138_v13  ;;  %v4240_v32 = vpop.f32.mrb[218].mxu1  ;;  %4717 = vmatprep.mubr.bf16.mxu0 %v8259_v38 }
 0x731   :  { %v4241_v63 = vadd.f32 %v4240_v32, %v8135_v9  ;;  %v4242_v56 = vpop.f32.mrb[219].mxu1  ;;  %4718 = vmatmul.mubr.bf16.gmra.mrb[52].mxu0 %v8257_v30  ;;  %v4359_v15 = vmax.f32 %v4237_v7, 0.0 }
 0x732   :  { %v4243_v58 = vadd.f32 %v4242_v56, %v8138_v13  ;;  %v4360_v18 = vmax.f32 %v4239_v42, 0.0 }
 0x733   :  { %v4361_v55 = vmax.f32 %v4241_v63, 0.0 }
 0x734   :  { %v4362_v20 = vmax.f32 %v4243_v58, 0.0 }
 0x735   :  { %v8273_v24 = vpack.c.bf16 %v4361_v55, %v4359_v15 }
 0x736   :  { %v8275_v35 = vpack.c.bf16 %v4362_v20, %v4360_v18  ;;  %v4246_v0 = vpop.f32.mrb[220].mxu1 }
 0x737   :  { %v4247_v40 = vadd.f32 %v4246_v0, %v8135_v9  ;;  %v4248_v32 = vpop.f32.mrb[221].mxu1 }
 0x738   :  { %v4249_v56 = vadd.f32 %v4248_v32, %v8138_v13  ;;  %v4250_v3 = vpop.f32.mrb[222].mxu1  ;;  %4727 = vmatprep.mubr.bf16.mxu0 %v8275_v35 }
 0x739   :  { %v4251_v7 = vadd.f32 %v4250_v3, %v8135_v9  ;;  %v4252_v63 = vpop.f32.mrb[223].mxu1  ;;  %4728 = vmatmul.mubr.bf16.gmra.mrb[56].mxu0 %v8273_v24  ;;  %v4363_v58 = vmax.f32 %v4247_v40, 0.0 }
 0x73a   :  { %v4253_v42 = vadd.f32 %v4252_v63, %v8138_v13  ;;  %v4364_v1 = vmax.f32 %v4249_v56, 0.0  ;;  %v7083_v56 = vld [vmem:[%s8847_s7 + $0x70] sm:$0xff]  }
 0x73b   :  { %v4365_v61 = vmax.f32 %v4251_v7, 0.0  ;;  %v7084_v7 = vld [vmem:[%s8847_s7 + $0x30] sm:$0xff]   ;;  %6215 = vmatprep.subr.bf16.mxu1 %v7083_v56 }
 0x73c   :  { %v4366_v15 = vmax.f32 %v4253_v42, 0.0  ;;  %6216 = vmatpush3.bf16.msra.mxu1 %v7084_v7 }
 0x73d   :  { %v8283_v55 = vpack.c.bf16 %v4365_v61, %v4363_v58 }
 0x73e   :  { %v8285_v18 = vpack.c.bf16 %v4366_v15, %v4364_v1  ;;  %v4256_v20 = vpop.f32.mrb[224].mxu1 }
 0x73f   :  { %v4257_v0 = vadd.f32 %v4256_v20, %v8135_v9  ;;  %v4258_v32 = vpop.f32.mrb[225].mxu1 }
 0x740   :  { %v4259_v33 = vadd.f32 %v4258_v32, %v8138_v13  ;;  %v4260_v3 = vpop.f32.mrb[226].mxu1  ;;  %4737 = vmatprep.mubr.bf16.mxu0 %v8285_v18 }
 0x741   :  { %v4261_v10 = vadd.f32 %v4260_v3, %v8135_v9  ;;  %v4262_v63 = vpop.f32.mrb[227].mxu1  ;;  %4738 = vmatmul.mubr.bf16.gmra.mrb[60].mxu0 %v8283_v55  ;;  %v4367_v42 = vmax.f32 %v4257_v0, 0.0 }
 0x742   :  { %v4263_v40 = vadd.f32 %v4262_v63, %v8138_v13  ;;  %v4368_v61 = vmax.f32 %v4259_v33, 0.0 }
 0x743   :  { %v4369_v58 = vmax.f32 %v4261_v10, 0.0 }
 0x744   :  { %v4370_v1 = vmax.f32 %v4263_v40, 0.0 }
 0x745   :  { %v8299_v15 = vpack.c.bf16 %v4369_v58, %v4367_v42 }
 0x746   :  { %v8301_v20 = vpack.c.bf16 %v4370_v1, %v4368_v61  ;;  %v4266_v32 = vpop.f32.mrb[228].mxu1 }
 0x747   :  { %v4267_v3 = vadd.f32 %v4266_v32, %v8135_v9  ;;  %v4268_v63 = vpop.f32.mrb[229].mxu1 }
 0x748   :  { %v4269_v59 = vadd.f32 %v4268_v63, %v8138_v13  ;;  %v4270_v47 = vpop.f32.mrb[230].mxu1  ;;  %4747 = vmatprep.mubr.bf16.mxu0 %v8301_v20 }
 0x749   :  { %v4271_v0 = vadd.f32 %v4270_v47, %v8135_v9  ;;  %v4272_v10 = vpop.f32.mrb[231].mxu1  ;;  %4748 = vmatmul.mubr.bf16.gmra.mrb[64].mxu0 %v8299_v15  ;;  %v4371_v40 = vmax.f32 %v4267_v3, 0.0  ;;  %v7085_v3 = vld [vmem:[%s8847_s7 + $0x78] sm:$0xff]  }
 0x74a   :  { %v4273_v33 = vadd.f32 %v4272_v10, %v8138_v13  ;;  %v4372_v7 = vmax.f32 %v4269_v59, 0.0  ;;  %6217 = vmatprep.subr.bf16.mxu1 %v7085_v3 }
 0x74b   :  { %v4373_v56 = vmax.f32 %v4271_v0, 0.0  ;;  %v7086_v0 = vld [vmem:[%s8847_s7 + $0x38] sm:$0xff]  }
 0x74c   :  { %v4374_v42 = vmax.f32 %v4273_v33, 0.0  ;;  %6218 = vmatpush3.bf16.msra.mxu1 %v7086_v0 }
 0x74d   :  { %v8309_v58 = vpack.c.bf16 %v4373_v56, %v4371_v40 }
 0x74e   :  { %v8311_v61 = vpack.c.bf16 %v4374_v42, %v4372_v7  ;;  %v4276_v1 = vpop.f32.mrb[232].mxu1 }
 0x74f   :  { %v4277_v32 = vadd.f32 %v4276_v1, %v8135_v9  ;;  %v4278_v63 = vpop.f32.mrb[233].mxu1 }
 0x750   :  { %v4279_v37 = vadd.f32 %v4278_v63, %v8138_v13  ;;  %v4280_v47 = vpop.f32.mrb[234].mxu1  ;;  %4757 = vmatprep.mubr.bf16.mxu0 %v8311_v61 }
 0x751   :  { %v4281_v51 = vadd.f32 %v4280_v47, %v8135_v9  ;;  %v4282_v10 = vpop.f32.mrb[235].mxu1  ;;  %4758 = vmatmul.mubr.bf16.gmra.mrb[68].mxu0 %v8309_v58  ;;  %v4375_v33 = vmax.f32 %v4277_v32, 0.0 }
 0x752   :  { %v4283_v59 = vadd.f32 %v4282_v10, %v8138_v13  ;;  %v4376_v56 = vmax.f32 %v4279_v37, 0.0 }
 0x753   :  { %v4377_v40 = vmax.f32 %v4281_v51, 0.0 }
 0x754   :  { %v4378_v7 = vmax.f32 %v4283_v59, 0.0 }
 0x755   :  { %v8325_v42 = vpack.c.bf16 %v4377_v40, %v4375_v33 }
 0x756   :  { %v8327_v1 = vpack.c.bf16 %v4378_v7, %v4376_v56  ;;  %v4286_v63 = vpop.f32.mrb[236].mxu1 }
 0x757   :  { %v4287_v47 = vadd.f32 %v4286_v63, %v8135_v9  ;;  %v4288_v10 = vpop.f32.mrb[237].mxu1 }
 0x758   :  { %v4289_v41 = vadd.f32 %v4288_v10, %v8138_v13  ;;  %v4290_v28 = vpop.f32.mrb[238].mxu1  ;;  %4767 = vmatprep.mubr.bf16.mxu0 %v8327_v1 }
 0x759   :  { %v4291_v32 = vadd.f32 %v4290_v28, %v8135_v9  ;;  %v4292_v51 = vpop.f32.mrb[239].mxu1  ;;  %4768 = vmatmul.mubr.bf16.gmra.mrb[72].mxu0 %v8325_v42  ;;  %v4379_v59 = vmax.f32 %v4287_v47, 0.0 }
 0x75a   :  { %v4293_v37 = vadd.f32 %v4292_v51, %v8138_v13  ;;  %v4380_v0 = vmax.f32 %v4289_v41, 0.0 }
 0x75b   :  { %v4381_v3 = vmax.f32 %v4291_v32, 0.0 }
 0x75c   :  { %v4382_v33 = vmax.f32 %v4293_v37, 0.0 }
 0x75d   :  { %v8335_v40 = vpack.c.bf16 %v4381_v3, %v4379_v59 }
 0x75e   :  { %v8337_v56 = vpack.c.bf16 %v4382_v33, %v4380_v0  ;;  %v4296_v7 = vpop.f32.mrb[240].mxu1 }
 0x75f   :  { %v4297_v63 = vadd.f32 %v4296_v7, %v8135_v9  ;;  %v4298_v10 = vpop.f32.mrb[241].mxu1 }
 0x760   :  { %v4299_v17 = vadd.f32 %v4298_v10, %v8138_v13  ;;  %v4300_v28 = vpop.f32.mrb[242].mxu1  ;;  %4777 = vmatprep.mubr.bf16.mxu0 %v8337_v56 }
 0x761   :  { %v4301_v22 = vadd.f32 %v4300_v28, %v8135_v9  ;;  %v4302_v51 = vpop.f32.mrb[243].mxu1  ;;  %4778 = vmatmul.mubr.bf16.gmra.mrb[76].mxu0 %v8335_v40  ;;  %v4383_v47 = vmax.f32 %v4297_v63, 0.0 }
 0x762   :  { %v4303_v41 = vadd.f32 %v4302_v51, %v8138_v13  ;;  %v4384_v37 = vmax.f32 %v4299_v17, 0.0 }
 0x763   :  { %v4385_v32 = vmax.f32 %v4301_v22, 0.0 }
 0x764   :  { %v4386_v59 = vmax.f32 %v4303_v41, 0.0 }
 0x765   :  { %v8345_v3 = vpack.c.bf16 %v4385_v32, %v4383_v47 }
 0x766   :  { %v8347_v0 = vpack.c.bf16 %v4386_v59, %v4384_v37  ;;  %v4306_v33 = vpop.f32.mrb[244].mxu1 }
 0x767   :  { %v4307_v7 = vadd.f32 %v4306_v33, %v8135_v9  ;;  %v4308_v10 = vpop.f32.mrb[245].mxu1 }
 0x768   :  { %v4309_v21 = vadd.f32 %v4308_v10, %v8138_v13  ;;  %v4310_v28 = vpop.f32.mrb[246].mxu1  ;;  %4787 = vmatprep.mubr.bf16.mxu0 %v8347_v0 }
 0x769   :  { %v4311_v6 = vadd.f32 %v4310_v28, %v8135_v9  ;;  %v4312_v51 = vpop.f32.mrb[247].mxu1  ;;  %4788 = vmatmul.mubr.bf16.gmra.mrb[80].mxu0 %v8345_v3  ;;  %v4387_v22 = vmax.f32 %v4307_v7, 0.0 }
 0x76a   :  { %v4313_v17 = vadd.f32 %v4312_v51, %v8138_v13  ;;  %v4388_v41 = vmax.f32 %v4309_v21, 0.0 }
 0x76b   :  { %v4389_v63 = vmax.f32 %v4311_v6, 0.0 }
 0x76c   :  { %v4390_v47 = vmax.f32 %v4313_v17, 0.0 }
 0x76d   :  { %v8355_v32 = vpack.c.bf16 %v4389_v63, %v4387_v22 }
 0x76e   :  { %v8357_v37 = vpack.c.bf16 %v4390_v47, %v4388_v41  ;;  %v4316_v59 = vpop.f32.mrb[248].mxu1 }
 0x76f   :  { %v4317_v33 = vadd.f32 %v4316_v59, %v8135_v9  ;;  %v4318_v10 = vpop.f32.mrb[249].mxu1 }
 0x770   :  { %v4319_v62 = vadd.f32 %v4318_v10, %v8138_v13  ;;  %v4320_v28 = vpop.f32.mrb[250].mxu1  ;;  %4797 = vmatprep.mubr.bf16.mxu0 %v8357_v37 }
 0x771   :  { %v4321_v12 = vadd.f32 %v4320_v28, %v8135_v9  ;;  %v4322_v51 = vpop.f32.mrb[251].mxu1  ;;  %4798 = vmatmul.mubr.bf16.gmra.mrb[84].mxu0 %v8355_v32  ;;  %v4391_v21 = vmax.f32 %v4317_v33, 0.0 }
 0x772   :  { %v4323_v6 = vadd.f32 %v4322_v51, %v8138_v13  ;;  %v4392_v17 = vmax.f32 %v4319_v62, 0.0 }
 0x773   :  { %v4393_v7 = vmax.f32 %v4321_v12, 0.0 }
 0x774   :  { %v4394_v22 = vmax.f32 %v4323_v6, 0.0 }
 0x775   :  { %v8365_v63 = vpack.c.bf16 %v4393_v7, %v4391_v21 }
 0x776   :  { %v8367_v41 = vpack.c.bf16 %v4394_v22, %v4392_v17  ;;  %v4326_v47 = vpop.f32.mrb[252].mxu1 }
 0x777   :  { %v4327_v59 = vadd.f32 %v4326_v47, %v8135_v9  ;;  %v4328_v10 = vpop.f32.mrb[253].mxu1 }
 0x778   :  { %v4329_v2 = vadd.f32 %v4328_v10, %v8138_v13  ;;  %v4330_v28 = vpop.f32.mrb[254].mxu1  ;;  %4807 = vmatprep.mubr.bf16.mxu0 %v8367_v41 }
 0x779   :  { %v4331_v54 = vadd.f32 %v4330_v28, %v8135_v9  ;;  %v4332_v51 = vpop.f32.mrb[255].mxu1  ;;  %4808 = vmatmul.mubr.bf16.gmra.mrb[88].mxu0 %v8365_v63  ;;  %v4395_v12 = vmax.f32 %v4327_v59, 0.0 }
 0x77a   :  { %v4333_v62 = vadd.f32 %v4332_v51, %v8138_v13  ;;  %v4396_v6 = vmax.f32 %v4329_v2, 0.0 }
 0x77b   :  { %v4397_v33 = vmax.f32 %v4331_v54, 0.0  ;;  %v4463_v54 = vld [vmem:[%s8846_s6] sm:$0x3] }
 0x77c   :  { %v4398_v21 = vmax.f32 %v4333_v62, 0.0  ;;  %v8408_v2 = vrot.slane %v4463_v54, %v7441_v14  ;;  %v8411_v13 = vrot.slane %v4463_v54, %v7446_v29 }
 0x77d   :  { %v8375_v7 = vpack.c.bf16 %v4397_v33, %v4395_v12 }
 0x77e   :  { %v8377_v17 = vpack.c.bf16 %v4398_v21, %v4396_v6 }
 0x780   :  { %4817 = vmatprep.mubr.bf16.mxu0 %v8377_v17 }
 0x781   :  { %4818 = vmatmul.mubr.bf16.gmra.mrb[92].mxu0 %v8375_v7 }
 0x782   :  { %5412 = vmatprep.mubr.bf16.mxu0 %v8152_v48 }
 0x789   :  { %5413 = vmatmul.mubr.bf16.vlgmr.msra.gmra.mrb[96].mxu0 %v8150_v45 }
 0x78a   :  { %5420 = vmatprep.mubr.bf16.mxu0 %v8174_v27 }
 0x791   :  { %5421 = vmatmul.mubr.bf16.gmra.mrb[100].mxu0 %v8172_v25 }
 0x792   :  { %5428 = vmatprep.mubr.bf16.mxu0 %v8202_v5 }
 0x799   :  { %5429 = vmatmul.mubr.bf16.gmra.mrb[104].mxu0 %v8200_v4 }
 0x79a   :  { %5436 = vmatprep.mubr.bf16.mxu0 %v8224_v57 }
 0x7a1   :  { %5437 = vmatmul.mubr.bf16.gmra.mrb[108].mxu0 %v8222_v50 }
 0x7a2   :  { %5444 = vmatprep.mubr.bf16.mxu0 %v8249_v53 }
 0x7a9   :  { %5445 = vmatmul.mubr.bf16.gmra.mrb[112].mxu0 %v8247_v44 }
 0x7aa   :  { %5452 = vmatprep.mubr.bf16.mxu0 %v8259_v38 }
 0x7b1   :  { %5453 = vmatmul.mubr.bf16.gmra.mrb[116].mxu0 %v8257_v30 }
 0x7b2   :  { %5460 = vmatprep.mubr.bf16.mxu0 %v8275_v35 }
 0x7b9   :  { %5461 = vmatmul.mubr.bf16.gmra.mrb[120].mxu0 %v8273_v24 }
 0x7ba   :  { %5468 = vmatprep.mubr.bf16.mxu0 %v8285_v18 }
 0x7c1   :  { %5469 = vmatmul.mubr.bf16.gmra.mrb[124].mxu0 %v8283_v55 }
 0x7c2   :  { %5476 = vmatprep.mubr.bf16.mxu0 %v8301_v20 }
 0x7c9   :  { %5477 = vmatmul.mubr.bf16.gmra.mrb[128].mxu0 %v8299_v15 }
 0x7ca   :  { %5484 = vmatprep.mubr.bf16.mxu0 %v8311_v61 }
 0x7d1   :  { %5485 = vmatmul.mubr.bf16.gmra.mrb[132].mxu0 %v8309_v58 }
 0x7d2   :  { %5492 = vmatprep.mubr.bf16.mxu0 %v8327_v1 }
 0x7d9   :  { %5493 = vmatmul.mubr.bf16.gmra.mrb[136].mxu0 %v8325_v42 }
 0x7da   :  { %5500 = vmatprep.mubr.bf16.mxu0 %v8337_v56 }
 0x7dc   :  { %v4669_v9 = vpop.f32.mrb[32].mxu0 }
 0x7dd   :  { %v4671_v45 = vpop.f32.mrb[33].mxu0  ;;  %v4670_v25 = vadd.f32 %v4669_v9, %v8408_v2 }
 0x7de   :  { %v4673_v48 = vpop.f32.mrb[34].mxu0  ;;  %v4672_v5 = vadd.f32 %v4671_v45, %v8411_v13 }
 0x7df   :  { %v4674_v27 = vadd.f32 %v4673_v48, %v8408_v2  ;;  %v4675_v4 = vpop.f32.mrb[35].mxu0 }
 0x7e0   :  { %v4676_v50 = vadd.f32 %v4675_v4, %v8411_v13 }
 0x7e1   :  { %v4828_v57 = vpack.c.bf16 %v4674_v27, %v4670_v25  ;;  %5501 = vmatmul.mubr.bf16.gmra.mrb[140].mxu0 %v8335_v40 }
 0x7e2   :  { %v4829_v14 = vpack.c.bf16 %v4676_v50, %v4672_v5  ;;  %5508 = vmatprep.mubr.bf16.mxu0 %v8347_v0  ;;  %v7087_v50 = vld [vmem:[%s8849_s9] sm:$0xff]  }
 0x7e3   :  { %6485 = vmatprep.subr.bf16.mxu1 %v7087_v50 }
 0x7e4   :  { %v4679_v44 = vpop.f32.mrb[36].mxu0  ;;  %5020 = vmatprep.mubr.bf16.mxu1 %v4829_v14 }
 0x7e5   :  { %v4681_v29 = vpop.f32.mrb[37].mxu0  ;;  %5021 = vmatmul.mubr.bf16.vlgmr.msra.gmra.mrb[64].mxu1 %v4828_v57  ;;  %v4680_v30 = vadd.f32 %v4679_v44, %v8408_v2 }
 0x7e6   :  { %v4683_v53 = vpop.f32.mrb[38].mxu0  ;;  %v4682_v35 = vadd.f32 %v4681_v29, %v8411_v13  ;;  %6486 = vmatpush3.bf16.msra.mxu1 %v7087_v50 }
 0x7e7   :  { %v4684_v38 = vadd.f32 %v4683_v53, %v8408_v2  ;;  %v4685_v24 = vpop.f32.mrb[39].mxu0 }
 0x7e8   :  { %v4686_v55 = vadd.f32 %v4685_v24, %v8411_v13 }
 0x7e9   :  { %v4830_v18 = vpack.c.bf16 %v4684_v38, %v4680_v30  ;;  %5509 = vmatmul.mubr.bf16.gmra.mrb[144].mxu0 %v8345_v3 }
 0x7ea   :  { %v4831_v15 = vpack.c.bf16 %v4686_v55, %v4682_v35  ;;  %5516 = vmatprep.mubr.bf16.mxu0 %v8357_v37 }
 0x7ec   :  { %v4689_v20 = vpop.f32.mrb[40].mxu0  ;;  %5028 = vmatprep.mubr.bf16.mxu1 %v4831_v15 }
 0x7ed   :  { %v4691_v58 = vpop.f32.mrb[41].mxu0  ;;  %5029 = vmatmul.mubr.bf16.gmra.mrb[68].mxu1 %v4830_v18  ;;  %v4690_v42 = vadd.f32 %v4689_v20, %v8408_v2 }
 0x7ee   :  { %v4693_v61 = vpop.f32.mrb[42].mxu0  ;;  %v4692_v56 = vadd.f32 %v4691_v58, %v8411_v13 }
 0x7ef   :  { %v4694_v1 = vadd.f32 %v4693_v61, %v8408_v2  ;;  %v4695_v40 = vpop.f32.mrb[43].mxu0 }
 0x7f0   :  { %v4696_v0 = vadd.f32 %v4695_v40, %v8411_v13 }
 0x7f1   :  { %v4832_v22 = vpack.c.bf16 %v4694_v1, %v4690_v42  ;;  %5517 = vmatmul.mubr.bf16.gmra.mrb[148].mxu0 %v8355_v32 }
 0x7f2   :  { %v4833_v3 = vpack.c.bf16 %v4696_v0, %v4692_v56  ;;  %5524 = vmatprep.mubr.bf16.mxu0 %v8367_v41  ;;  %v7088_v0 = vld [vmem:[%s8849_s9 + $0x8] sm:$0xff]  }
 0x7f3   :  { %6487 = vmatprep.subr.bf16.mxu1 %v7088_v0 }
 0x7f4   :  { %v4699_v37 = vpop.f32.mrb[44].mxu0  ;;  %5036 = vmatprep.mubr.bf16.mxu1 %v4833_v3  ;;  %6488 = vmatpush3.bf16.msra.mxu1 %v7088_v0 }
 0x7f5   :  { %v4701_v47 = vpop.f32.mrb[45].mxu0  ;;  %5037 = vmatmul.mubr.bf16.gmra.mrb[72].mxu1 %v4832_v22  ;;  %v4700_v10 = vadd.f32 %v4699_v37, %v8408_v2 }
 0x7f6   :  { %v4703_v59 = vpop.f32.mrb[46].mxu0  ;;  %v4702_v62 = vadd.f32 %v4701_v47, %v8411_v13 }
 0x7f7   :  { %v4704_v28 = vadd.f32 %v4703_v59, %v8408_v2  ;;  %v4705_v51 = vpop.f32.mrb[47].mxu0 }
 0x7f8   :  { %v4706_v12 = vadd.f32 %v4705_v51, %v8411_v13 }
 0x7f9   :  { %v4834_v33 = vpack.c.bf16 %v4704_v28, %v4700_v10  ;;  %5525 = vmatmul.mubr.bf16.gmra.mrb[152].mxu0 %v8365_v63 }
 0x7fa   :  { %v4835_v32 = vpack.c.bf16 %v4706_v12, %v4702_v62  ;;  %5532 = vmatprep.mubr.bf16.mxu0 %v8377_v17 }
 0x7fc   :  { %v4709_v41 = vpop.f32.mrb[48].mxu0  ;;  %5044 = vmatprep.mubr.bf16.mxu1 %v4835_v32 }
 0x7fd   :  { %v4711_v6 = vpop.f32.mrb[49].mxu0  ;;  %5045 = vmatmul.mubr.bf16.gmra.mrb[76].mxu1 %v4834_v33  ;;  %v4710_v54 = vadd.f32 %v4709_v41, %v8408_v2 }
 0x7fe   :  { %v4713_v21 = vpop.f32.mrb[50].mxu0  ;;  %v4712_v48 = vadd.f32 %v4711_v6, %v8411_v13 }
 0x7ff   :  { %v4714_v9 = vadd.f32 %v4713_v21, %v8408_v2  ;;  %v4715_v45 = vpop.f32.mrb[51].mxu0 }
 0x800   :  { %v4716_v25 = vadd.f32 %v4715_v45, %v8411_v13 }
 0x801   :  { %v4836_v27 = vpack.c.bf16 %v4714_v9, %v4710_v54  ;;  %5533 = vmatmul.mubr.bf16.gmra.mrb[156].mxu0 %v8375_v7 }
 0x802   :  { %v4837_v63 = vpack.c.bf16 %v4716_v25, %v4712_v48 }
 0x804   :  { %v4719_v4 = vpop.f32.mrb[52].mxu0  ;;  %5052 = vmatprep.mubr.bf16.mxu1 %v4837_v63 }
 0x805   :  { %v4721_v17 = vpop.f32.mrb[53].mxu0  ;;  %5053 = vmatmul.mubr.bf16.gmra.mrb[80].mxu1 %v4836_v27  ;;  %v4720_v57 = vadd.f32 %v4719_v4, %v8408_v2  ;;  %v7089_v27 = vld [vmem:[%s8849_s9 + $0x10] sm:$0xff]  }
 0x806   :  { %v4723_v5 = vpop.f32.mrb[54].mxu0  ;;  %v4722_v29 = vadd.f32 %v4721_v17, %v8411_v13  ;;  %6489 = vmatprep.subr.bf16.mxu1 %v7089_v27 }
 0x807   :  { %v4724_v14 = vadd.f32 %v4723_v5, %v8408_v2  ;;  %v4725_v44 = vpop.f32.mrb[55].mxu0  ;;  %6490 = vmatpush3.bf16.msra.mxu1 %v7089_v27 }
 0x808   :  { %v4726_v53 = vadd.f32 %v4725_v44, %v8411_v13 }
 0x809   :  { %v4838_v7 = vpack.c.bf16 %v4724_v14, %v4720_v57 }
 0x80a   :  { %v4839_v30 = vpack.c.bf16 %v4726_v53, %v4722_v29 }
 0x80c   :  { %v4729_v38 = vpop.f32.mrb[56].mxu0  ;;  %5060 = vmatprep.mubr.bf16.mxu1 %v4839_v30 }
 0x80d   :  { %v4731_v24 = vpop.f32.mrb[57].mxu0  ;;  %5061 = vmatmul.mubr.bf16.gmra.mrb[84].mxu1 %v4838_v7  ;;  %v4730_v55 = vadd.f32 %v4729_v38, %v8408_v2 }
 0x80e   :  { %v4733_v35 = vpop.f32.mrb[58].mxu0  ;;  %v4732_v20 = vadd.f32 %v4731_v24, %v8411_v13 }
 0x80f   :  { %v4734_v18 = vadd.f32 %v4733_v35, %v8408_v2  ;;  %v4735_v15 = vpop.f32.mrb[59].mxu0 }
 0x810   :  { %v4736_v58 = vadd.f32 %v4735_v15, %v8411_v13 }
 0x811   :  { %v4840_v61 = vpack.c.bf16 %v4734_v18, %v4730_v55 }
 0x812   :  { %v4841_v42 = vpack.c.bf16 %v4736_v58, %v4732_v20 }
 0x814   :  { %v4739_v1 = vpop.f32.mrb[60].mxu0  ;;  %5068 = vmatprep.mubr.bf16.mxu1 %v4841_v42 }
 0x815   :  { %v4741_v40 = vpop.f32.mrb[61].mxu0  ;;  %5069 = vmatmul.mubr.bf16.gmra.mrb[88].mxu1 %v4840_v61  ;;  %v4740_v22 = vadd.f32 %v4739_v1, %v8408_v2  ;;  %v7090_v61 = vld [vmem:[%s8849_s9 + $0x18] sm:$0xff]  }
 0x816   :  { %v4743_v56 = vpop.f32.mrb[62].mxu0  ;;  %v4742_v47 = vadd.f32 %v4741_v40, %v8411_v13  ;;  %6491 = vmatprep.subr.bf16.mxu1 %v7090_v61 }
 0x817   :  { %v4744_v3 = vadd.f32 %v4743_v56, %v8408_v2  ;;  %v4745_v37 = vpop.f32.mrb[63].mxu0  ;;  %6492 = vmatpush3.bf16.msra.mxu1 %v7090_v61 }
 0x818   :  { %v4746_v59 = vadd.f32 %v4745_v37, %v8411_v13 }
 0x819   :  { %v4842_v10 = vpack.c.bf16 %v4744_v3, %v4740_v22 }
 0x81a   :  { %v4843_v28 = vpack.c.bf16 %v4746_v59, %v4742_v47  ;;  %v7091_v47 = vld [vmem:[%s8849_s9 + $0x20] sm:$0xff]  }
 0x81b   :  { %6493 = vmatprep.subr.bf16.mxu1 %v7091_v47 }
 0x81c   :  { %v4749_v51 = vpop.f32.mrb[64].mxu0  ;;  %5076 = vmatprep.mubr.bf16.mxu1 %v4843_v28  ;;  %6494 = vmatpush3.bf16.msra.mxu1 %v7091_v47 }
 0x81d   :  { %v4751_v62 = vpop.f32.mrb[65].mxu0  ;;  %5077 = vmatmul.mubr.bf16.gmra.mrb[92].mxu1 %v4842_v10  ;;  %v4750_v33 = vadd.f32 %v4749_v51, %v8408_v2 }
 0x81e   :  { %v4753_v12 = vpop.f32.mrb[66].mxu0  ;;  %v4752_v6 = vadd.f32 %v4751_v62, %v8411_v13 }
 0x81f   :  { %v4754_v32 = vadd.f32 %v4753_v12, %v8408_v2  ;;  %v4755_v41 = vpop.f32.mrb[67].mxu0 }
 0x820   :  { %v4756_v21 = vadd.f32 %v4755_v41, %v8411_v13 }
 0x821   :  { %v4844_v54 = vpack.c.bf16 %v4754_v32, %v4750_v33  ;;  %v7092_v32 = vld [vmem:[%s8849_s9 + $0x28] sm:$0xff]  }
 0x822   :  { %v4845_v9 = vpack.c.bf16 %v4756_v21, %v4752_v6  ;;  %6495 = vmatprep.subr.bf16.mxu1 %v7092_v32 }
 0x823   :  { %6496 = vmatpush3.bf16.msra.mxu1 %v7092_v32 }
 0x824   :  { %v4759_v45 = vpop.f32.mrb[68].mxu0  ;;  %5084 = vmatprep.mubr.bf16.mxu1 %v4845_v9 }
 0x825   :  { %v4761_v48 = vpop.f32.mrb[69].mxu0  ;;  %5085 = vmatmul.mubr.bf16.gmra.mrb[96].mxu1 %v4844_v54  ;;  %v4760_v63 = vadd.f32 %v4759_v45, %v8408_v2  ;;  %v7093_v54 = vld [vmem:[%s8849_s9 + $0x30] sm:$0xff]  }
 0x826   :  { %v4763_v25 = vpop.f32.mrb[70].mxu0  ;;  %v4762_v5 = vadd.f32 %v4761_v48, %v8411_v13  ;;  %6497 = vmatprep.subr.bf16.mxu1 %v7093_v54 }
 0x827   :  { %v4764_v4 = vadd.f32 %v4763_v25, %v8408_v2  ;;  %v4765_v17 = vpop.f32.mrb[71].mxu0  ;;  %6498 = vmatpush3.bf16.msra.mxu1 %v7093_v54 }
 0x828   :  { %v4766_v50 = vadd.f32 %v4765_v17, %v8411_v13  ;;  %v7094_v17 = vld [vmem:[%s8849_s9 + $0x38] sm:$0xff]  }
 0x829   :  { %v4846_v57 = vpack.c.bf16 %v4764_v4, %v4760_v63  ;;  %6499 = vmatprep.subr.bf16.mxu1 %v7094_v17 }
 0x82a   :  { %v4847_v14 = vpack.c.bf16 %v4766_v50, %v4762_v5 }
 0x82b   :  { %6500 = vmatpush3.bf16.msra.mxu1 %v7094_v17 }
 0x82c   :  { %v4769_v44 = vpop.f32.mrb[72].mxu0  ;;  %5092 = vmatprep.mubr.bf16.mxu1 %v4847_v14 }
 0x82d   :  { %v4771_v29 = vpop.f32.mrb[73].mxu0  ;;  %5093 = vmatmul.mubr.bf16.gmra.mrb[100].mxu1 %v4846_v57  ;;  %v4770_v7 = vadd.f32 %v4769_v44, %v8408_v2 }
 0x82e   :  { %v4773_v53 = vpop.f32.mrb[74].mxu0  ;;  %v4772_v24 = vadd.f32 %v4771_v29, %v8411_v13 }
 0x82f   :  { %v4774_v30 = vadd.f32 %v4773_v53, %v8408_v2  ;;  %v4775_v38 = vpop.f32.mrb[75].mxu0 }
 0x830   :  { %v4776_v35 = vadd.f32 %v4775_v38, %v8411_v13 }
 0x831   :  { %v4848_v55 = vpack.c.bf16 %v4774_v30, %v4770_v7 }
 0x832   :  { %v4849_v18 = vpack.c.bf16 %v4776_v35, %v4772_v24 }
 0x834   :  { %v4779_v15 = vpop.f32.mrb[76].mxu0  ;;  %5100 = vmatprep.mubr.bf16.mxu1 %v4849_v18 }
 0x835   :  { %v4781_v20 = vpop.f32.mrb[77].mxu0  ;;  %5101 = vmatmul.mubr.bf16.gmra.mrb[104].mxu1 %v4848_v55  ;;  %v4780_v42 = vadd.f32 %v4779_v15, %v8408_v2 }
 0x836   :  { %v4783_v58 = vpop.f32.mrb[78].mxu0  ;;  %v4782_v56 = vadd.f32 %v4781_v20, %v8411_v13 }
 0x837   :  { %v4784_v1 = vadd.f32 %v4783_v58, %v8408_v2  ;;  %v4785_v40 = vpop.f32.mrb[79].mxu0 }
 0x838   :  { %v4786_v0 = vadd.f32 %v4785_v40, %v8411_v13 }
 0x839   :  { %v4850_v22 = vpack.c.bf16 %v4784_v1, %v4780_v42 }
 0x83a   :  { %v4851_v3 = vpack.c.bf16 %v4786_v0, %v4782_v56 }
 0x83c   :  { %v4789_v37 = vpop.f32.mrb[80].mxu0  ;;  %5108 = vmatprep.mubr.bf16.mxu1 %v4851_v3 }
 0x83d   :  { %v4791_v59 = vpop.f32.mrb[81].mxu0  ;;  %5109 = vmatmul.mubr.bf16.gmra.mrb[108].mxu1 %v4850_v22  ;;  %v4790_v28 = vadd.f32 %v4789_v37, %v8408_v2 }
 0x83e   :  { %v4793_v10 = vpop.f32.mrb[82].mxu0  ;;  %v4792_v12 = vadd.f32 %v4791_v59, %v8411_v13 }
 0x83f   :  { %v4794_v51 = vadd.f32 %v4793_v10, %v8408_v2  ;;  %v4795_v62 = vpop.f32.mrb[83].mxu0 }
 0x840   :  { %v4796_v33 = vadd.f32 %v4795_v62, %v8411_v13 }
 0x841   :  { %v4852_v41 = vpack.c.bf16 %v4794_v51, %v4790_v28 }
 0x842   :  { %v4853_v6 = vpack.c.bf16 %v4796_v33, %v4792_v12 }
 0x844   :  { %v4799_v21 = vpop.f32.mrb[84].mxu0  ;;  %5116 = vmatprep.mubr.bf16.mxu1 %v4853_v6 }
 0x845   :  { %v4801_v9 = vpop.f32.mrb[85].mxu0  ;;  %5117 = vmatmul.mubr.bf16.gmra.mrb[112].mxu1 %v4852_v41  ;;  %v4800_v48 = vadd.f32 %v4799_v21, %v8408_v2 }
 0x846   :  { %v4803_v45 = vpop.f32.mrb[86].mxu0  ;;  %v4802_v63 = vadd.f32 %v4801_v9, %v8411_v13 }
 0x847   :  { %v4804_v25 = vadd.f32 %v4803_v45, %v8408_v2  ;;  %v4805_v27 = vpop.f32.mrb[87].mxu0 }
 0x848   :  { %v4806_v4 = vadd.f32 %v4805_v27, %v8411_v13 }
 0x849   :  { %v4854_v5 = vpack.c.bf16 %v4804_v25, %v4800_v48 }
 0x84a   :  { %v4855_v50 = vpack.c.bf16 %v4806_v4, %v4802_v63 }
 0x84c   :  { %v4809_v57 = vpop.f32.mrb[88].mxu0  ;;  %5124 = vmatprep.mubr.bf16.mxu1 %v4855_v50 }
 0x84d   :  { %v4811_v14 = vpop.f32.mrb[89].mxu0  ;;  %5125 = vmatmul.mubr.bf16.gmra.mrb[116].mxu1 %v4854_v5  ;;  %v4810_v29 = vadd.f32 %v4809_v57, %v8408_v2 }
 0x84e   :  { %v4813_v44 = vpop.f32.mrb[90].mxu0  ;;  %v4812_v30 = vadd.f32 %v4811_v14, %v8411_v13 }
 0x84f   :  { %v4814_v53 = vadd.f32 %v4813_v44, %v8408_v2  ;;  %v4815_v7 = vpop.f32.mrb[91].mxu0 }
 0x850   :  { %v4816_v38 = vadd.f32 %v4815_v7, %v8411_v13 }
 0x851   :  { %v4856_v24 = vpack.c.bf16 %v4814_v53, %v4810_v29 }
 0x852   :  { %v4857_v35 = vpack.c.bf16 %v4816_v38, %v4812_v30 }
 0x854   :  { %v4819_v55 = vpop.f32.mrb[92].mxu0  ;;  %5132 = vmatprep.mubr.bf16.mxu1 %v4857_v35 }
 0x855   :  { %v4821_v18 = vpop.f32.mrb[93].mxu0  ;;  %5133 = vmatmul.mubr.bf16.gmra.mrb[120].mxu1 %v4856_v24  ;;  %v4820_v20 = vadd.f32 %v4819_v55, %v8408_v2 }
 0x856   :  { %v4823_v15 = vpop.f32.mrb[94].mxu0  ;;  %v4822_v42 = vadd.f32 %v4821_v18, %v8411_v13 }
 0x857   :  { %v4824_v58 = vadd.f32 %v4823_v15, %v8408_v2  ;;  %v4825_v61 = vpop.f32.mrb[95].mxu0 }
 0x858   :  { %v4826_v1 = vadd.f32 %v4825_v61, %v8411_v13 }
 0x859   :  { %v4858_v40 = vpack.c.bf16 %v4824_v58, %v4820_v20 }
 0x85a   :  { %v4859_v56 = vpack.c.bf16 %v4826_v1, %v4822_v42 }
 0x85c   :  { %5140 = vmatprep.mubr.bf16.mxu1 %v4859_v56  ;;  %v6331_v0 = vpop.f32.mrb[96].mxu0 }
 0x85d   :  { %5141 = vmatmul.mubr.bf16.gmra.mrb[124].mxu1 %v4858_v40  ;;  %v6332_v22 = vpop.f32.mrb[97].mxu0 }
 0x85e   :  { %v8510_v3 = vadd.f32 %v6332_v22, %v6331_v0  ;;  %v6334_v37 = vpop.f32.mrb[98].mxu0 }
 0x85f   :  { %v6335_v47 = vpop.f32.mrb[99].mxu0 }
 0x860   :  { %v8512_v59 = vadd.f32 %v6335_v47, %v6334_v37 }
 0x864   :  { %v6337_v10 = vpop.f32.mrb[100].mxu0 }
 0x865   :  { %v6338_v28 = vpop.f32.mrb[101].mxu0 }
 0x866   :  { %v8514_v2 = vadd.f32 %v6338_v28, %v6337_v10  ;;  %v6340_v51 = vpop.f32.mrb[102].mxu0 }
 0x867   :  { %v6341_v62 = vpop.f32.mrb[103].mxu0 }
 0x868   :  { %v8516_v12 = vadd.f32 %v6341_v62, %v6340_v51 }
 0x86c   :  { %v6343_v13 = vpop.f32.mrb[104].mxu0 }
 0x86d   :  { %v6344_v33 = vpop.f32.mrb[105].mxu0 }
 0x86e   :  { %v8518_v32 = vadd.f32 %v6344_v33, %v6343_v13  ;;  %v6346_v41 = vpop.f32.mrb[106].mxu0 }
 0x86f   :  { %v6347_v6 = vpop.f32.mrb[107].mxu0 }
 0x870   :  { %v8520_v21 = vadd.f32 %v6347_v6, %v6346_v41 }
 0x874   :  { %v6349_v54 = vpop.f32.mrb[108].mxu0 }
 0x875   :  { %v6350_v9 = vpop.f32.mrb[109].mxu0 }
 0x876   :  { %v8522_v45 = vadd.f32 %v6350_v9, %v6349_v54  ;;  %v6352_v48 = vpop.f32.mrb[110].mxu0 }
 0x877   :  { %v6353_v25 = vpop.f32.mrb[111].mxu0 }
 0x878   :  { %v8524_v27 = vadd.f32 %v6353_v25, %v6352_v48 }
 0x87c   :  { %v6355_v63 = vpop.f32.mrb[112].mxu0 }
 0x87d   :  { %v6356_v4 = vpop.f32.mrb[113].mxu0 }
 0x87e   :  { %v8526_v17 = vadd.f32 %v6356_v4, %v6355_v63  ;;  %v6358_v5 = vpop.f32.mrb[114].mxu0 }
 0x87f   :  { %v6359_v50 = vpop.f32.mrb[115].mxu0 }
 0x880   :  { %v8528_v57 = vadd.f32 %v6359_v50, %v6358_v5 }
 0x884   :  { %v6361_v14 = vpop.f32.mrb[116].mxu0 }
 0x885   :  { %v6362_v44 = vpop.f32.mrb[117].mxu0 }
 0x886   :  { %v8530_v29 = vadd.f32 %v6362_v44, %v6361_v14  ;;  %v6364_v53 = vpop.f32.mrb[118].mxu0 }
 0x887   :  { %v6365_v7 = vpop.f32.mrb[119].mxu0 }
 0x888   :  { %v8532_v30 = vadd.f32 %v6365_v7, %v6364_v53 }
 0x88c   :  { %v6367_v38 = vpop.f32.mrb[120].mxu0 }
 0x88d   :  { %v6368_v24 = vpop.f32.mrb[121].mxu0 }
 0x88e   :  { %v8534_v35 = vadd.f32 %v6368_v24, %v6367_v38  ;;  %v6370_v55 = vpop.f32.mrb[122].mxu0 }
 0x88f   :  { %v6371_v18 = vpop.f32.mrb[123].mxu0 }
 0x890   :  { %v8536_v15 = vadd.f32 %v6371_v18, %v6370_v55  ;;  %v8561_v18 = vld [vmem:[%s8848_s8] ss:$0 sm:$0xff] }
 0x894   :  { %v6373_v20 = vpop.f32.mrb[124].mxu0 }
 0x895   :  { %v6374_v58 = vpop.f32.mrb[125].mxu0 }
 0x896   :  { %v8538_v61 = vadd.f32 %v6374_v58, %v6373_v20  ;;  %v6376_v42 = vpop.f32.mrb[126].mxu0 }
 0x897   :  { %v6377_v1 = vpop.f32.mrb[127].mxu0 }
 0x898   :  { %v8540_v40 = vadd.f32 %v6377_v1, %v6376_v42 }
 0x89c   :  { %v6379_v56 = vpop.f32.mrb[128].mxu0 }
 0x89d   :  { %v6380_v0 = vpop.f32.mrb[129].mxu0 }
 0x89e   :  { %v8542_v22 = vadd.f32 %v6380_v0, %v6379_v56  ;;  %v6382_v37 = vpop.f32.mrb[130].mxu0 }
 0x89f   :  { %v6383_v47 = vpop.f32.mrb[131].mxu0 }
 0x8a0   :  { %v8544_v10 = vadd.f32 %v6383_v47, %v6382_v37 }
 0x8a4   :  { %v6385_v28 = vpop.f32.mrb[132].mxu0 }
 0x8a5   :  { %v6386_v51 = vpop.f32.mrb[133].mxu0 }
 0x8a6   :  { %v8546_v62 = vadd.f32 %v6386_v51, %v6385_v28  ;;  %v6388_v13 = vpop.f32.mrb[134].mxu0 }
 0x8a7   :  { %v6389_v33 = vpop.f32.mrb[135].mxu0 }
 0x8a8   :  { %v8548_v41 = vadd.f32 %v6389_v33, %v6388_v13 }
 0x8ac   :  { %v6391_v6 = vpop.f32.mrb[136].mxu0 }
 0x8ad   :  { %v6392_v54 = vpop.f32.mrb[137].mxu0 }
 0x8ae   :  { %v8550_v9 = vadd.f32 %v6392_v54, %v6391_v6  ;;  %v6394_v48 = vpop.f32.mrb[138].mxu0 }
 0x8af   :  { %v6395_v25 = vpop.f32.mrb[139].mxu0 }
 0x8b0   :  { %v8552_v63 = vadd.f32 %v6395_v25, %v6394_v48 }
 0x8b4   :  { %v6397_v4 = vpop.f32.mrb[140].mxu0 }
 0x8b5   :  { %v6398_v5 = vpop.f32.mrb[141].mxu0 }
 0x8b6   :  { %v8554_v50 = vadd.f32 %v6398_v5, %v6397_v4  ;;  %v6400_v14 = vpop.f32.mrb[142].mxu0 }
 0x8b7   :  { %v6401_v44 = vpop.f32.mrb[143].mxu0 }
 0x8b8   :  { %v8556_v53 = vadd.f32 %v6401_v44, %v6400_v14  ;;  %v6219_v7 = vpop.f32.mrb[64].mxu1 }
 0x8b9   :  { %v6220_v38 = vpop.f32.mrb[65].mxu1 }
 0x8ba   :  { %v6221_v24 = vadd.f32 %v6220_v38, %v6219_v7  ;;  %v6222_v55 = vpop.f32.mrb[66].mxu1 }
 0x8bb   :  { %v6223_v20 = vpop.f32.mrb[67].mxu1 }
 0x8bc   :  { %v5023_v58 = vadd.f32 %v6221_v24, %v7533_v11  ;;  %v6224_v42 = vadd.f32 %v6223_v20, %v6222_v55  ;;  %v6403_v1 = vpop.f32.mrb[144].mxu0 }
 0x8bd   :  { %v6404_v56 = vpop.f32.mrb[145].mxu0 }
 0x8be   :  { %v5156_v0 = vadd.f32 %v8561_v18, %v5023_v58  ;;  %v5026_v37 = vadd.f32 %v6224_v42, %v7537_v19  ;;  %v8566_v47 = vadd.f32 %v6404_v56, %v6403_v1  ;;  %v6406_v28 = vpop.f32.mrb[146].mxu0 }
 0x8bf   :  { %v6407_v51 = vpop.f32.mrb[147].mxu0 }
 0x8c0   :  { %v5157_v13 = vadd.f32 %v8561_v18, %v5026_v37  ;;  %v8569_v33 = vadd.f32 %v6407_v51, %v6406_v28  ;;  %v6225_v6 = vpop.f32.mrb[68].mxu1  ;;  %v5188_v48 = vmax.f32 %v5156_v0, 0.0 }
 0x8c1   :  { %v6226_v54 = vpop.f32.mrb[69].mxu1 }
 0x8c2   :  { %v5189_v25 = vmax.f32 %v5157_v13, 0.0  ;;  %v6227_v11 = vadd.f32 %v6226_v54, %v6225_v6  ;;  %v6228_v4 = vpop.f32.mrb[70].mxu1 }
 0x8c3   :  { %v6229_v5 = vpop.f32.mrb[71].mxu1 }
 0x8c4   :  { %v5031_v14 = vadd.f32 %v7531_v8, %v6227_v11  ;;  %v6230_v44 = vadd.f32 %v6229_v5, %v6228_v4  ;;  %v6409_v7 = vpop.f32.mrb[148].mxu0  ;;  %v5220_v19 = vpack.c.bf16 %v5189_v25, %v5188_v48 }
 0x8c5   :  { %v6410_v38 = vpop.f32.mrb[149].mxu0 }
 0x8c6   :  { %v5158_v24 = vadd.f32 %v8561_v18, %v5031_v14  ;;  %v5034_v55 = vadd.f32 %v7535_v16, %v6230_v44  ;;  %v8574_v20 = vadd.f32 %v6410_v38, %v6409_v7  ;;  %v6412_v58 = vpop.f32.mrb[150].mxu0  ;;  %6501 = vmatprep.mubr.bf16.mxu1 %v5220_v19 }
 0x8c7   :  { %v6413_v42 = vpop.f32.mrb[151].mxu0 }
 0x8c8   :  { %v5159_v1 = vadd.f32 %v8561_v18, %v5034_v55  ;;  %v8577_v56 = vadd.f32 %v6413_v42, %v6412_v58  ;;  %v6231_v0 = vpop.f32.mrb[72].mxu1  ;;  %v5190_v8 = vmax.f32 %v5158_v24, 0.0 }
 0x8c9   :  { %v6232_v37 = vpop.f32.mrb[73].mxu1 }
 0x8ca   :  { %v5191_v28 = vmax.f32 %v5159_v1, 0.0  ;;  %v6233_v51 = vadd.f32 %v6232_v37, %v6231_v0  ;;  %v6234_v13 = vpop.f32.mrb[74].mxu1 }
 0x8cb   :  { %v6235_v6 = vpop.f32.mrb[75].mxu1 }
 0x8cc   :  { %v5221_v54 = vpack.c.bf16 %v5191_v28, %v5190_v8  ;;  %v5039_v48 = vadd.f32 %v6233_v51, %v7542_v26  ;;  %v6236_v16 = vadd.f32 %v6235_v6, %v6234_v13  ;;  %v6415_v25 = vpop.f32.mrb[152].mxu0 }
 0x8cd   :  { %v6416_v11 = vpop.f32.mrb[153].mxu0 }
 0x8ce   :  { %v5160_v4 = vadd.f32 %v8561_v18, %v5039_v48  ;;  %v5042_v5 = vadd.f32 %v6236_v16, %v7548_v34  ;;  %v8582_v14 = vadd.f32 %v6416_v11, %v6415_v25  ;;  %v6418_v44 = vpop.f32.mrb[154].mxu0  ;;  %6502 = vmatmul.mubr.bf16.vlgmr.msra.gmra.mrb[128].mxu1 %v5221_v54 }
 0x8cf   :  { %v6419_v7 = vpop.f32.mrb[155].mxu0 }
 0x8d0   :  { %v5161_v19 = vadd.f32 %v8561_v18, %v5042_v5  ;;  %v8585_v38 = vadd.f32 %v6419_v7, %v6418_v44  ;;  %v6237_v24 = vpop.f32.mrb[76].mxu1  ;;  %v5192_v58 = vmax.f32 %v5160_v4, 0.0 }
 0x8d1   :  { %v6238_v55 = vpop.f32.mrb[77].mxu1 }
 0x8d2   :  { %v5193_v26 = vmax.f32 %v5161_v19, 0.0  ;;  %v6239_v42 = vadd.f32 %v6238_v55, %v6237_v24  ;;  %v6240_v1 = vpop.f32.mrb[78].mxu1 }
 0x8d3   :  { %v6241_v0 = vpop.f32.mrb[79].mxu1 }
 0x8d4   :  { %v5047_v37 = vadd.f32 %v7539_v23, %v6239_v42  ;;  %v6242_v8 = vadd.f32 %v6241_v0, %v6240_v1  ;;  %v6421_v34 = vpop.f32.mrb[156].mxu0  ;;  %v5222_v28 = vpack.c.bf16 %v5193_v26, %v5192_v58 }
 0x8d5   :  { %v6422_v51 = vpop.f32.mrb[157].mxu0 }
 0x8d6   :  { %v5162_v13 = vadd.f32 %v8561_v18, %v5047_v37  ;;  %v5050_v6 = vadd.f32 %v7545_v31, %v6242_v8  ;;  %v8590_v54 = vadd.f32 %v6422_v51, %v6421_v34  ;;  %v6424_v48 = vpop.f32.mrb[158].mxu0  ;;  %6505 = vmatprep.mubr.bf16.mxu1 %v5222_v28 }
 0x8d7   :  { %v6425_v16 = vpop.f32.mrb[159].mxu0 }
 0x8d8   :  { %v5163_v25 = vadd.f32 %v8561_v18, %v5050_v6  ;;  %v8593_v11 = vadd.f32 %v6425_v16, %v6424_v48  ;;  %v6243_v4 = vpop.f32.mrb[80].mxu1  ;;  %v5194_v23 = vmax.f32 %v5162_v13, 0.0 }
 0x8d9   :  { %v6244_v5 = vpop.f32.mrb[81].mxu1 }
 0x8da   :  { %v5195_v44 = vmax.f32 %v5163_v25, 0.0  ;;  %v6245_v7 = vadd.f32 %v6244_v5, %v6243_v4  ;;  %v6246_v19 = vpop.f32.mrb[82].mxu1 }
 0x8db   :  { %v6247_v24 = vpop.f32.mrb[83].mxu1 }
 0x8dc   :  { %v5223_v55 = vpack.c.bf16 %v5195_v44, %v5194_v23  ;;  %v5055_v58 = vadd.f32 %v6245_v7, %v7553_v39  ;;  %v6248_v31 = vadd.f32 %v6247_v24, %v6246_v19 }
 0x8de   :  { %v5164_v26 = vadd.f32 %v8561_v18, %v5055_v58  ;;  %v5058_v42 = vadd.f32 %v6248_v31, %v7557_v46  ;;  %6506 = vmatmul.mubr.bf16.gmra.mrb[132].mxu1 %v5223_v55 }
 0x8e0   :  { %v5165_v1 = vadd.f32 %v8561_v18, %v5058_v42  ;;  %v6249_v0 = vpop.f32.mrb[84].mxu1  ;;  %v5196_v8 = vmax.f32 %v5164_v26, 0.0 }
 0x8e1   :  { %v6250_v37 = vpop.f32.mrb[85].mxu1 }
 0x8e2   :  { %v5197_v34 = vmax.f32 %v5165_v1, 0.0  ;;  %v6251_v28 = vadd.f32 %v6250_v37, %v6249_v0  ;;  %v6252_v51 = vpop.f32.mrb[86].mxu1 }
 0x8e3   :  { %v6253_v13 = vpop.f32.mrb[87].mxu1 }
 0x8e4   :  { %v5063_v6 = vadd.f32 %v7551_v36, %v6251_v28  ;;  %v6254_v48 = vadd.f32 %v6253_v13, %v6252_v51  ;;  %v5224_v16 = vpack.c.bf16 %v5197_v34, %v5196_v8 }
 0x8e6   :  { %v5166_v39 = vadd.f32 %v8561_v18, %v5063_v6  ;;  %v5066_v25 = vadd.f32 %v7555_v43, %v6254_v48  ;;  %6509 = vmatprep.mubr.bf16.mxu1 %v5224_v16  ;;  %v8870_v48 = vld [vmem:[#allocation5_spill] sm:$0xff] }
 0x8e8   :  { %v5167_v46 = vadd.f32 %v8561_v18, %v5066_v25  ;;  %v6255_v4 = vpop.f32.mrb[88].mxu1  ;;  %v5198_v23 = vmax.f32 %v5166_v39, 0.0 }
 0x8e9   :  { %v6256_v5 = vpop.f32.mrb[89].mxu1 }
 0x8ea   :  { %v5199_v44 = vmax.f32 %v5167_v46, 0.0  ;;  %v6257_v7 = vadd.f32 %v6256_v5, %v6255_v4  ;;  %v6258_v19 = vpop.f32.mrb[90].mxu1 }
 0x8eb   :  { %v6259_v24 = vpop.f32.mrb[91].mxu1 }
 0x8ec   :  { %v5225_v55 = vpack.c.bf16 %v5199_v44, %v5198_v23  ;;  %v5071_v58 = vadd.f32 %v6257_v7, %v7562_v52  ;;  %v6260_v36 = vadd.f32 %v6259_v24, %v6258_v19  ;;  %v8871_v19 = vld [vmem:[#allocation7_spill] sm:$0xff] }
 0x8ee   :  { %v5168_v31 = vadd.f32 %v8561_v18, %v5071_v58  ;;  %v5074_v26 = vadd.f32 %v6260_v36, %v7568_v60  ;;  %6510 = vmatmul.mubr.bf16.gmra.mrb[136].mxu1 %v5225_v55  ;;  %v8872_v58 = vld [vmem:[#allocation9_spill] sm:$0xff] }
 0x8f0   :  { %v5169_v43 = vadd.f32 %v8561_v18, %v5074_v26  ;;  %v6261_v42 = vpop.f32.mrb[92].mxu1  ;;  %v5200_v0 = vmax.f32 %v5168_v31, 0.0 }
 0x8f1   :  { %v6262_v1 = vpop.f32.mrb[93].mxu1 }
 0x8f2   :  { %v5201_v37 = vmax.f32 %v5169_v43, 0.0  ;;  %v6263_v8 = vadd.f32 %v6262_v1, %v6261_v42  ;;  %v6264_v34 = vpop.f32.mrb[94].mxu1 }
 0x8f3   :  { %v6265_v28 = vpop.f32.mrb[95].mxu1 }
 0x8f4   :  { %v5079_v51 = vadd.f32 %v7559_v49, %v6263_v8  ;;  %v6266_v13 = vadd.f32 %v6265_v28, %v6264_v34  ;;  %v5226_v6 = vpack.c.bf16 %v5201_v37, %v5200_v0  ;;  %v8873_v34 = vld [vmem:[#allocation6_spill] sm:$0xff] }
 0x8f6   :  { %v5170_v52 = vadd.f32 %v8561_v18, %v5079_v51  ;;  %v5082_v16 = vadd.f32 %v8870_v48, %v6266_v13  ;;  %6513 = vmatprep.mubr.bf16.mxu1 %v5226_v6 }
 0x8f8   :  { %v5171_v60 = vadd.f32 %v8561_v18, %v5082_v16  ;;  %v6267_v39 = vpop.f32.mrb[96].mxu1  ;;  %v5202_v46 = vmax.f32 %v5170_v52, 0.0  ;;  %v8874_v52 = vld [vmem:[#allocation8_spill] sm:$0xff] }
 0x8f9   :  { %v6268_v25 = vpop.f32.mrb[97].mxu1 }
 0x8fa   :  { %v5203_v4 = vmax.f32 %v5171_v60, 0.0  ;;  %v6269_v5 = vadd.f32 %v6268_v25, %v6267_v39  ;;  %v6270_v23 = vpop.f32.mrb[98].mxu1 }
 0x8fb   :  { %v6271_v44 = vpop.f32.mrb[99].mxu1 }
 0x8fc   :  { %v5227_v7 = vpack.c.bf16 %v5203_v4, %v5202_v46  ;;  %v5087_v24 = vadd.f32 %v6269_v5, %v8871_v19  ;;  %v6272_v49 = vadd.f32 %v6271_v44, %v6270_v23 }
 0x8fe   :  { %v5172_v55 = vadd.f32 %v8561_v18, %v5087_v24  ;;  %v5090_v36 = vadd.f32 %v6272_v49, %v8872_v58  ;;  %6514 = vmatmul.mubr.bf16.gmra.mrb[140].mxu1 %v5227_v7  ;;  %v8875_v7 = vld [vmem:[#allocation11_spill] sm:$0xff] }
 0x900   :  { %v5173_v31 = vadd.f32 %v8561_v18, %v5090_v36  ;;  %v6273_v26 = vpop.f32.mrb[100].mxu1  ;;  %v5204_v42 = vmax.f32 %v5172_v55, 0.0  ;;  %v8876_v55 = vld [vmem:[#allocation13_spill] sm:$0xff] }
 0x901   :  { %v6274_v43 = vpop.f32.mrb[101].mxu1 }
 0x902   :  { %v5205_v1 = vmax.f32 %v5173_v31, 0.0  ;;  %v6275_v0 = vadd.f32 %v6274_v43, %v6273_v26  ;;  %v6276_v37 = vpop.f32.mrb[102].mxu1 }
 0x903   :  { %v6277_v8 = vpop.f32.mrb[103].mxu1 }
 0x904   :  { %v5095_v28 = vadd.f32 %v8873_v34, %v6275_v0  ;;  %v6278_v51 = vadd.f32 %v6277_v8, %v6276_v37  ;;  %v5228_v13 = vpack.c.bf16 %v5205_v1, %v5204_v42  ;;  %v8877_v8 = vld [vmem:[#allocation10_spill] sm:$0xff] }
 0x906   :  { %v5174_v6 = vadd.f32 %v8561_v18, %v5095_v28  ;;  %v5098_v48 = vadd.f32 %v8874_v52, %v6278_v51  ;;  %6517 = vmatprep.mubr.bf16.mxu1 %v5228_v13 }
 0x908   :  { %v5175_v16 = vadd.f32 %v8561_v18, %v5098_v48  ;;  %v6279_v60 = vpop.f32.mrb[104].mxu1  ;;  %v5206_v25 = vmax.f32 %v5174_v6, 0.0  ;;  %v8878_v6 = vld [vmem:[#allocation12_spill] sm:$0xff] }
 0x909   :  { %v6280_v39 = vpop.f32.mrb[105].mxu1 }
 0x90a   :  { %v5207_v46 = vmax.f32 %v5175_v16, 0.0  ;;  %v6281_v4 = vadd.f32 %v6280_v39, %v6279_v60  ;;  %v6282_v5 = vpop.f32.mrb[106].mxu1 }
 0x90b   :  { %v6283_v23 = vpop.f32.mrb[107].mxu1 }
 0x90c   :  { %v5229_v44 = vpack.c.bf16 %v5207_v46, %v5206_v25  ;;  %v5103_v19 = vadd.f32 %v6281_v4, %v8875_v7  ;;  %v6284_v24 = vadd.f32 %v6283_v23, %v6282_v5 }
 0x90e   :  { %v5176_v49 = vadd.f32 %v8561_v18, %v5103_v19  ;;  %v5106_v58 = vadd.f32 %v6284_v24, %v8876_v55  ;;  %6518 = vmatmul.mubr.bf16.gmra.mrb[144].mxu1 %v5229_v44  ;;  %v8879_v44 = vld [vmem:[#allocation15_spill] sm:$0xff] }
 0x910   :  { %v5177_v36 = vadd.f32 %v8561_v18, %v5106_v58  ;;  %v6285_v31 = vpop.f32.mrb[108].mxu1  ;;  %v5208_v43 = vmax.f32 %v5176_v49, 0.0  ;;  %v8880_v49 = vld [vmem:[#allocation17_spill] sm:$0xff] }
 0x911   :  { %v6286_v26 = vpop.f32.mrb[109].mxu1 }
 0x912   :  { %v5209_v42 = vmax.f32 %v5177_v36, 0.0  ;;  %v6287_v1 = vadd.f32 %v6286_v26, %v6285_v31  ;;  %v6288_v0 = vpop.f32.mrb[110].mxu1 }
 0x913   :  { %v6289_v37 = vpop.f32.mrb[111].mxu1 }
 0x914   :  { %v5111_v34 = vadd.f32 %v8877_v8, %v6287_v1  ;;  %v6290_v28 = vadd.f32 %v6289_v37, %v6288_v0  ;;  %v5230_v51 = vpack.c.bf16 %v5209_v42, %v5208_v43  ;;  %v8881_v37 = vld [vmem:[#allocation14_spill] sm:$0xff] }
 0x916   :  { %v5178_v13 = vadd.f32 %v8561_v18, %v5111_v34  ;;  %v5114_v52 = vadd.f32 %v8878_v6, %v6290_v28  ;;  %6521 = vmatprep.mubr.bf16.mxu1 %v5230_v51 }
 0x918   :  { %v5179_v48 = vadd.f32 %v8561_v18, %v5114_v52  ;;  %v6291_v16 = vpop.f32.mrb[112].mxu1  ;;  %v5210_v39 = vmax.f32 %v5178_v13, 0.0  ;;  %v8882_v13 = vld [vmem:[#allocation16_spill] sm:$0xff] }
 0x919   :  { %v6292_v60 = vpop.f32.mrb[113].mxu1 }
 0x91a   :  { %v5211_v25 = vmax.f32 %v5179_v48, 0.0  ;;  %v6293_v46 = vadd.f32 %v6292_v60, %v6291_v16  ;;  %v6294_v4 = vpop.f32.mrb[114].mxu1 }
 0x91b   :  { %v6295_v5 = vpop.f32.mrb[115].mxu1 }
 0x91c   :  { %v5231_v23 = vpack.c.bf16 %v5211_v25, %v5210_v39  ;;  %v5119_v7 = vadd.f32 %v6293_v46, %v8879_v44  ;;  %v6296_v19 = vadd.f32 %v6295_v5, %v6294_v4 }
 0x91e   :  { %v5180_v24 = vadd.f32 %v8561_v18, %v5119_v7  ;;  %v5122_v55 = vadd.f32 %v6296_v19, %v8880_v49  ;;  %6522 = vmatmul.mubr.bf16.gmra.mrb[148].mxu1 %v5231_v23  ;;  %v8883_v23 = vld [vmem:[#allocation19_spill] sm:$0xff] }
 0x920   :  { %v5181_v58 = vadd.f32 %v8561_v18, %v5122_v55  ;;  %v6297_v36 = vpop.f32.mrb[116].mxu1  ;;  %v5212_v26 = vmax.f32 %v5180_v24, 0.0  ;;  %v8884_v24 = vld [vmem:[#allocation21_spill] sm:$0xff] }
 0x921   :  { %v6298_v31 = vpop.f32.mrb[117].mxu1 }
 0x922   :  { %v5213_v43 = vmax.f32 %v5181_v58, 0.0  ;;  %v6299_v42 = vadd.f32 %v6298_v31, %v6297_v36  ;;  %v6300_v1 = vpop.f32.mrb[118].mxu1 }
 0x923   :  { %v6301_v0 = vpop.f32.mrb[119].mxu1 }
 0x924   :  { %v5127_v8 = vadd.f32 %v8881_v37, %v6299_v42  ;;  %v6302_v34 = vadd.f32 %v6301_v0, %v6300_v1  ;;  %v5232_v28 = vpack.c.bf16 %v5213_v43, %v5212_v26  ;;  %v8885_v0 = vld [vmem:[#allocation18_spill] sm:$0xff] }
 0x926   :  { %v5182_v51 = vadd.f32 %v8561_v18, %v5127_v8  ;;  %v5130_v6 = vadd.f32 %v8882_v13, %v6302_v34  ;;  %6525 = vmatprep.mubr.bf16.mxu1 %v5232_v28 }
 0x928   :  { %v5183_v52 = vadd.f32 %v8561_v18, %v5130_v6  ;;  %v6303_v48 = vpop.f32.mrb[120].mxu1  ;;  %v5214_v60 = vmax.f32 %v5182_v51, 0.0  ;;  %v8886_v51 = vld [vmem:[#allocation20_spill] sm:$0xff] }
 0x929   :  { %v6304_v16 = vpop.f32.mrb[121].mxu1 }
 0x92a   :  { %v5215_v39 = vmax.f32 %v5183_v52, 0.0  ;;  %v6305_v25 = vadd.f32 %v6304_v16, %v6303_v48  ;;  %v6306_v46 = vpop.f32.mrb[122].mxu1 }
 0x92b   :  { %v6307_v4 = vpop.f32.mrb[123].mxu1 }
 0x92c   :  { %v5233_v5 = vpack.c.bf16 %v5215_v39, %v5214_v60  ;;  %v5135_v44 = vadd.f32 %v6305_v25, %v8883_v23  ;;  %v6308_v7 = vadd.f32 %v6307_v4, %v6306_v46  ;;  %v8646_v39 = vld [vmem:[%s8851_s11] ss:$0 sm:$0xff] }
 0x92e   :  { %v5184_v19 = vadd.f32 %v8561_v18, %v5135_v44  ;;  %v5138_v49 = vadd.f32 %v6308_v7, %v8884_v24  ;;  %6526 = vmatmul.mubr.bf16.gmra.mrb[152].mxu1 %v5233_v5 }
 0x930   :  { %v5185_v55 = vadd.f32 %v8561_v18, %v5138_v49  ;;  %v6309_v58 = vpop.f32.mrb[124].mxu1  ;;  %v5216_v31 = vmax.f32 %v5184_v19, 0.0 }
 0x931   :  { %v6310_v36 = vpop.f32.mrb[125].mxu1 }
 0x932   :  { %v5217_v26 = vmax.f32 %v5185_v55, 0.0  ;;  %v6311_v43 = vadd.f32 %v6310_v36, %v6309_v58  ;;  %v6312_v42 = vpop.f32.mrb[126].mxu1 }
 0x933   :  { %v6313_v1 = vpop.f32.mrb[127].mxu1 }
 0x934   :  { %v5143_v37 = vadd.f32 %v8885_v0, %v6311_v43  ;;  %v6314_v8 = vadd.f32 %v6313_v1, %v6312_v42  ;;  %v5234_v34 = vpack.c.bf16 %v5217_v26, %v5216_v31 }
 0x936   :  { %v5186_v28 = vadd.f32 %v8561_v18, %v5143_v37  ;;  %v5146_v13 = vadd.f32 %v8886_v51, %v6314_v8  ;;  %6529 = vmatprep.mubr.bf16.mxu1 %v5234_v34 }
 0x938   :  { %v5187_v6 = vadd.f32 %v8561_v18, %v5146_v13  ;;  %v5218_v52 = vmax.f32 %v5186_v28, 0.0 }
 0x93a   :  { %v5219_v48 = vmax.f32 %v5187_v6, 0.0 }
 0x93c   :  { %v5235_v16 = vpack.c.bf16 %v5219_v48, %v5218_v52 }
 0x93e   :  { %6530 = vmatmul.mubr.bf16.gmra.mrb[156].mxu1 %v5235_v16 }
 0x9a1   :  { %v6503_v60 = vpop.f32.mrb[128].mxu1 }
 0x9a2   :  { %v5632_v25 = vadd.f32 %v6503_v60, %v8514_v2  ;;  %v5623_v46 = vpop.f32.mrb[129].mxu1 }
 0x9a3   :  { %v5624_v4 = vadd.f32 %v8510_v3, %v5623_v46  ;;  %v6504_v5 = vpop.f32.mrb[130].mxu1 }
 0x9a4   :  { %v5759_v23 = vadd.f32 %v8646_v39, %v5632_v25  ;;  %v5635_v18 = vadd.f32 %v6504_v5, %v8516_v12  ;;  %v5626_v44 = vpop.f32.mrb[131].mxu1 }
 0x9a5   :  { %v5757_v7 = vadd.f32 %v8646_v39, %v5624_v4  ;;  %v5627_v19 = vadd.f32 %v8512_v59, %v5626_v44 }
 0x9a6   :  { %5792 = vst.msk [vmem:[%s8852_s12 + $0x10] sm:$0xff] %vm5789_vm2, %v5759_v23  ;;  %v5760_v2 = vadd.f32 %v8646_v39, %v5635_v18 }
 0x9a7   :  { %5790 = vst.msk [vmem:[%s8852_s12] sm:$0xff] %vm5789_vm2, %v5757_v7  ;;  %v5758_v3 = vadd.f32 %v8646_v39, %v5627_v19 }
 0x9a8   :  { %5793 = vst.msk [vmem:[%s8852_s12 + $0x18] sm:$0xff] %vm5789_vm2, %v5760_v2 }
 0x9a9   :  { %5791 = vst.msk [vmem:[%s8852_s12 + $0x8] sm:$0xff] %vm5789_vm2, %v5758_v3 }
 0x9b1   :  { %v6507_v59 = vpop.f32.mrb[132].mxu1 }
 0x9b2   :  { %v5648_v12 = vadd.f32 %v6507_v59, %v8522_v45  ;;  %v5639_v24 = vpop.f32.mrb[133].mxu1 }
 0x9b3   :  { %v5640_v49 = vadd.f32 %v8518_v32, %v5639_v24  ;;  %v6508_v55 = vpop.f32.mrb[134].mxu1 }
 0x9b4   :  { %v5763_v58 = vadd.f32 %v8646_v39, %v5648_v12  ;;  %v5651_v36 = vadd.f32 %v6508_v55, %v8524_v27  ;;  %v5642_v31 = vpop.f32.mrb[135].mxu1 }
 0x9b5   :  { %v5761_v26 = vadd.f32 %v8646_v39, %v5640_v49  ;;  %v5643_v43 = vadd.f32 %v8520_v21, %v5642_v31 }
 0x9b6   :  { %5796 = vst.msk [vmem:[%s8852_s12 + $0x30] sm:$0xff] %vm5789_vm2, %v5763_v58  ;;  %v5764_v45 = vadd.f32 %v8646_v39, %v5651_v36 }
 0x9b7   :  { %5794 = vst.msk [vmem:[%s8852_s12 + $0x20] sm:$0xff] %vm5789_vm2, %v5761_v26  ;;  %v5762_v32 = vadd.f32 %v8646_v39, %v5643_v43 }
 0x9b8   :  { %5797 = vst.msk [vmem:[%s8852_s12 + $0x38] sm:$0xff] %vm5789_vm2, %v5764_v45 }
 0x9b9   :  { %5795 = vst.msk [vmem:[%s8852_s12 + $0x28] sm:$0xff] %vm5789_vm2, %v5762_v32 }
 0x9c1   :  { %v6511_v21 = vpop.f32.mrb[136].mxu1 }
 0x9c2   :  { %v5664_v27 = vadd.f32 %v6511_v21, %v8530_v29  ;;  %v5655_v42 = vpop.f32.mrb[137].mxu1 }
 0x9c3   :  { %v5656_v1 = vadd.f32 %v8526_v17, %v5655_v42  ;;  %v6512_v0 = vpop.f32.mrb[138].mxu1 }
 0x9c4   :  { %v5767_v37 = vadd.f32 %v8646_v39, %v5664_v27  ;;  %v5667_v8 = vadd.f32 %v6512_v0, %v8532_v30  ;;  %v5658_v34 = vpop.f32.mrb[139].mxu1 }
 0x9c5   :  { %v5765_v28 = vadd.f32 %v8646_v39, %v5656_v1  ;;  %v5659_v51 = vadd.f32 %v8528_v57, %v5658_v34 }
 0x9c6   :  { %5800 = vst.msk [vmem:[%s8852_s12 + $0x50] sm:$0xff] %vm5789_vm2, %v5767_v37  ;;  %v5768_v29 = vadd.f32 %v8646_v39, %v5667_v8 }
 0x9c7   :  { %5798 = vst.msk [vmem:[%s8852_s12 + $0x40] sm:$0xff] %vm5789_vm2, %v5765_v28  ;;  %v5766_v17 = vadd.f32 %v8646_v39, %v5659_v51 }
 0x9c8   :  { %5801 = vst.msk [vmem:[%s8852_s12 + $0x58] sm:$0xff] %vm5789_vm2, %v5768_v29 }
 0x9c9   :  { %5799 = vst.msk [vmem:[%s8852_s12 + $0x48] sm:$0xff] %vm5789_vm2, %v5766_v17 }
 0x9d1   :  { %v6515_v57 = vpop.f32.mrb[140].mxu1 }
 0x9d2   :  { %v5680_v30 = vadd.f32 %v6515_v57, %v8538_v61  ;;  %v5671_v13 = vpop.f32.mrb[141].mxu1 }
 0x9d3   :  { %v5672_v6 = vadd.f32 %v8534_v35, %v5671_v13  ;;  %v6516_v52 = vpop.f32.mrb[142].mxu1 }
 0x9d4   :  { %v5771_v48 = vadd.f32 %v8646_v39, %v5680_v30  ;;  %v5683_v16 = vadd.f32 %v6516_v52, %v8540_v40  ;;  %v5674_v60 = vpop.f32.mrb[143].mxu1 }
 0x9d5   :  { %v5769_v25 = vadd.f32 %v8646_v39, %v5672_v6  ;;  %v5675_v46 = vadd.f32 %v8536_v15, %v5674_v60 }
 0x9d6   :  { %5804 = vst.msk [vmem:[%s8852_s12 + $0x70] sm:$0xff] %vm5789_vm2, %v5771_v48  ;;  %v5772_v61 = vadd.f32 %v8646_v39, %v5683_v16 }
 0x9d7   :  { %5802 = vst.msk [vmem:[%s8852_s12 + $0x60] sm:$0xff] %vm5789_vm2, %v5769_v25  ;;  %v5770_v35 = vadd.f32 %v8646_v39, %v5675_v46 }
 0x9d8   :  { %5805 = vst.msk [vmem:[%s8852_s12 + $0x78] sm:$0xff] %vm5789_vm2, %v5772_v61 }
 0x9d9   :  { %5803 = vst.msk [vmem:[%s8852_s12 + $0x68] sm:$0xff] %vm5789_vm2, %v5770_v35 }
 0x9e1   :  { %v6519_v15 = vpop.f32.mrb[144].mxu1 }
 0x9e2   :  { %v5696_v40 = vadd.f32 %v6519_v15, %v8546_v62  ;;  %v5687_v4 = vpop.f32.mrb[145].mxu1 }
 0x9e3   :  { %v5688_v5 = vadd.f32 %v8542_v22, %v5687_v4  ;;  %v6520_v23 = vpop.f32.mrb[146].mxu1 }
 0x9e4   :  { %v5775_v18 = vadd.f32 %v8646_v39, %v5696_v40  ;;  %v5699_v44 = vadd.f32 %v6520_v23, %v8548_v41  ;;  %v5690_v7 = vpop.f32.mrb[147].mxu1 }
 0x9e5   :  { %v5773_v19 = vadd.f32 %v8646_v39, %v5688_v5  ;;  %v5691_v2 = vadd.f32 %v8544_v10, %v5690_v7 }
 0x9e6   :  { %5808 = vst.msk [vmem:[%s8852_s12 + $0x90] sm:$0xff] %vm5789_vm2, %v5775_v18  ;;  %v5776_v62 = vadd.f32 %v8646_v39, %v5699_v44 }
 0x9e7   :  { %5806 = vst.msk [vmem:[%s8852_s12 + $0x80] sm:$0xff] %vm5789_vm2, %v5773_v19  ;;  %v5774_v22 = vadd.f32 %v8646_v39, %v5691_v2 }
 0x9e8   :  { %5809 = vst.msk [vmem:[%s8852_s12 + $0x98] sm:$0xff] %vm5789_vm2, %v5776_v62 }
 0x9e9   :  { %5807 = vst.msk [vmem:[%s8852_s12 + $0x88] sm:$0xff] %vm5789_vm2, %v5774_v22 }
 0x9f1   :  { %v6523_v10 = vpop.f32.mrb[148].mxu1 }
 0x9f2   :  { %v5712_v41 = vadd.f32 %v6523_v10, %v8554_v50  ;;  %v5703_v3 = vpop.f32.mrb[149].mxu1 }
 0x9f3   :  { %v5704_v59 = vadd.f32 %v8550_v9, %v5703_v3  ;;  %v6524_v12 = vpop.f32.mrb[150].mxu1 }
 0x9f4   :  { %v5779_v24 = vadd.f32 %v8646_v39, %v5712_v41  ;;  %v5715_v49 = vadd.f32 %v6524_v12, %v8556_v53  ;;  %v5706_v55 = vpop.f32.mrb[151].mxu1 }
 0x9f5   :  { %v5777_v58 = vadd.f32 %v8646_v39, %v5704_v59  ;;  %v5707_v36 = vadd.f32 %v8552_v63, %v5706_v55 }
 0x9f6   :  { %5812 = vst.msk [vmem:[%s8852_s12 + $0xb0] sm:$0xff] %vm5789_vm2, %v5779_v24  ;;  %v5780_v50 = vadd.f32 %v8646_v39, %v5715_v49 }
 0x9f7   :  { %5810 = vst.msk [vmem:[%s8852_s12 + $0xa0] sm:$0xff] %vm5789_vm2, %v5777_v58  ;;  %v5778_v9 = vadd.f32 %v8646_v39, %v5707_v36 }
 0x9f8   :  { %5813 = vst.msk [vmem:[%s8852_s12 + $0xb8] sm:$0xff] %vm5789_vm2, %v5780_v50 }
 0x9f9   :  { %5811 = vst.msk [vmem:[%s8852_s12 + $0xa8] sm:$0xff] %vm5789_vm2, %v5778_v9 }
 0xa01   :  { %v6527_v63 = vpop.f32.mrb[152].mxu1 }
 0xa02   :  { %v5728_v53 = vadd.f32 %v6527_v63, %v8574_v20  ;;  %v5719_v31 = vpop.f32.mrb[153].mxu1 }
 0xa03   :  { %v5720_v26 = vadd.f32 %v8566_v47, %v5719_v31  ;;  %v6528_v43 = vpop.f32.mrb[154].mxu1 }
 0xa04   :  { %v5783_v45 = vadd.f32 %v8646_v39, %v5728_v53  ;;  %v5731_v32 = vadd.f32 %v6528_v43, %v8577_v56  ;;  %v5722_v21 = vpop.f32.mrb[155].mxu1 }
 0xa05   :  { %v5781_v27 = vadd.f32 %v8646_v39, %v5720_v26  ;;  %v5723_v42 = vadd.f32 %v8569_v33, %v5722_v21 }
 0xa06   :  { %5816 = vst.msk [vmem:[%s8852_s12 + $0xd0] sm:$0xff] %vm5789_vm2, %v5783_v45  ;;  %v5784_v20 = vadd.f32 %v8646_v39, %v5731_v32 }
 0xa07   :  { %5814 = vst.msk [vmem:[%s8852_s12 + $0xc0] sm:$0xff] %vm5789_vm2, %v5781_v27  ;;  %v5782_v47 = vadd.f32 %v8646_v39, %v5723_v42 }
 0xa08   :  { %5817 = vst.msk [vmem:[%s8852_s12 + $0xd8] sm:$0xff] %vm5789_vm2, %v5784_v20 }
 0xa09   :  { %5815 = vst.msk [vmem:[%s8852_s12 + $0xc8] sm:$0xff] %vm5789_vm2, %v5782_v47 }
 0xa11   :  { %v6531_v33 = vpop.f32.mrb[156].mxu1 }
 0xa12   :  { %v5744_v56 = vadd.f32 %v6531_v33, %v8590_v54  ;;  %v5735_v1 = vpop.f32.mrb[157].mxu1 }
 0xa13   :  { %v5736_v0 = vadd.f32 %v8582_v14, %v5735_v1  ;;  %v6532_v37 = vpop.f32.mrb[158].mxu1 }
 0xa14   :  { %v5787_v8 = vadd.f32 %v8646_v39, %v5744_v56  ;;  %v5747_v34 = vadd.f32 %v6532_v37, %v8593_v11  ;;  %v5738_v28 = vpop.f32.mrb[159].mxu1 }
 0xa15   :  { %v5785_v51 = vadd.f32 %v8646_v39, %v5736_v0  ;;  %v5739_v29 = vadd.f32 %v8585_v38, %v5738_v28 }
 0xa16   :  { %5820 = vst.msk [vmem:[%s8852_s12 + $0xf0] sm:$0xff] %vm5789_vm2, %v5787_v8  ;;  %v5788_v54 = vadd.f32 %v8646_v39, %v5747_v34 }
 0xa17   :  { %5818 = vst.msk [vmem:[%s8852_s12 + $0xe0] sm:$0xff] %vm5789_vm2, %v5785_v51  ;;  %v5786_v14 = vadd.f32 %v8646_v39, %v5739_v29 }
 0xa18   :  { %5821 = vst.msk [vmem:[%s8852_s12 + $0xf8] sm:$0xff] %vm5789_vm2, %v5788_v54 }
 0xa19   :  { %5819 = vst.msk [vmem:[%s8852_s12 + $0xe8] sm:$0xff] %vm5789_vm2, %v5786_v14 }
 0xa1a   :  { %5826 = vsyncpa [#allocation3], 1 }

</bundles_post_ra>
